<compile_context>
chip_gen: v7x
topology: tpu7x:2x2x1
jax: 0.10.0
libtpu: 0.0.40
codegen_flags: <defaults>
</compile_context>

<pallas_src>
import functools

import jax
import jax.numpy as jnp
from jax.experimental import pallas as pl
from jax.experimental.pallas import tpu as pltpu

# ----------------------- small ViT configuration -----------------------
PATCH = 8             # patch size (timm vit_base uses 16; scaled down)
IMG = 16              # image spatial size
C_IN = 3              # input channels
EMBED = 32            # embed_dim (timm vit_base uses 768; scaled down)
DEPTH = 2             # number of transformer blocks
HEADS = 4
HEAD_DIM = EMBED // HEADS            # 8
MLP_HIDDEN = 4 * EMBED               # 128
NUM_PATCHES = (IMG // PATCH) ** 2    # 4
NUM_TOKENS = NUM_PATCHES + 1         # 5 (+ CLS token)
NUM_CLASSES = 1
HEAD_H1 = 512
HEAD_H2 = 256
LN_EPS_BACKBONE = 1e-6               # timm ViT norm eps
LN_EPS_HEAD = 1e-5                   # nn.LayerNorm default eps
PATCH_DIM = C_IN * PATCH * PATCH     # 192

# ----------------------- packed parameter slab layout -----------------------
LANE = 128            # backbone slab width (lane-dense, one vreg wide)
HEAD_LANE = 512       # classifier-head slab width

# backbone bf16 weight slab (rows, LANE)
PATCH_W_OFF = 0                      # patch_w  (PATCH_DIM, EMBED)
BLK_W_OFF = PATCH_DIM                # per-block chunks follow
WQKV_OFF = 0                         # (EMBED, 3*EMBED)
WO_OFF = EMBED                       # (EMBED, EMBED)
W1_OFF = 2 * EMBED                   # (EMBED, MLP_HIDDEN)
W2_OFF = 3 * EMBED                   # (MLP_HIDDEN, EMBED)
BLK_W_ROWS = 3 * EMBED + MLP_HIDDEN  # 224
BWSLAB_ROWS = PATCH_DIM + DEPTH * BLK_W_ROWS   # 640

# head bf16 weight slab (rows, HEAD_LANE)
HW1_OFF = 0                          # (EMBED, 512)
HW2_OFF = EMBED                      # (512, 256) col-padded
HW3_OFF = EMBED + HEAD_H1            # (256, NUM_CLASSES) col-padded
HWSLAB_ROWS = EMBED + HEAD_H1 + HEAD_H2        # 800

# per-block f32 vector page rows (DEPTH, 8, LANE)
(VROW_LN1W, VROW_LN1B, VROW_BQKV, VROW_BO,
 VROW_LN2W, VROW_LN2B, VROW_B1, VROW_B2) = range(8)

# head f32 vector page rows (8, HEAD_LANE)
(HVROW_BN_W, HVROW_BN_B, HVROW_CLN_W, HVROW_CLN_B,
 HVROW_HB1, HVROW_HB2, HVROW_HB3, HVROW_PAD) = range(8)


def _layernorm(x, w, b, eps):
    mu = jnp.mean(x, axis=-1, keepdims=True)
    var = jnp.mean(jnp.square(x - mu), axis=-1, keepdims=True)
    return (x - mu) * jax.lax.rsqrt(var + eps) * w + b


def _gelu(x):
    # TODO(synk): PyTorch nn.GELU default is the exact erf formulation; the
    # tanh approximation is used for robust Mosaic lowering (|diff| ~1e-3).
    return jax.nn.gelu(x, approximate=True)


# --------------------------- fused Pallas kernel ---------------------------
def fused_vit_kernel(patches_ref, template_ref, mask_ref,
                     bw_ref, bv_ref, hw_ref, hv_ref, o_ref, *, batch):
    """Whole ViT forward for all batch elements in one kernel invocation."""
    B = batch
    T = NUM_TOKENS
    BT = B * T
    scale = 1.0 / (HEAD_DIM ** 0.5)

    def bf(v):
        return v.astype(jnp.bfloat16)

    def mm(a, b):
        # bf16 MXU matmul with f32 accumulation; `b` is already bf16.
        return jnp.dot(bf(a), b, preferred_element_type=jnp.float32)

    # ---- patch embedding + CLS/positional template (one matmul + one add) ----
    patch_w = bw_ref[PATCH_W_OFF:PATCH_W_OFF + PATCH_DIM, :]       # (192,128) bf16
    emb = mm(patches_ref[...], patch_w)                            # (BT,128) f32
    x = emb[:, :EMBED] + template_ref[...]                         # (BT,32)  f32

    mask = mask_ref[...]                                           # (BT,BT) additive

    # ---- transformer blocks (Python-unrolled; activations stay on-core) ----
    for d in range(DEPTH):
        base = BLK_W_OFF + d * BLK_W_ROWS
        wqkv = bw_ref[base + WQKV_OFF:base + WQKV_OFF + EMBED, :]       # (32,128)
        wo = bw_ref[base + WO_OFF:base + WO_OFF + EMBED, :]             # (32,128)
        w1 = bw_ref[base + W1_OFF:base + W1_OFF + EMBED, :]             # (32,128)
        w2 = bw_ref[base + W2_OFF:base + W2_OFF + MLP_HIDDEN, :]        # (128,128)
        vec = bv_ref[d]                                                 # (8,128) f32

        ln1w = vec[VROW_LN1W:VROW_LN1W + 1, :EMBED]
        ln1b = vec[VROW_LN1B:VROW_LN1B + 1, :EMBED]
        bqkv = vec[VROW_BQKV:VROW_BQKV + 1, :]
        bo = vec[VROW_BO:VROW_BO + 1, :]
        ln2w = vec[VROW_LN2W:VROW_LN2W + 1, :EMBED]
        ln2b = vec[VROW_LN2B:VROW_LN2B + 1, :EMBED]
        b1 = vec[VROW_B1:VROW_B1 + 1, :]
        b2 = vec[VROW_B2:VROW_B2 + 1, :]

        # --- multi-head self-attention, block-diagonal over the batch ---
        h = _layernorm(x, ln1w, ln1b, LN_EPS_BACKBONE)             # (BT,32)
        qkv = mm(h, wqkv) + bqkv                                   # (BT,128); cols 0:96 valid
        head_outs = []
        for hi in range(HEADS):
            q = qkv[:, hi * HEAD_DIM:(hi + 1) * HEAD_DIM] * scale
            k = qkv[:, EMBED + hi * HEAD_DIM:EMBED + (hi + 1) * HEAD_DIM]
            v = qkv[:, 2 * EMBED + hi * HEAD_DIM:2 * EMBED + (hi + 1) * HEAD_DIM]
            s = jax.lax.dot_general(bf(q), bf(k), (((1,), (1,)), ((), ())),
                                    preferred_element_type=jnp.float32)
            s = s + mask                                           # cross-batch -> -1e9
            s = s - jnp.max(s, axis=-1, keepdims=True)
            p = jnp.exp(s)
            p = p / jnp.sum(p, axis=-1, keepdims=True)             # exact softmax
            head_outs.append(mm(p, bf(v)))                         # (BT, HEAD_DIM)
        attn_cat = jnp.concatenate(head_outs, axis=-1)             # (BT,32)
        attn = mm(attn_cat, wo) + bo                               # (BT,128)
        x = x + attn[:, :EMBED]

        # --- MLP ---
        h2 = _layernorm(x, ln2w, ln2b, LN_EPS_BACKBONE)
        h2 = mm(h2, w1) + b1                                       # (BT,128)
        h2 = _gelu(h2)
        h2 = mm(h2, w2) + b2                                       # (BT,128); cols 0:32 valid
        x = x + h2[:, :EMBED]

    # ---- CLS pooling via one-hot selector matmul (no sublane gathers) ----
    col = jax.lax.broadcasted_iota(jnp.int32, (B, BT), 1)
    row = jax.lax.broadcasted_iota(jnp.int32, (B, BT), 0)
    sel = jnp.where(col == row * T, 1.0, 0.0).astype(jnp.float32)  # (B, BT)
    cls = jnp.dot(sel, x, preferred_element_type=jnp.float32)      # (B, 32) exact row pick

    # ---- backbone final norm + classifier head (dropouts are identity) ----
    hv = hv_ref[...]                                               # (8,512) f32
    bn_w = hv[HVROW_BN_W:HVROW_BN_W + 1, :EMBED]
    bn_b = hv[HVROW_BN_B:HVROW_BN_B + 1, :EMBED]
    cln_w = hv[HVROW_CLN_W:HVROW_CLN_W + 1, :EMBED]
    cln_b = hv[HVROW_CLN_B:HVROW_CLN_B + 1, :EMBED]
    hb1 = hv[HVROW_HB1:HVROW_HB1 + 1, :]
    hb2 = hv[HVROW_HB2:HVROW_HB2 + 1, :]
    hb3 = hv[HVROW_HB3:HVROW_HB3 + 1, :]

    cls = _layernorm(cls, bn_w, bn_b, LN_EPS_BACKBONE)   # timm backbone.norm
    cls = _layernorm(cls, cln_w, cln_b, LN_EPS_HEAD)     # classifier LayerNorm

    hw1 = hw_ref[HW1_OFF:HW1_OFF + EMBED, :]             # (32,512)  bf16
    hw2 = hw_ref[HW2_OFF:HW2_OFF + HEAD_H1, :]           # (512,512) bf16, 256 valid
    hw3 = hw_ref[HW3_OFF:HW3_OFF + HEAD_H2, :]           # (256,512) bf16, 1 valid

    y = _gelu(mm(cls, hw1) + hb1)                        # (B,512)
    y = _gelu(mm(y, hw2) + hb2)                          # (B,512); cols 256: are 0
    y = mm(y[:, :HEAD_H2], hw3) + hb3                    # (B,512); col 0 valid
    o_ref[...] = y[:, :LANE]                             # lane-dense (B,128) store


# ------------------------------ wrapper glue ------------------------------
def extract_patches(x):
    """NCHW -> (B, num_patches, C*P*P); matches Conv2d(stride=P, kernel=P)."""
    B, C, H, W = x.shape
    ph, pw = H // PATCH, W // PATCH
    x = x.reshape(B, C, ph, PATCH, pw, PATCH)
    x = x.transpose(0, 2, 4, 1, 3, 5)            # (B, ph, pw, C, P, P)
    return x.reshape(B, ph * pw, C * PATCH * PATCH)


def _pack_tokens(x):
    """(B,C,H,W) -> (B*T, PATCH_DIM) bf16 with a zero row at each CLS slot."""
    B = x.shape[0]
    patches = extract_patches(x)
    tok = jnp.concatenate(
        [jnp.zeros((B, 1, PATCH_DIM), patches.dtype), patches], axis=1)
    return tok.reshape(B * NUM_TOKENS, PATCH_DIM).astype(jnp.bfloat16)


def _block_diag_mask(batch):
    idx = jnp.repeat(jnp.arange(batch), NUM_TOKENS)
    same = idx[:, None] == idx[None, :]
    return jnp.where(same, 0.0, -1e9).astype(jnp.float32)


def vit_forward(x, bw, bv, hw, hv, template):
    B = x.shape[0]
    patches = _pack_tokens(x)                          # (B*T, 192) bf16
    tmpl = jnp.tile(template, (B, 1))                  # (B*T, 32)  f32
    mask = _block_diag_mask(B)                         # (B*T, B*T) f32

    out = pl.pallas_call(
        functools.partial(fused_vit_kernel, batch=B),
        out_shape=jax.ShapeDtypeStruct((B, LANE), jnp.float32),
        in_specs=[pl.BlockSpec(memory_space=pltpu.MemorySpace.VMEM)] * 7,
        out_specs=pl.BlockSpec(memory_space=pltpu.MemorySpace.VMEM),
    )(patches, tmpl, mask, bw, bv, hw, hv)
    return out[:, :NUM_CLASSES]


# --------------------------- parameter init / pack ---------------------------
def init_params(key):
    keys = list(jax.random.split(key, 32))
    ki = iter(keys)

    def nrm(shape, std=0.02):
        return jax.random.normal(next(ki), shape, jnp.float32) * std

    def trunc(shape, std=0.02):
        return jax.random.truncated_normal(next(ki), -2.0, 2.0, shape,
                                           jnp.float32) * std

    p = {}
    p["patch_w"] = nrm((PATCH_DIM, EMBED))
    p["patch_b"] = jnp.zeros((EMBED,), jnp.float32)
    p["cls_token"] = nrm((1, EMBED))
    p["pos_embed"] = nrm((NUM_TOKENS, EMBED))

    blocks = []
    for _ in range(DEPTH):
        blocks.append(dict(
            ln1_w=jnp.ones((EMBED,), jnp.float32),
            ln1_b=jnp.zeros((EMBED,), jnp.float32),
            wqkv=nrm((EMBED, 3 * EMBED)),
            bqkv=jnp.zeros((3 * EMBED,), jnp.float32),
            wo=nrm((EMBED, EMBED)),
            bo=jnp.zeros((EMBED,), jnp.float32),
            ln2_w=jnp.ones((EMBED,), jnp.float32),
            ln2_b=jnp.zeros((EMBED,), jnp.float32),
            w1=nrm((EMBED, MLP_HIDDEN)),
            b1=jnp.zeros((MLP_HIDDEN,), jnp.float32),
            w2=nrm((MLP_HIDDEN, EMBED)),
            b2=jnp.zeros((EMBED,), jnp.float32),
        ))
    p["blocks"] = blocks

    p["bn_w"] = jnp.ones((EMBED,), jnp.float32)
    p["bn_b"] = jnp.zeros((EMBED,), jnp.float32)
    # classifier: LayerNorm -> Linear(D,512) -> GELU -> Linear(512,256) -> GELU
    #             -> Linear(256,num_classes); trunc_normal(0.02) init.
    p["cls_ln_w"] = jnp.ones((EMBED,), jnp.float32)
    p["cls_ln_b"] = jnp.zeros((EMBED,), jnp.float32)
    p["head_w1"] = trunc((EMBED, HEAD_H1))
    p["head_b1"] = jnp.zeros((HEAD_H1,), jnp.float32)
    p["head_w2"] = trunc((HEAD_H1, HEAD_H2))
    p["head_b2"] = jnp.zeros((HEAD_H2,), jnp.float32)
    p["head_w3"] = trunc((HEAD_H2, NUM_CLASSES))
    p["head_b3"] = jnp.zeros((NUM_CLASSES,), jnp.float32)
    return p


def _pad_cols(a, width):
    return jnp.pad(a, ((0, 0), (0, width - a.shape[1])))


def _pad_vec(v, width):
    return jnp.pad(v, (0, width - v.shape[0]))


def pack_params(p):
    """Pack all parameters into 4 VMEM slabs + the (T, D) token template."""
    # backbone bf16 weight slab, lane width 128
    rows = [_pad_cols(p["patch_w"], LANE)]
    for blk in p["blocks"]:
        rows.append(_pad_cols(blk["wqkv"], LANE))
        rows.append(_pad_cols(blk["wo"], LANE))
        rows.append(_pad_cols(blk["w1"], LANE))
        rows.append(_pad_cols(blk["w2"], LANE))
    bw = jnp.concatenate(rows, axis=0).astype(jnp.bfloat16)
    assert bw.shape == (BWSLAB_ROWS, LANE)

    # per-block f32 vector pages (DEPTH, 8, 128)
    pages = []
    for blk in p["blocks"]:
        pages.append(jnp.stack([
            _pad_vec(blk["ln1_w"], LANE), _pad_vec(blk["ln1_b"], LANE),
            _pad_vec(blk["bqkv"], LANE), _pad_vec(blk["bo"], LANE),
            _pad_vec(blk["ln2_w"], LANE), _pad_vec(blk["ln2_b"], LANE),
            _pad_vec(blk["b1"], LANE), _pad_vec(blk["b2"], LANE)], axis=0))
    bv = jnp.stack(pages, axis=0).astype(jnp.float32)
    assert bv.shape == (DEPTH, 8, LANE)

    # classifier-head bf16 weight slab, lane width 512
    hw = jnp.concatenate([
        _pad_cols(p["head_w1"], HEAD_LANE),
        _pad_cols(p["head_w2"], HEAD_LANE),
        _pad_cols(p["head_w3"], HEAD_LANE)], axis=0).astype(jnp.bfloat16)
    assert hw.shape == (HWSLAB_ROWS, HEAD_LANE)

    # head f32 vector page (8, 512)
    hv = jnp.stack([
        _pad_vec(p["bn_w"], HEAD_LANE), _pad_vec(p["bn_b"], HEAD_LANE),
        _pad_vec(p["cls_ln_w"], HEAD_LANE), _pad_vec(p["cls_ln_b"], HEAD_LANE),
        _pad_vec(p["head_b1"], HEAD_LANE), _pad_vec(p["head_b2"], HEAD_LANE),
        _pad_vec(p["head_b3"], HEAD_LANE),
        jnp.zeros((HEAD_LANE,), jnp.float32)], axis=0).astype(jnp.float32)

    # per-token bias template: CLS row = cls_token + pos[0];
    # patch rows = patch_b + pos[1:]  (conv bias folded in).
    template = jnp.concatenate([
        p["cls_token"] + p["pos_embed"][0:1, :],
        p["patch_b"][None, :] + p["pos_embed"][1:, :]], axis=0)
    assert template.shape == (NUM_TOKENS, EMBED)

    return bw, bv, hw, hv, template.astype(jnp.float32)


if __name__ == "__main__":
    key = jax.random.PRNGKey(0)
    k_param, k_x = jax.random.split(key)
    params = init_params(k_param)
    packed = pack_params(params)

    # PyTorch-style NCHW input.
    x = jax.random.normal(k_x, (2, C_IN, IMG, IMG), jnp.float32)

    fwd = jax.jit(vit_forward)
    out = fwd(x, *packed)
    jax.block_until_ready(out)
    assert out.shape == (2, NUM_CLASSES)
    print("KERNEL_OK")
</pallas_src>

<mosaic_0001>
module attributes {stable_mosaic.version = 11 : i64} {
  func.func @fused_vit_kernel(%arg0: memref<10x192xbf16, #tpu.memory_space<vmem>>, %arg1: memref<10x32xf32, #tpu.memory_space<vmem>>, %arg2: memref<10x10xf32, #tpu.memory_space<vmem>>, %arg3: memref<640x128xbf16, #tpu.memory_space<vmem>>, %arg4: memref<2x8x128xf32, #tpu.memory_space<vmem>>, %arg5: memref<800x512xbf16, #tpu.memory_space<vmem>>, %arg6: memref<8x512xf32, #tpu.memory_space<vmem>>, %arg7: memref<2x128xf32, #tpu.memory_space<vmem>>) attributes {dimension_semantics = [], scalar_prefetch = 0 : i64, scratch_operands = 0 : i64, tpu.core_type = #tpu.core_type<tc>} {
    %c0 = arith.constant 0 : index
    %c0_0 = arith.constant 0 : index
    %0 = vector.load %arg3[%c0, %c0_0] : memref<640x128xbf16, #tpu.memory_space<vmem>>, vector<192x128xbf16>
    %c0_1 = arith.constant 0 : index
    %c0_2 = arith.constant 0 : index
    %1 = vector.load %arg0[%c0_1, %c0_2] : memref<10x192xbf16, #tpu.memory_space<vmem>>, vector<10x192xbf16>
    %cst = arith.constant dense<0.000000e+00> : vector<10x128xf32>
    %2 = tpu.matmul %1, %0, %cst {dimension_numbers = #tpu.dot_dimension_numbers<[1], [0], [0], [1], [0, 0, 1, 1], [], []>} : vector<10x192xbf16>, vector<192x128xbf16>, vector<10x128xf32> -> vector<10x128xf32>
    %3 = vector.extract_strided_slice %2 {offsets = [0, 0], sizes = [10, 32], strides = [1, 1]} : vector<10x128xf32> to vector<10x32xf32>
    %c0_3 = arith.constant 0 : index
    %c0_4 = arith.constant 0 : index
    %4 = vector.load %arg1[%c0_3, %c0_4] : memref<10x32xf32, #tpu.memory_space<vmem>>, vector<10x32xf32>
    %5 = arith.addf %3, %4 : vector<10x32xf32>
    %c0_5 = arith.constant 0 : index
    %c0_6 = arith.constant 0 : index
    %6 = vector.load %arg2[%c0_5, %c0_6] : memref<10x10xf32, #tpu.memory_space<vmem>>, vector<10x10xf32>
    %c192 = arith.constant 192 : index
    %c0_7 = arith.constant 0 : index
    %7 = vector.load %arg3[%c192, %c0_7] : memref<640x128xbf16, #tpu.memory_space<vmem>>, vector<32x128xbf16>
    %c224 = arith.constant 224 : index
    %c0_8 = arith.constant 0 : index
    %8 = vector.load %arg3[%c224, %c0_8] : memref<640x128xbf16, #tpu.memory_space<vmem>>, vector<32x128xbf16>
    %c256 = arith.constant 256 : index
    %c0_9 = arith.constant 0 : index
    %9 = vector.load %arg3[%c256, %c0_9] : memref<640x128xbf16, #tpu.memory_space<vmem>>, vector<32x128xbf16>
    %c288 = arith.constant 288 : index
    %c0_10 = arith.constant 0 : index
    %10 = vector.load %arg3[%c288, %c0_10] : memref<640x128xbf16, #tpu.memory_space<vmem>>, vector<128x128xbf16>
    %c0_11 = arith.constant 0 : index
    %c0_12 = arith.constant 0 : index
    %c0_13 = arith.constant 0 : index
    %11 = vector.load %arg4[%c0_11, %c0_12, %c0_13] : memref<2x8x128xf32, #tpu.memory_space<vmem>>, vector<1x8x128xf32>
    %12 = vector.shape_cast %11 : vector<1x8x128xf32> to vector<8x128xf32>
    %13 = vector.extract_strided_slice %12 {offsets = [0, 0], sizes = [1, 32], strides = [1, 1]} : vector<8x128xf32> to vector<1x32xf32>
    %14 = vector.extract_strided_slice %12 {offsets = [1, 0], sizes = [1, 32], strides = [1, 1]} : vector<8x128xf32> to vector<1x32xf32>
    %15 = vector.extract_strided_slice %12 {offsets = [2, 0], sizes = [1, 128], strides = [1, 1]} : vector<8x128xf32> to vector<1x128xf32>
    %16 = vector.extract_strided_slice %12 {offsets = [3, 0], sizes = [1, 128], strides = [1, 1]} : vector<8x128xf32> to vector<1x128xf32>
    %17 = vector.extract_strided_slice %12 {offsets = [4, 0], sizes = [1, 32], strides = [1, 1]} : vector<8x128xf32> to vector<1x32xf32>
    %18 = vector.extract_strided_slice %12 {offsets = [5, 0], sizes = [1, 32], strides = [1, 1]} : vector<8x128xf32> to vector<1x32xf32>
    %19 = vector.extract_strided_slice %12 {offsets = [6, 0], sizes = [1, 128], strides = [1, 1]} : vector<8x128xf32> to vector<1x128xf32>
    %20 = vector.extract_strided_slice %12 {offsets = [7, 0], sizes = [1, 128], strides = [1, 1]} : vector<8x128xf32> to vector<1x128xf32>
    %cst_14 = arith.constant dense<0.000000e+00> : vector<10xf32>
    %21 = vector.multi_reduction <add>, %5, %cst_14 [1] : vector<10x32xf32> to vector<10xf32>
    %22 = vector.shape_cast %21 : vector<10xf32> to vector<10x1xf32>
    %cst_15 = arith.constant 3.200000e+01 : f32
    %23 = vector.broadcast %cst_15 : f32 to vector<10x1xf32>
    %24 = arith.divf %22, %23 : vector<10x1xf32>
    %25 = vector.broadcast %24 : vector<10x1xf32> to vector<10x32xf32>
    %26 = arith.subf %5, %25 : vector<10x32xf32>
    %27 = arith.mulf %26, %26 : vector<10x32xf32>
    %cst_16 = arith.constant dense<0.000000e+00> : vector<10xf32>
    %28 = vector.multi_reduction <add>, %27, %cst_16 [1] : vector<10x32xf32> to vector<10xf32>
    %29 = vector.shape_cast %28 : vector<10xf32> to vector<10x1xf32>
    %cst_17 = arith.constant 3.200000e+01 : f32
    %30 = vector.broadcast %cst_17 : f32 to vector<10x1xf32>
    %31 = arith.divf %29, %30 : vector<10x1xf32>
    %32 = vector.broadcast %24 : vector<10x1xf32> to vector<10x32xf32>
    %33 = arith.subf %5, %32 : vector<10x32xf32>
    %cst_18 = arith.constant 9.99999997E-7 : f32
    %34 = vector.broadcast %cst_18 : f32 to vector<10x1xf32>
    %35 = arith.addf %31, %34 : vector<10x1xf32>
    %36 = math.rsqrt %35 : vector<10x1xf32>
    %37 = vector.broadcast %36 : vector<10x1xf32> to vector<10x32xf32>
    %38 = arith.mulf %33, %37 : vector<10x32xf32>
    %39 = vector.broadcast %13 : vector<1x32xf32> to vector<10x32xf32>
    %40 = arith.mulf %38, %39 : vector<10x32xf32>
    %41 = vector.broadcast %14 : vector<1x32xf32> to vector<10x32xf32>
    %42 = arith.addf %40, %41 : vector<10x32xf32>
    %43 = arith.truncf %42 : vector<10x32xf32> to vector<10x32xbf16>
    %cst_19 = arith.constant dense<0.000000e+00> : vector<10x128xf32>
    %44 = tpu.matmul %43, %7, %cst_19 {dimension_numbers = #tpu.dot_dimension_numbers<[1], [0], [0], [1], [0, 0, 1, 1], [], []>} : vector<10x32xbf16>, vector<32x128xbf16>, vector<10x128xf32> -> vector<10x128xf32>
    %45 = vector.broadcast %15 : vector<1x128xf32> to vector<10x128xf32>
    %46 = arith.addf %44, %45 : vector<10x128xf32>
    %47 = vector.extract_strided_slice %46 {offsets = [0, 0], sizes = [10, 8], strides = [1, 1]} : vector<10x128xf32> to vector<10x8xf32>
    %cst_20 = arith.constant 0.353553385 : f32
    %48 = vector.broadcast %cst_20 : f32 to vector<10x8xf32>
    %49 = arith.mulf %47, %48 : vector<10x8xf32>
    %50 = vector.extract_strided_slice %46 {offsets = [0, 32], sizes = [10, 8], strides = [1, 1]} : vector<10x128xf32> to vector<10x8xf32>
    %51 = vector.extract_strided_slice %46 {offsets = [0, 64], sizes = [10, 8], strides = [1, 1]} : vector<10x128xf32> to vector<10x8xf32>
    %52 = arith.truncf %49 : vector<10x8xf32> to vector<10x8xbf16>
    %53 = arith.truncf %50 : vector<10x8xf32> to vector<10x8xbf16>
    %cst_21 = arith.constant dense<0.000000e+00> : vector<10x10xf32>
    %54 = tpu.matmul %52, %53, %cst_21 {dimension_numbers = #tpu.dot_dimension_numbers<[1], [1], [0], [0], [0, 0, 1, 0], [], []>} : vector<10x8xbf16>, vector<10x8xbf16>, vector<10x10xf32> -> vector<10x10xf32>
    %55 = arith.addf %54, %6 : vector<10x10xf32>
    %cst_22 = arith.constant dense<0xFF800000> : vector<10xf32>
    %56 = vector.multi_reduction <maximumf>, %55, %cst_22 [1] : vector<10x10xf32> to vector<10xf32>
    %57 = vector.shape_cast %56 : vector<10xf32> to vector<10x1xf32>
    %58 = vector.broadcast %57 : vector<10x1xf32> to vector<10x10xf32>
    %59 = arith.subf %55, %58 : vector<10x10xf32>
    %60 = math.exp %59 : vector<10x10xf32>
    %cst_23 = arith.constant dense<0.000000e+00> : vector<10xf32>
    %61 = vector.multi_reduction <add>, %60, %cst_23 [1] : vector<10x10xf32> to vector<10xf32>
    %62 = vector.shape_cast %61 : vector<10xf32> to vector<10x1xf32>
    %63 = vector.broadcast %62 : vector<10x1xf32> to vector<10x10xf32>
    %64 = arith.divf %60, %63 : vector<10x10xf32>
    %65 = arith.truncf %51 : vector<10x8xf32> to vector<10x8xbf16>
    %66 = arith.truncf %64 : vector<10x10xf32> to vector<10x10xbf16>
    %cst_24 = arith.constant dense<0.000000e+00> : vector<10x8xf32>
    %67 = tpu.matmul %66, %65, %cst_24 {dimension_numbers = #tpu.dot_dimension_numbers<[1], [0], [0], [1], [0, 0, 1, 1], [], []>} : vector<10x10xbf16>, vector<10x8xbf16>, vector<10x8xf32> -> vector<10x8xf32>
    %68 = vector.extract_strided_slice %46 {offsets = [0, 8], sizes = [10, 8], strides = [1, 1]} : vector<10x128xf32> to vector<10x8xf32>
    %cst_25 = arith.constant 0.353553385 : f32
    %69 = vector.broadcast %cst_25 : f32 to vector<10x8xf32>
    %70 = arith.mulf %68, %69 : vector<10x8xf32>
    %71 = vector.extract_strided_slice %46 {offsets = [0, 40], sizes = [10, 8], strides = [1, 1]} : vector<10x128xf32> to vector<10x8xf32>
    %72 = vector.extract_strided_slice %46 {offsets = [0, 72], sizes = [10, 8], strides = [1, 1]} : vector<10x128xf32> to vector<10x8xf32>
    %73 = arith.truncf %70 : vector<10x8xf32> to vector<10x8xbf16>
    %74 = arith.truncf %71 : vector<10x8xf32> to vector<10x8xbf16>
    %cst_26 = arith.constant dense<0.000000e+00> : vector<10x10xf32>
    %75 = tpu.matmul %73, %74, %cst_26 {dimension_numbers = #tpu.dot_dimension_numbers<[1], [1], [0], [0], [0, 0, 1, 0], [], []>} : vector<10x8xbf16>, vector<10x8xbf16>, vector<10x10xf32> -> vector<10x10xf32>
    %76 = arith.addf %75, %6 : vector<10x10xf32>
    %cst_27 = arith.constant dense<0xFF800000> : vector<10xf32>
    %77 = vector.multi_reduction <maximumf>, %76, %cst_27 [1] : vector<10x10xf32> to vector<10xf32>
    %78 = vector.shape_cast %77 : vector<10xf32> to vector<10x1xf32>
    %79 = vector.broadcast %78 : vector<10x1xf32> to vector<10x10xf32>
    %80 = arith.subf %76, %79 : vector<10x10xf32>
    %81 = math.exp %80 : vector<10x10xf32>
    %cst_28 = arith.constant dense<0.000000e+00> : vector<10xf32>
    %82 = vector.multi_reduction <add>, %81, %cst_28 [1] : vector<10x10xf32> to vector<10xf32>
    %83 = vector.shape_cast %82 : vector<10xf32> to vector<10x1xf32>
    %84 = vector.broadcast %83 : vector<10x1xf32> to vector<10x10xf32>
    %85 = arith.divf %81, %84 : vector<10x10xf32>
    %86 = arith.truncf %72 : vector<10x8xf32> to vector<10x8xbf16>
    %87 = arith.truncf %85 : vector<10x10xf32> to vector<10x10xbf16>
    %cst_29 = arith.constant dense<0.000000e+00> : vector<10x8xf32>
    %88 = tpu.matmul %87, %86, %cst_29 {dimension_numbers = #tpu.dot_dimension_numbers<[1], [0], [0], [1], [0, 0, 1, 1], [], []>} : vector<10x10xbf16>, vector<10x8xbf16>, vector<10x8xf32> -> vector<10x8xf32>
    %89 = vector.extract_strided_slice %46 {offsets = [0, 16], sizes = [10, 8], strides = [1, 1]} : vector<10x128xf32> to vector<10x8xf32>
    %cst_30 = arith.constant 0.353553385 : f32
    %90 = vector.broadcast %cst_30 : f32 to vector<10x8xf32>
    %91 = arith.mulf %89, %90 : vector<10x8xf32>
    %92 = vector.extract_strided_slice %46 {offsets = [0, 48], sizes = [10, 8], strides = [1, 1]} : vector<10x128xf32> to vector<10x8xf32>
    %93 = vector.extract_strided_slice %46 {offsets = [0, 80], sizes = [10, 8], strides = [1, 1]} : vector<10x128xf32> to vector<10x8xf32>
    %94 = arith.truncf %91 : vector<10x8xf32> to vector<10x8xbf16>
    %95 = arith.truncf %92 : vector<10x8xf32> to vector<10x8xbf16>
    %cst_31 = arith.constant dense<0.000000e+00> : vector<10x10xf32>
    %96 = tpu.matmul %94, %95, %cst_31 {dimension_numbers = #tpu.dot_dimension_numbers<[1], [1], [0], [0], [0, 0, 1, 0], [], []>} : vector<10x8xbf16>, vector<10x8xbf16>, vector<10x10xf32> -> vector<10x10xf32>
    %97 = arith.addf %96, %6 : vector<10x10xf32>
    %cst_32 = arith.constant dense<0xFF800000> : vector<10xf32>
    %98 = vector.multi_reduction <maximumf>, %97, %cst_32 [1] : vector<10x10xf32> to vector<10xf32>
    %99 = vector.shape_cast %98 : vector<10xf32> to vector<10x1xf32>
    %100 = vector.broadcast %99 : vector<10x1xf32> to vector<10x10xf32>
    %101 = arith.subf %97, %100 : vector<10x10xf32>
    %102 = math.exp %101 : vector<10x10xf32>
    %cst_33 = arith.constant dense<0.000000e+00> : vector<10xf32>
    %103 = vector.multi_reduction <add>, %102, %cst_33 [1] : vector<10x10xf32> to vector<10xf32>
    %104 = vector.shape_cast %103 : vector<10xf32> to vector<10x1xf32>
    %105 = vector.broadcast %104 : vector<10x1xf32> to vector<10x10xf32>
    %106 = arith.divf %102, %105 : vector<10x10xf32>
    %107 = arith.truncf %93 : vector<10x8xf32> to vector<10x8xbf16>
    %108 = arith.truncf %106 : vector<10x10xf32> to vector<10x10xbf16>
    %cst_34 = arith.constant dense<0.000000e+00> : vector<10x8xf32>
    %109 = tpu.matmul %108, %107, %cst_34 {dimension_numbers = #tpu.dot_dimension_numbers<[1], [0], [0], [1], [0, 0, 1, 1], [], []>} : vector<10x10xbf16>, vector<10x8xbf16>, vector<10x8xf32> -> vector<10x8xf32>
    %110 = vector.extract_strided_slice %46 {offsets = [0, 24], sizes = [10, 8], strides = [1, 1]} : vector<10x128xf32> to vector<10x8xf32>
    %cst_35 = arith.constant 0.353553385 : f32
    %111 = vector.broadcast %cst_35 : f32 to vector<10x8xf32>
    %112 = arith.mulf %110, %111 : vector<10x8xf32>
    %113 = vector.extract_strided_slice %46 {offsets = [0, 56], sizes = [10, 8], strides = [1, 1]} : vector<10x128xf32> to vector<10x8xf32>
    %114 = vector.extract_strided_slice %46 {offsets = [0, 88], sizes = [10, 8], strides = [1, 1]} : vector<10x128xf32> to vector<10x8xf32>
    %115 = arith.truncf %112 : vector<10x8xf32> to vector<10x8xbf16>
    %116 = arith.truncf %113 : vector<10x8xf32> to vector<10x8xbf16>
    %cst_36 = arith.constant dense<0.000000e+00> : vector<10x10xf32>
    %117 = tpu.matmul %115, %116, %cst_36 {dimension_numbers = #tpu.dot_dimension_numbers<[1], [1], [0], [0], [0, 0, 1, 0], [], []>} : vector<10x8xbf16>, vector<10x8xbf16>, vector<10x10xf32> -> vector<10x10xf32>
    %118 = arith.addf %117, %6 : vector<10x10xf32>
    %cst_37 = arith.constant dense<0xFF800000> : vector<10xf32>
    %119 = vector.multi_reduction <maximumf>, %118, %cst_37 [1] : vector<10x10xf32> to vector<10xf32>
    %120 = vector.shape_cast %119 : vector<10xf32> to vector<10x1xf32>
    %121 = vector.broadcast %120 : vector<10x1xf32> to vector<10x10xf32>
    %122 = arith.subf %118, %121 : vector<10x10xf32>
    %123 = math.exp %122 : vector<10x10xf32>
    %cst_38 = arith.constant dense<0.000000e+00> : vector<10xf32>
    %124 = vector.multi_reduction <add>, %123, %cst_38 [1] : vector<10x10xf32> to vector<10xf32>
    %125 = vector.shape_cast %124 : vector<10xf32> to vector<10x1xf32>
    %126 = vector.broadcast %125 : vector<10x1xf32> to vector<10x10xf32>
    %127 = arith.divf %123, %126 : vector<10x10xf32>
    %128 = arith.truncf %114 : vector<10x8xf32> to vector<10x8xbf16>
    %129 = arith.truncf %127 : vector<10x10xf32> to vector<10x10xbf16>
    %cst_39 = arith.constant dense<0.000000e+00> : vector<10x8xf32>
    %130 = tpu.matmul %129, %128, %cst_39 {dimension_numbers = #tpu.dot_dimension_numbers<[1], [0], [0], [1], [0, 0, 1, 1], [], []>} : vector<10x10xbf16>, vector<10x8xbf16>, vector<10x8xf32> -> vector<10x8xf32>
    %131 = tpu.concatenate %67, %88, %109, %130 in 1 : vector<10x8xf32>, vector<10x8xf32>, vector<10x8xf32>, vector<10x8xf32> -> vector<10x32xf32>
    %132 = arith.truncf %131 : vector<10x32xf32> to vector<10x32xbf16>
    %cst_40 = arith.constant dense<0.000000e+00> : vector<10x128xf32>
    %133 = tpu.matmul %132, %8, %cst_40 {dimension_numbers = #tpu.dot_dimension_numbers<[1], [0], [0], [1], [0, 0, 1, 1], [], []>} : vector<10x32xbf16>, vector<32x128xbf16>, vector<10x128xf32> -> vector<10x128xf32>
    %134 = vector.broadcast %16 : vector<1x128xf32> to vector<10x128xf32>
    %135 = arith.addf %133, %134 : vector<10x128xf32>
    %136 = vector.extract_strided_slice %135 {offsets = [0, 0], sizes = [10, 32], strides = [1, 1]} : vector<10x128xf32> to vector<10x32xf32>
    %137 = arith.addf %5, %136 : vector<10x32xf32>
    %cst_41 = arith.constant dense<0.000000e+00> : vector<10xf32>
    %138 = vector.multi_reduction <add>, %137, %cst_41 [1] : vector<10x32xf32> to vector<10xf32>
    %139 = vector.shape_cast %138 : vector<10xf32> to vector<10x1xf32>
    %cst_42 = arith.constant 3.200000e+01 : f32
    %140 = vector.broadcast %cst_42 : f32 to vector<10x1xf32>
    %141 = arith.divf %139, %140 : vector<10x1xf32>
    %142 = vector.broadcast %141 : vector<10x1xf32> to vector<10x32xf32>
    %143 = arith.subf %137, %142 : vector<10x32xf32>
    %144 = arith.mulf %143, %143 : vector<10x32xf32>
    %cst_43 = arith.constant dense<0.000000e+00> : vector<10xf32>
    %145 = vector.multi_reduction <add>, %144, %cst_43 [1] : vector<10x32xf32> to vector<10xf32>
    %146 = vector.shape_cast %145 : vector<10xf32> to vector<10x1xf32>
    %cst_44 = arith.constant 3.200000e+01 : f32
    %147 = vector.broadcast %cst_44 : f32 to vector<10x1xf32>
    %148 = arith.divf %146, %147 : vector<10x1xf32>
    %149 = vector.broadcast %141 : vector<10x1xf32> to vector<10x32xf32>
    %150 = arith.subf %137, %149 : vector<10x32xf32>
    %cst_45 = arith.constant 9.99999997E-7 : f32
    %151 = vector.broadcast %cst_45 : f32 to vector<10x1xf32>
    %152 = arith.addf %148, %151 : vector<10x1xf32>
    %153 = math.rsqrt %152 : vector<10x1xf32>
    %154 = vector.broadcast %153 : vector<10x1xf32> to vector<10x32xf32>
    %155 = arith.mulf %150, %154 : vector<10x32xf32>
    %156 = vector.broadcast %17 : vector<1x32xf32> to vector<10x32xf32>
    %157 = arith.mulf %155, %156 : vector<10x32xf32>
    %158 = vector.broadcast %18 : vector<1x32xf32> to vector<10x32xf32>
    %159 = arith.addf %157, %158 : vector<10x32xf32>
    %160 = arith.truncf %159 : vector<10x32xf32> to vector<10x32xbf16>
    %cst_46 = arith.constant dense<0.000000e+00> : vector<10x128xf32>
    %161 = tpu.matmul %160, %9, %cst_46 {dimension_numbers = #tpu.dot_dimension_numbers<[1], [0], [0], [1], [0, 0, 1, 1], [], []>} : vector<10x32xbf16>, vector<32x128xbf16>, vector<10x128xf32> -> vector<10x128xf32>
    %162 = vector.broadcast %19 : vector<1x128xf32> to vector<10x128xf32>
    %163 = arith.addf %161, %162 : vector<10x128xf32>
    %164 = arith.mulf %163, %163 : vector<10x128xf32>
    %165 = arith.mulf %163, %164 : vector<10x128xf32>
    %cst_47 = arith.constant 4.471500e-02 : f32
    %166 = vector.broadcast %cst_47 : f32 to vector<10x128xf32>
    %167 = arith.mulf %166, %165 : vector<10x128xf32>
    %168 = arith.addf %163, %167 : vector<10x128xf32>
    %cst_48 = arith.constant 0.797884583 : f32
    %169 = vector.broadcast %cst_48 : f32 to vector<10x128xf32>
    %170 = arith.mulf %169, %168 : vector<10x128xf32>
    %171 = math.tanh %170 : vector<10x128xf32>
    %cst_49 = arith.constant 1.000000e+00 : f32
    %172 = vector.broadcast %cst_49 : f32 to vector<10x128xf32>
    %173 = arith.addf %172, %171 : vector<10x128xf32>
    %cst_50 = arith.constant 5.000000e-01 : f32
    %174 = vector.broadcast %cst_50 : f32 to vector<10x128xf32>
    %175 = arith.mulf %174, %173 : vector<10x128xf32>
    %176 = arith.mulf %163, %175 : vector<10x128xf32>
    %177 = arith.truncf %176 : vector<10x128xf32> to vector<10x128xbf16>
    %cst_51 = arith.constant dense<0.000000e+00> : vector<10x128xf32>
    %178 = tpu.matmul %177, %10, %cst_51 {dimension_numbers = #tpu.dot_dimension_numbers<[1], [0], [0], [1], [0, 0, 1, 1], [], []>} : vector<10x128xbf16>, vector<128x128xbf16>, vector<10x128xf32> -> vector<10x128xf32>
    %179 = vector.broadcast %20 : vector<1x128xf32> to vector<10x128xf32>
    %180 = arith.addf %178, %179 : vector<10x128xf32>
    %181 = vector.extract_strided_slice %180 {offsets = [0, 0], sizes = [10, 32], strides = [1, 1]} : vector<10x128xf32> to vector<10x32xf32>
    %182 = arith.addf %137, %181 : vector<10x32xf32>
    %c416 = arith.constant 416 : index
    %c0_52 = arith.constant 0 : index
    %183 = vector.load %arg3[%c416, %c0_52] : memref<640x128xbf16, #tpu.memory_space<vmem>>, vector<32x128xbf16>
    %c448 = arith.constant 448 : index
    %c0_53 = arith.constant 0 : index
    %184 = vector.load %arg3[%c448, %c0_53] : memref<640x128xbf16, #tpu.memory_space<vmem>>, vector<32x128xbf16>
    %c480 = arith.constant 480 : index
    %c0_54 = arith.constant 0 : index
    %185 = vector.load %arg3[%c480, %c0_54] : memref<640x128xbf16, #tpu.memory_space<vmem>>, vector<32x128xbf16>
    %c512 = arith.constant 512 : index
    %c0_55 = arith.constant 0 : index
    %186 = vector.load %arg3[%c512, %c0_55] : memref<640x128xbf16, #tpu.memory_space<vmem>>, vector<128x128xbf16>
    %c1 = arith.constant 1 : index
    %c0_56 = arith.constant 0 : index
    %c0_57 = arith.constant 0 : index
    %187 = vector.load %arg4[%c1, %c0_56, %c0_57] : memref<2x8x128xf32, #tpu.memory_space<vmem>>, vector<1x8x128xf32>
    %188 = vector.shape_cast %187 : vector<1x8x128xf32> to vector<8x128xf32>
    %189 = vector.extract_strided_slice %188 {offsets = [0, 0], sizes = [1, 32], strides = [1, 1]} : vector<8x128xf32> to vector<1x32xf32>
    %190 = vector.extract_strided_slice %188 {offsets = [1, 0], sizes = [1, 32], strides = [1, 1]} : vector<8x128xf32> to vector<1x32xf32>
    %191 = vector.extract_strided_slice %188 {offsets = [2, 0], sizes = [1, 128], strides = [1, 1]} : vector<8x128xf32> to vector<1x128xf32>
    %192 = vector.extract_strided_slice %188 {offsets = [3, 0], sizes = [1, 128], strides = [1, 1]} : vector<8x128xf32> to vector<1x128xf32>
    %193 = vector.extract_strided_slice %188 {offsets = [4, 0], sizes = [1, 32], strides = [1, 1]} : vector<8x128xf32> to vector<1x32xf32>
    %194 = vector.extract_strided_slice %188 {offsets = [5, 0], sizes = [1, 32], strides = [1, 1]} : vector<8x128xf32> to vector<1x32xf32>
    %195 = vector.extract_strided_slice %188 {offsets = [6, 0], sizes = [1, 128], strides = [1, 1]} : vector<8x128xf32> to vector<1x128xf32>
    %196 = vector.extract_strided_slice %188 {offsets = [7, 0], sizes = [1, 128], strides = [1, 1]} : vector<8x128xf32> to vector<1x128xf32>
    %cst_58 = arith.constant dense<0.000000e+00> : vector<10xf32>
    %197 = vector.multi_reduction <add>, %182, %cst_58 [1] : vector<10x32xf32> to vector<10xf32>
    %198 = vector.shape_cast %197 : vector<10xf32> to vector<10x1xf32>
    %cst_59 = arith.constant 3.200000e+01 : f32
    %199 = vector.broadcast %cst_59 : f32 to vector<10x1xf32>
    %200 = arith.divf %198, %199 : vector<10x1xf32>
    %201 = vector.broadcast %200 : vector<10x1xf32> to vector<10x32xf32>
    %202 = arith.subf %182, %201 : vector<10x32xf32>
    %203 = arith.mulf %202, %202 : vector<10x32xf32>
    %cst_60 = arith.constant dense<0.000000e+00> : vector<10xf32>
    %204 = vector.multi_reduction <add>, %203, %cst_60 [1] : vector<10x32xf32> to vector<10xf32>
    %205 = vector.shape_cast %204 : vector<10xf32> to vector<10x1xf32>
    %cst_61 = arith.constant 3.200000e+01 : f32
    %206 = vector.broadcast %cst_61 : f32 to vector<10x1xf32>
    %207 = arith.divf %205, %206 : vector<10x1xf32>
    %208 = vector.broadcast %200 : vector<10x1xf32> to vector<10x32xf32>
    %209 = arith.subf %182, %208 : vector<10x32xf32>
    %cst_62 = arith.constant 9.99999997E-7 : f32
    %210 = vector.broadcast %cst_62 : f32 to vector<10x1xf32>
    %211 = arith.addf %207, %210 : vector<10x1xf32>
    %212 = math.rsqrt %211 : vector<10x1xf32>
    %213 = vector.broadcast %212 : vector<10x1xf32> to vector<10x32xf32>
    %214 = arith.mulf %209, %213 : vector<10x32xf32>
    %215 = vector.broadcast %189 : vector<1x32xf32> to vector<10x32xf32>
    %216 = arith.mulf %214, %215 : vector<10x32xf32>
    %217 = vector.broadcast %190 : vector<1x32xf32> to vector<10x32xf32>
    %218 = arith.addf %216, %217 : vector<10x32xf32>
    %219 = arith.truncf %218 : vector<10x32xf32> to vector<10x32xbf16>
    %cst_63 = arith.constant dense<0.000000e+00> : vector<10x128xf32>
    %220 = tpu.matmul %219, %183, %cst_63 {dimension_numbers = #tpu.dot_dimension_numbers<[1], [0], [0], [1], [0, 0, 1, 1], [], []>} : vector<10x32xbf16>, vector<32x128xbf16>, vector<10x128xf32> -> vector<10x128xf32>
    %221 = vector.broadcast %191 : vector<1x128xf32> to vector<10x128xf32>
    %222 = arith.addf %220, %221 : vector<10x128xf32>
    %223 = vector.extract_strided_slice %222 {offsets = [0, 0], sizes = [10, 8], strides = [1, 1]} : vector<10x128xf32> to vector<10x8xf32>
    %cst_64 = arith.constant 0.353553385 : f32
    %224 = vector.broadcast %cst_64 : f32 to vector<10x8xf32>
    %225 = arith.mulf %223, %224 : vector<10x8xf32>
    %226 = vector.extract_strided_slice %222 {offsets = [0, 32], sizes = [10, 8], strides = [1, 1]} : vector<10x128xf32> to vector<10x8xf32>
    %227 = vector.extract_strided_slice %222 {offsets = [0, 64], sizes = [10, 8], strides = [1, 1]} : vector<10x128xf32> to vector<10x8xf32>
    %228 = arith.truncf %225 : vector<10x8xf32> to vector<10x8xbf16>
    %229 = arith.truncf %226 : vector<10x8xf32> to vector<10x8xbf16>
    %cst_65 = arith.constant dense<0.000000e+00> : vector<10x10xf32>
    %230 = tpu.matmul %228, %229, %cst_65 {dimension_numbers = #tpu.dot_dimension_numbers<[1], [1], [0], [0], [0, 0, 1, 0], [], []>} : vector<10x8xbf16>, vector<10x8xbf16>, vector<10x10xf32> -> vector<10x10xf32>
    %231 = arith.addf %230, %6 : vector<10x10xf32>
    %cst_66 = arith.constant dense<0xFF800000> : vector<10xf32>
    %232 = vector.multi_reduction <maximumf>, %231, %cst_66 [1] : vector<10x10xf32> to vector<10xf32>
    %233 = vector.shape_cast %232 : vector<10xf32> to vector<10x1xf32>
    %234 = vector.broadcast %233 : vector<10x1xf32> to vector<10x10xf32>
    %235 = arith.subf %231, %234 : vector<10x10xf32>
    %236 = math.exp %235 : vector<10x10xf32>
    %cst_67 = arith.constant dense<0.000000e+00> : vector<10xf32>
    %237 = vector.multi_reduction <add>, %236, %cst_67 [1] : vector<10x10xf32> to vector<10xf32>
    %238 = vector.shape_cast %237 : vector<10xf32> to vector<10x1xf32>
    %239 = vector.broadcast %238 : vector<10x1xf32> to vector<10x10xf32>
    %240 = arith.divf %236, %239 : vector<10x10xf32>
    %241 = arith.truncf %227 : vector<10x8xf32> to vector<10x8xbf16>
    %242 = arith.truncf %240 : vector<10x10xf32> to vector<10x10xbf16>
    %cst_68 = arith.constant dense<0.000000e+00> : vector<10x8xf32>
    %243 = tpu.matmul %242, %241, %cst_68 {dimension_numbers = #tpu.dot_dimension_numbers<[1], [0], [0], [1], [0, 0, 1, 1], [], []>} : vector<10x10xbf16>, vector<10x8xbf16>, vector<10x8xf32> -> vector<10x8xf32>
    %244 = vector.extract_strided_slice %222 {offsets = [0, 8], sizes = [10, 8], strides = [1, 1]} : vector<10x128xf32> to vector<10x8xf32>
    %cst_69 = arith.constant 0.353553385 : f32
    %245 = vector.broadcast %cst_69 : f32 to vector<10x8xf32>
    %246 = arith.mulf %244, %245 : vector<10x8xf32>
    %247 = vector.extract_strided_slice %222 {offsets = [0, 40], sizes = [10, 8], strides = [1, 1]} : vector<10x128xf32> to vector<10x8xf32>
    %248 = vector.extract_strided_slice %222 {offsets = [0, 72], sizes = [10, 8], strides = [1, 1]} : vector<10x128xf32> to vector<10x8xf32>
    %249 = arith.truncf %246 : vector<10x8xf32> to vector<10x8xbf16>
    %250 = arith.truncf %247 : vector<10x8xf32> to vector<10x8xbf16>
    %cst_70 = arith.constant dense<0.000000e+00> : vector<10x10xf32>
    %251 = tpu.matmul %249, %250, %cst_70 {dimension_numbers = #tpu.dot_dimension_numbers<[1], [1], [0], [0], [0, 0, 1, 0], [], []>} : vector<10x8xbf16>, vector<10x8xbf16>, vector<10x10xf32> -> vector<10x10xf32>
    %252 = arith.addf %251, %6 : vector<10x10xf32>
    %cst_71 = arith.constant dense<0xFF800000> : vector<10xf32>
    %253 = vector.multi_reduction <maximumf>, %252, %cst_71 [1] : vector<10x10xf32> to vector<10xf32>
    %254 = vector.shape_cast %253 : vector<10xf32> to vector<10x1xf32>
    %255 = vector.broadcast %254 : vector<10x1xf32> to vector<10x10xf32>
    %256 = arith.subf %252, %255 : vector<10x10xf32>
    %257 = math.exp %256 : vector<10x10xf32>
    %cst_72 = arith.constant dense<0.000000e+00> : vector<10xf32>
    %258 = vector.multi_reduction <add>, %257, %cst_72 [1] : vector<10x10xf32> to vector<10xf32>
    %259 = vector.shape_cast %258 : vector<10xf32> to vector<10x1xf32>
    %260 = vector.broadcast %259 : vector<10x1xf32> to vector<10x10xf32>
    %261 = arith.divf %257, %260 : vector<10x10xf32>
    %262 = arith.truncf %248 : vector<10x8xf32> to vector<10x8xbf16>
    %263 = arith.truncf %261 : vector<10x10xf32> to vector<10x10xbf16>
    %cst_73 = arith.constant dense<0.000000e+00> : vector<10x8xf32>
    %264 = tpu.matmul %263, %262, %cst_73 {dimension_numbers = #tpu.dot_dimension_numbers<[1], [0], [0], [1], [0, 0, 1, 1], [], []>} : vector<10x10xbf16>, vector<10x8xbf16>, vector<10x8xf32> -> vector<10x8xf32>
    %265 = vector.extract_strided_slice %222 {offsets = [0, 16], sizes = [10, 8], strides = [1, 1]} : vector<10x128xf32> to vector<10x8xf32>
    %cst_74 = arith.constant 0.353553385 : f32
    %266 = vector.broadcast %cst_74 : f32 to vector<10x8xf32>
    %267 = arith.mulf %265, %266 : vector<10x8xf32>
    %268 = vector.extract_strided_slice %222 {offsets = [0, 48], sizes = [10, 8], strides = [1, 1]} : vector<10x128xf32> to vector<10x8xf32>
    %269 = vector.extract_strided_slice %222 {offsets = [0, 80], sizes = [10, 8], strides = [1, 1]} : vector<10x128xf32> to vector<10x8xf32>
    %270 = arith.truncf %267 : vector<10x8xf32> to vector<10x8xbf16>
    %271 = arith.truncf %268 : vector<10x8xf32> to vector<10x8xbf16>
    %cst_75 = arith.constant dense<0.000000e+00> : vector<10x10xf32>
    %272 = tpu.matmul %270, %271, %cst_75 {dimension_numbers = #tpu.dot_dimension_numbers<[1], [1], [0], [0], [0, 0, 1, 0], [], []>} : vector<10x8xbf16>, vector<10x8xbf16>, vector<10x10xf32> -> vector<10x10xf32>
    %273 = arith.addf %272, %6 : vector<10x10xf32>
    %cst_76 = arith.constant dense<0xFF800000> : vector<10xf32>
    %274 = vector.multi_reduction <maximumf>, %273, %cst_76 [1] : vector<10x10xf32> to vector<10xf32>
    %275 = vector.shape_cast %274 : vector<10xf32> to vector<10x1xf32>
    %276 = vector.broadcast %275 : vector<10x1xf32> to vector<10x10xf32>
    %277 = arith.subf %273, %276 : vector<10x10xf32>
    %278 = math.exp %277 : vector<10x10xf32>
    %cst_77 = arith.constant dense<0.000000e+00> : vector<10xf32>
    %279 = vector.multi_reduction <add>, %278, %cst_77 [1] : vector<10x10xf32> to vector<10xf32>
    %280 = vector.shape_cast %279 : vector<10xf32> to vector<10x1xf32>
    %281 = vector.broadcast %280 : vector<10x1xf32> to vector<10x10xf32>
    %282 = arith.divf %278, %281 : vector<10x10xf32>
    %283 = arith.truncf %269 : vector<10x8xf32> to vector<10x8xbf16>
    %284 = arith.truncf %282 : vector<10x10xf32> to vector<10x10xbf16>
    %cst_78 = arith.constant dense<0.000000e+00> : vector<10x8xf32>
    %285 = tpu.matmul %284, %283, %cst_78 {dimension_numbers = #tpu.dot_dimension_numbers<[1], [0], [0], [1], [0, 0, 1, 1], [], []>} : vector<10x10xbf16>, vector<10x8xbf16>, vector<10x8xf32> -> vector<10x8xf32>
    %286 = vector.extract_strided_slice %222 {offsets = [0, 24], sizes = [10, 8], strides = [1, 1]} : vector<10x128xf32> to vector<10x8xf32>
    %cst_79 = arith.constant 0.353553385 : f32
    %287 = vector.broadcast %cst_79 : f32 to vector<10x8xf32>
    %288 = arith.mulf %286, %287 : vector<10x8xf32>
    %289 = vector.extract_strided_slice %222 {offsets = [0, 56], sizes = [10, 8], strides = [1, 1]} : vector<10x128xf32> to vector<10x8xf32>
    %290 = vector.extract_strided_slice %222 {offsets = [0, 88], sizes = [10, 8], strides = [1, 1]} : vector<10x128xf32> to vector<10x8xf32>
    %291 = arith.truncf %288 : vector<10x8xf32> to vector<10x8xbf16>
    %292 = arith.truncf %289 : vector<10x8xf32> to vector<10x8xbf16>
    %cst_80 = arith.constant dense<0.000000e+00> : vector<10x10xf32>
    %293 = tpu.matmul %291, %292, %cst_80 {dimension_numbers = #tpu.dot_dimension_numbers<[1], [1], [0], [0], [0, 0, 1, 0], [], []>} : vector<10x8xbf16>, vector<10x8xbf16>, vector<10x10xf32> -> vector<10x10xf32>
    %294 = arith.addf %293, %6 : vector<10x10xf32>
    %cst_81 = arith.constant dense<0xFF800000> : vector<10xf32>
    %295 = vector.multi_reduction <maximumf>, %294, %cst_81 [1] : vector<10x10xf32> to vector<10xf32>
    %296 = vector.shape_cast %295 : vector<10xf32> to vector<10x1xf32>
    %297 = vector.broadcast %296 : vector<10x1xf32> to vector<10x10xf32>
    %298 = arith.subf %294, %297 : vector<10x10xf32>
    %299 = math.exp %298 : vector<10x10xf32>
    %cst_82 = arith.constant dense<0.000000e+00> : vector<10xf32>
    %300 = vector.multi_reduction <add>, %299, %cst_82 [1] : vector<10x10xf32> to vector<10xf32>
    %301 = vector.shape_cast %300 : vector<10xf32> to vector<10x1xf32>
    %302 = vector.broadcast %301 : vector<10x1xf32> to vector<10x10xf32>
    %303 = arith.divf %299, %302 : vector<10x10xf32>
    %304 = arith.truncf %290 : vector<10x8xf32> to vector<10x8xbf16>
    %305 = arith.truncf %303 : vector<10x10xf32> to vector<10x10xbf16>
    %cst_83 = arith.constant dense<0.000000e+00> : vector<10x8xf32>
    %306 = tpu.matmul %305, %304, %cst_83 {dimension_numbers = #tpu.dot_dimension_numbers<[1], [0], [0], [1], [0, 0, 1, 1], [], []>} : vector<10x10xbf16>, vector<10x8xbf16>, vector<10x8xf32> -> vector<10x8xf32>
    %307 = tpu.concatenate %243, %264, %285, %306 in 1 : vector<10x8xf32>, vector<10x8xf32>, vector<10x8xf32>, vector<10x8xf32> -> vector<10x32xf32>
    %308 = arith.truncf %307 : vector<10x32xf32> to vector<10x32xbf16>
    %cst_84 = arith.constant dense<0.000000e+00> : vector<10x128xf32>
    %309 = tpu.matmul %308, %184, %cst_84 {dimension_numbers = #tpu.dot_dimension_numbers<[1], [0], [0], [1], [0, 0, 1, 1], [], []>} : vector<10x32xbf16>, vector<32x128xbf16>, vector<10x128xf32> -> vector<10x128xf32>
    %310 = vector.broadcast %192 : vector<1x128xf32> to vector<10x128xf32>
    %311 = arith.addf %309, %310 : vector<10x128xf32>
    %312 = vector.extract_strided_slice %311 {offsets = [0, 0], sizes = [10, 32], strides = [1, 1]} : vector<10x128xf32> to vector<10x32xf32>
    %313 = arith.addf %182, %312 : vector<10x32xf32>
    %cst_85 = arith.constant dense<0.000000e+00> : vector<10xf32>
    %314 = vector.multi_reduction <add>, %313, %cst_85 [1] : vector<10x32xf32> to vector<10xf32>
    %315 = vector.shape_cast %314 : vector<10xf32> to vector<10x1xf32>
    %cst_86 = arith.constant 3.200000e+01 : f32
    %316 = vector.broadcast %cst_86 : f32 to vector<10x1xf32>
    %317 = arith.divf %315, %316 : vector<10x1xf32>
    %318 = vector.broadcast %317 : vector<10x1xf32> to vector<10x32xf32>
    %319 = arith.subf %313, %318 : vector<10x32xf32>
    %320 = arith.mulf %319, %319 : vector<10x32xf32>
    %cst_87 = arith.constant dense<0.000000e+00> : vector<10xf32>
    %321 = vector.multi_reduction <add>, %320, %cst_87 [1] : vector<10x32xf32> to vector<10xf32>
    %322 = vector.shape_cast %321 : vector<10xf32> to vector<10x1xf32>
    %cst_88 = arith.constant 3.200000e+01 : f32
    %323 = vector.broadcast %cst_88 : f32 to vector<10x1xf32>
    %324 = arith.divf %322, %323 : vector<10x1xf32>
    %325 = vector.broadcast %317 : vector<10x1xf32> to vector<10x32xf32>
    %326 = arith.subf %313, %325 : vector<10x32xf32>
    %cst_89 = arith.constant 9.99999997E-7 : f32
    %327 = vector.broadcast %cst_89 : f32 to vector<10x1xf32>
    %328 = arith.addf %324, %327 : vector<10x1xf32>
    %329 = math.rsqrt %328 : vector<10x1xf32>
    %330 = vector.broadcast %329 : vector<10x1xf32> to vector<10x32xf32>
    %331 = arith.mulf %326, %330 : vector<10x32xf32>
    %332 = vector.broadcast %193 : vector<1x32xf32> to vector<10x32xf32>
    %333 = arith.mulf %331, %332 : vector<10x32xf32>
    %334 = vector.broadcast %194 : vector<1x32xf32> to vector<10x32xf32>
    %335 = arith.addf %333, %334 : vector<10x32xf32>
    %336 = arith.truncf %335 : vector<10x32xf32> to vector<10x32xbf16>
    %cst_90 = arith.constant dense<0.000000e+00> : vector<10x128xf32>
    %337 = tpu.matmul %336, %185, %cst_90 {dimension_numbers = #tpu.dot_dimension_numbers<[1], [0], [0], [1], [0, 0, 1, 1], [], []>} : vector<10x32xbf16>, vector<32x128xbf16>, vector<10x128xf32> -> vector<10x128xf32>
    %338 = vector.broadcast %195 : vector<1x128xf32> to vector<10x128xf32>
    %339 = arith.addf %337, %338 : vector<10x128xf32>
    %340 = arith.mulf %339, %339 : vector<10x128xf32>
    %341 = arith.mulf %339, %340 : vector<10x128xf32>
    %cst_91 = arith.constant 4.471500e-02 : f32
    %342 = vector.broadcast %cst_91 : f32 to vector<10x128xf32>
    %343 = arith.mulf %342, %341 : vector<10x128xf32>
    %344 = arith.addf %339, %343 : vector<10x128xf32>
    %cst_92 = arith.constant 0.797884583 : f32
    %345 = vector.broadcast %cst_92 : f32 to vector<10x128xf32>
    %346 = arith.mulf %345, %344 : vector<10x128xf32>
    %347 = math.tanh %346 : vector<10x128xf32>
    %cst_93 = arith.constant 1.000000e+00 : f32
    %348 = vector.broadcast %cst_93 : f32 to vector<10x128xf32>
    %349 = arith.addf %348, %347 : vector<10x128xf32>
    %cst_94 = arith.constant 5.000000e-01 : f32
    %350 = vector.broadcast %cst_94 : f32 to vector<10x128xf32>
    %351 = arith.mulf %350, %349 : vector<10x128xf32>
    %352 = arith.mulf %339, %351 : vector<10x128xf32>
    %353 = arith.truncf %352 : vector<10x128xf32> to vector<10x128xbf16>
    %cst_95 = arith.constant dense<0.000000e+00> : vector<10x128xf32>
    %354 = tpu.matmul %353, %186, %cst_95 {dimension_numbers = #tpu.dot_dimension_numbers<[1], [0], [0], [1], [0, 0, 1, 1], [], []>} : vector<10x128xbf16>, vector<128x128xbf16>, vector<10x128xf32> -> vector<10x128xf32>
    %355 = vector.broadcast %196 : vector<1x128xf32> to vector<10x128xf32>
    %356 = arith.addf %354, %355 : vector<10x128xf32>
    %357 = vector.extract_strided_slice %356 {offsets = [0, 0], sizes = [10, 32], strides = [1, 1]} : vector<10x128xf32> to vector<10x32xf32>
    %358 = arith.addf %313, %357 : vector<10x32xf32>
    %359 = tpu.iota {dimensions = array<i32: 1>} : vector<2x10xi32>
    %360 = tpu.iota {dimensions = array<i32: 0>} : vector<2x10xi32>
    %c5_i32 = arith.constant 5 : i32
    %361 = vector.broadcast %c5_i32 : i32 to vector<2x10xi32>
    %362 = arith.muli %360, %361 : vector<2x10xi32>
    %363 = arith.cmpi eq, %359, %362 : vector<2x10xi32>
    %cst_96 = arith.constant 1.000000e+00 : f32
    %cst_97 = arith.constant 0.000000e+00 : f32
    %364 = vector.broadcast %cst_96 : f32 to vector<2x10xf32>
    %365 = vector.broadcast %cst_97 : f32 to vector<2x10xf32>
    %366 = arith.select %363, %364, %365 : vector<2x10xi1>, vector<2x10xf32>
    %cst_98 = arith.constant dense<0.000000e+00> : vector<2x32xf32>
    %367 = tpu.matmul %366, %358, %cst_98 {dimension_numbers = #tpu.dot_dimension_numbers<[1], [0], [0], [1], [0, 0, 1, 1], [], []>} : vector<2x10xf32>, vector<10x32xf32>, vector<2x32xf32> -> vector<2x32xf32>
    %c0_99 = arith.constant 0 : index
    %c0_100 = arith.constant 0 : index
    %368 = vector.load %arg6[%c0_99, %c0_100] : memref<8x512xf32, #tpu.memory_space<vmem>>, vector<8x512xf32>
    %369 = vector.extract_strided_slice %368 {offsets = [0, 0], sizes = [1, 32], strides = [1, 1]} : vector<8x512xf32> to vector<1x32xf32>
    %370 = vector.extract_strided_slice %368 {offsets = [1, 0], sizes = [1, 32], strides = [1, 1]} : vector<8x512xf32> to vector<1x32xf32>
    %371 = vector.extract_strided_slice %368 {offsets = [2, 0], sizes = [1, 32], strides = [1, 1]} : vector<8x512xf32> to vector<1x32xf32>
    %372 = vector.extract_strided_slice %368 {offsets = [3, 0], sizes = [1, 32], strides = [1, 1]} : vector<8x512xf32> to vector<1x32xf32>
    %373 = vector.extract_strided_slice %368 {offsets = [4, 0], sizes = [1, 512], strides = [1, 1]} : vector<8x512xf32> to vector<1x512xf32>
    %374 = vector.extract_strided_slice %368 {offsets = [5, 0], sizes = [1, 512], strides = [1, 1]} : vector<8x512xf32> to vector<1x512xf32>
    %375 = vector.extract_strided_slice %368 {offsets = [6, 0], sizes = [1, 512], strides = [1, 1]} : vector<8x512xf32> to vector<1x512xf32>
    %cst_101 = arith.constant dense<0.000000e+00> : vector<2xf32>
    %376 = vector.multi_reduction <add>, %367, %cst_101 [1] : vector<2x32xf32> to vector<2xf32>
    %377 = vector.shape_cast %376 : vector<2xf32> to vector<2x1xf32>
    %cst_102 = arith.constant 3.200000e+01 : f32
    %378 = vector.broadcast %cst_102 : f32 to vector<2x1xf32>
    %379 = arith.divf %377, %378 : vector<2x1xf32>
    %380 = vector.broadcast %379 : vector<2x1xf32> to vector<2x32xf32>
    %381 = arith.subf %367, %380 : vector<2x32xf32>
    %382 = arith.mulf %381, %381 : vector<2x32xf32>
    %cst_103 = arith.constant dense<0.000000e+00> : vector<2xf32>
    %383 = vector.multi_reduction <add>, %382, %cst_103 [1] : vector<2x32xf32> to vector<2xf32>
    %384 = vector.shape_cast %383 : vector<2xf32> to vector<2x1xf32>
    %cst_104 = arith.constant 3.200000e+01 : f32
    %385 = vector.broadcast %cst_104 : f32 to vector<2x1xf32>
    %386 = arith.divf %384, %385 : vector<2x1xf32>
    %387 = vector.broadcast %379 : vector<2x1xf32> to vector<2x32xf32>
    %388 = arith.subf %367, %387 : vector<2x32xf32>
    %cst_105 = arith.constant 9.99999997E-7 : f32
    %389 = vector.broadcast %cst_105 : f32 to vector<2x1xf32>
    %390 = arith.addf %386, %389 : vector<2x1xf32>
    %391 = math.rsqrt %390 : vector<2x1xf32>
    %392 = vector.broadcast %391 : vector<2x1xf32> to vector<2x32xf32>
    %393 = arith.mulf %388, %392 : vector<2x32xf32>
    %394 = vector.broadcast %369 : vector<1x32xf32> to vector<2x32xf32>
    %395 = arith.mulf %393, %394 : vector<2x32xf32>
    %396 = vector.broadcast %370 : vector<1x32xf32> to vector<2x32xf32>
    %397 = arith.addf %395, %396 : vector<2x32xf32>
    %cst_106 = arith.constant dense<0.000000e+00> : vector<2xf32>
    %398 = vector.multi_reduction <add>, %397, %cst_106 [1] : vector<2x32xf32> to vector<2xf32>
    %399 = vector.shape_cast %398 : vector<2xf32> to vector<2x1xf32>
    %cst_107 = arith.constant 3.200000e+01 : f32
    %400 = vector.broadcast %cst_107 : f32 to vector<2x1xf32>
    %401 = arith.divf %399, %400 : vector<2x1xf32>
    %402 = vector.broadcast %401 : vector<2x1xf32> to vector<2x32xf32>
    %403 = arith.subf %397, %402 : vector<2x32xf32>
    %404 = arith.mulf %403, %403 : vector<2x32xf32>
    %cst_108 = arith.constant dense<0.000000e+00> : vector<2xf32>
    %405 = vector.multi_reduction <add>, %404, %cst_108 [1] : vector<2x32xf32> to vector<2xf32>
    %406 = vector.shape_cast %405 : vector<2xf32> to vector<2x1xf32>
    %cst_109 = arith.constant 3.200000e+01 : f32
    %407 = vector.broadcast %cst_109 : f32 to vector<2x1xf32>
    %408 = arith.divf %406, %407 : vector<2x1xf32>
    %409 = vector.broadcast %401 : vector<2x1xf32> to vector<2x32xf32>
    %410 = arith.subf %397, %409 : vector<2x32xf32>
    %cst_110 = arith.constant 9.99999974E-6 : f32
    %411 = vector.broadcast %cst_110 : f32 to vector<2x1xf32>
    %412 = arith.addf %408, %411 : vector<2x1xf32>
    %413 = math.rsqrt %412 : vector<2x1xf32>
    %414 = vector.broadcast %413 : vector<2x1xf32> to vector<2x32xf32>
    %415 = arith.mulf %410, %414 : vector<2x32xf32>
    %416 = vector.broadcast %371 : vector<1x32xf32> to vector<2x32xf32>
    %417 = arith.mulf %415, %416 : vector<2x32xf32>
    %418 = vector.broadcast %372 : vector<1x32xf32> to vector<2x32xf32>
    %419 = arith.addf %417, %418 : vector<2x32xf32>
    %c0_111 = arith.constant 0 : index
    %c0_112 = arith.constant 0 : index
    %420 = vector.load %arg5[%c0_111, %c0_112] : memref<800x512xbf16, #tpu.memory_space<vmem>>, vector<32x512xbf16>
    %c32 = arith.constant 32 : index
    %c0_113 = arith.constant 0 : index
    %421 = vector.load %arg5[%c32, %c0_113] : memref<800x512xbf16, #tpu.memory_space<vmem>>, vector<512x512xbf16>
    %c544 = arith.constant 544 : index
    %c0_114 = arith.constant 0 : index
    %422 = vector.load %arg5[%c544, %c0_114] : memref<800x512xbf16, #tpu.memory_space<vmem>>, vector<256x512xbf16>
    %423 = arith.truncf %419 : vector<2x32xf32> to vector<2x32xbf16>
    %cst_115 = arith.constant dense<0.000000e+00> : vector<2x512xf32>
    %424 = tpu.matmul %423, %420, %cst_115 {dimension_numbers = #tpu.dot_dimension_numbers<[1], [0], [0], [1], [0, 0, 1, 1], [], []>} : vector<2x32xbf16>, vector<32x512xbf16>, vector<2x512xf32> -> vector<2x512xf32>
    %425 = vector.broadcast %373 : vector<1x512xf32> to vector<2x512xf32>
    %426 = arith.addf %424, %425 : vector<2x512xf32>
    %427 = arith.mulf %426, %426 : vector<2x512xf32>
    %428 = arith.mulf %426, %427 : vector<2x512xf32>
    %cst_116 = arith.constant 4.471500e-02 : f32
    %429 = vector.broadcast %cst_116 : f32 to vector<2x512xf32>
    %430 = arith.mulf %429, %428 : vector<2x512xf32>
    %431 = arith.addf %426, %430 : vector<2x512xf32>
    %cst_117 = arith.constant 0.797884583 : f32
    %432 = vector.broadcast %cst_117 : f32 to vector<2x512xf32>
    %433 = arith.mulf %432, %431 : vector<2x512xf32>
    %434 = math.tanh %433 : vector<2x512xf32>
    %cst_118 = arith.constant 1.000000e+00 : f32
    %435 = vector.broadcast %cst_118 : f32 to vector<2x512xf32>
    %436 = arith.addf %435, %434 : vector<2x512xf32>
    %cst_119 = arith.constant 5.000000e-01 : f32
    %437 = vector.broadcast %cst_119 : f32 to vector<2x512xf32>
    %438 = arith.mulf %437, %436 : vector<2x512xf32>
    %439 = arith.mulf %426, %438 : vector<2x512xf32>
    %440 = arith.truncf %439 : vector<2x512xf32> to vector<2x512xbf16>
    %cst_120 = arith.constant dense<0.000000e+00> : vector<2x512xf32>
    %441 = tpu.matmul %440, %421, %cst_120 {dimension_numbers = #tpu.dot_dimension_numbers<[1], [0], [0], [1], [0, 0, 1, 1], [], []>} : vector<2x512xbf16>, vector<512x512xbf16>, vector<2x512xf32> -> vector<2x512xf32>
    %442 = vector.broadcast %374 : vector<1x512xf32> to vector<2x512xf32>
    %443 = arith.addf %441, %442 : vector<2x512xf32>
    %444 = arith.mulf %443, %443 : vector<2x512xf32>
    %445 = arith.mulf %443, %444 : vector<2x512xf32>
    %cst_121 = arith.constant 4.471500e-02 : f32
    %446 = vector.broadcast %cst_121 : f32 to vector<2x512xf32>
    %447 = arith.mulf %446, %445 : vector<2x512xf32>
    %448 = arith.addf %443, %447 : vector<2x512xf32>
    %cst_122 = arith.constant 0.797884583 : f32
    %449 = vector.broadcast %cst_122 : f32 to vector<2x512xf32>
    %450 = arith.mulf %449, %448 : vector<2x512xf32>
    %451 = math.tanh %450 : vector<2x512xf32>
    %cst_123 = arith.constant 1.000000e+00 : f32
    %452 = vector.broadcast %cst_123 : f32 to vector<2x512xf32>
    %453 = arith.addf %452, %451 : vector<2x512xf32>
    %cst_124 = arith.constant 5.000000e-01 : f32
    %454 = vector.broadcast %cst_124 : f32 to vector<2x512xf32>
    %455 = arith.mulf %454, %453 : vector<2x512xf32>
    %456 = arith.mulf %443, %455 : vector<2x512xf32>
    %457 = vector.extract_strided_slice %456 {offsets = [0, 0], sizes = [2, 256], strides = [1, 1]} : vector<2x512xf32> to vector<2x256xf32>
    %458 = arith.truncf %457 : vector<2x256xf32> to vector<2x256xbf16>
    %cst_125 = arith.constant dense<0.000000e+00> : vector<2x512xf32>
    %459 = tpu.matmul %458, %422, %cst_125 {dimension_numbers = #tpu.dot_dimension_numbers<[1], [0], [0], [1], [0, 0, 1, 1], [], []>} : vector<2x256xbf16>, vector<256x512xbf16>, vector<2x512xf32> -> vector<2x512xf32>
    %460 = vector.broadcast %375 : vector<1x512xf32> to vector<2x512xf32>
    %461 = arith.addf %459, %460 : vector<2x512xf32>
    %462 = vector.extract_strided_slice %461 {offsets = [0, 0], sizes = [2, 128], strides = [1, 1]} : vector<2x512xf32> to vector<2x128xf32>
    %c0_126 = arith.constant 0 : index
    %c0_127 = arith.constant 0 : index
    %463 = vector.load %arg7[%c0_126, %c0_127] : memref<2x128xf32, #tpu.memory_space<vmem>>, vector<2x128xf32>
    tpu.vector_store %arg7[%c0_126, %c0_127], %462 {strides = array<i32>} : memref<2x128xf32, #tpu.memory_space<vmem>>, vector<2x128xf32>,
    return
  }
}

</mosaic_0001>

<bundles_post_ra>
// kernel: tile.9
= control target key start
LH: loop header
LB: loop body
LE: loop exit
PB: predicated region body
PF: predicated region fallthrough
CT: control target
= control target key end

     0   :  { %vm3_vm0 = vcmask 261120   ;;  %s34_s0 = inlined_call_operand.vmem [shape: f32[2,5,32], index: 0, kind: input, shape index: {}]   ;;  %s35_s1 = inlined_call_operand.vmem [shape: f32[10,32], index: 1, kind: output, shape index: {}]  }
   0x1   :  { %v2_v0 = vld [vmem:[%s34_s0] sm:$0x1f]   ;;  %v10_v1 = vld [vmem:[%s34_s0 + $0x8] sm:$0x1f]  }
   0x2   :  { %4 = vst.msk [vmem:[%s35_s1] sm:$0x1f] %vm3_vm0, %v2_v0   ;;  %11 = vst.msk [vmem:[%s35_s1 + $0x5] sm:$0x1f] %vm3_vm0, %v10_v1  }

// kernel: eq.8
= control target key start
LH: loop header
LB: loop body
LE: loop exit
PB: predicated region body
PF: predicated region fallthrough
CT: control target
= control target key end

     0   :  { %vm7_vm0 = vcmask 39936   ;;  %vm13_vm1 = vcmask 80936   ;;  %s39_s0 = inlined_call_operand.vmem [shape: s32[2,5], index: 0, kind: input, shape index: {}]   ;;  %s40_s1 = inlined_call_operand.vmem [shape: s32[10], index: 1, kind: output, shape index: {}]  }
   0x1   :  { %v4_v0 = vld [vmem:[%s39_s0] sm:$0x3]  ;;  %s22_s0 = smov 5  }
   0x2   :  { %5 = vst [vmem:[#allocation1] sm:$0x3] %v4_v0 }
   0x9   :  { %v10_v1 = vld [vmem:[#allocation1 + $0x1] sm:$0x1]   ;;  %v6_v2 = vld [vmem:[#allocation1] sm:$0x1]  }
   0xa   :  { %11 = vrot.lane.b32.xlu0 %v10_v1, %s22_s0  ;;  %8 = vst.msk [vmem:[#allocation0] sm:$0x1] %vm7_vm0, %v6_v2  }
  0x7c   :  { %v12_v3 = vpop.permute.xlu0 %11  }
  0x7d   :  { %14 = vst.msk [vmem:[#allocation0] sm:$0x1] %vm13_vm1, %v12_v3  }
  0x84   :  { %v18_v4 = vld [vmem:[#allocation0] sm:$0x1] }
  0x85   :  { %20 = vst [vmem:[%s40_s1] sm:$0x1] %v18_v4 }

// kernel: vit_forward.1
= control target key start
LH: loop header
LB: loop body
LE: loop exit
PB: predicated region body
PF: predicated region fallthrough
CT: control target
= control target key end

     0   :  { %12 = vsyncpa [#allocation3], 0  ;;  %s3955_s24 = smov [#allocation2]   ;;  %s4619_s0 = inlined_call_operand.vmem [shape: bf16[10,192], index: 0, kind: input, shape index: {}]   ;;  %s4620_s1 = inlined_call_operand.vmem [shape: f32[10,32], index: 1, kind: input, shape index: {}]   ;;  %s4621_s2 = inlined_call_operand.vmem [shape: f32[10,10], index: 2, kind: input, shape index: {}]   ;;  %s4622_s3 = inlined_call_operand.vmem [shape: bf16[640,128], index: 3, kind: input, shape index: {}]   ;;  %s4623_s4 = inlined_call_operand.vmem [shape: f32[2,8,128], index: 4, kind: input, shape index: {}]   ;;  %s4624_s5 = inlined_call_operand.hbm [shape: bf16[800,512], index: 5, kind: input, shape index: {}]   ;;  %s4625_s6 = inlined_call_operand.vmem [shape: f32[8,512], index: 6, kind: input, shape index: {}]   ;;  %s4626_s7 = inlined_call_operand.vmem [shape: f32[2,128], index: 7, kind: output, shape index: {}]  }
   0x1   :  { %s28_s25 = sshll.u32 %s3955_s24, 4  ;;  %s3931_s28 = scalar_lea.hbm %s4624_s5, 25600  ;;  %s29_s25 = int_to_ptr.vmem [resolvable:$true] %s28_s25 }
   0x2   :  { %p3932_p0 = scmp.ne.s32.totalorder %s4624_s5, %s3931_s28  ;;  %p3935_p1 = scmp.lt.u32.totalorder %s3931_s28, %s4624_s5 }
   0x4   :  { %p3937_p2 = pnand %p3935_p1, %p3932_p0 }
   0x6   :  { %3940 = shalt.err (!%p3937_p2)
}
   0x7   :  { %s3941_s10 = scalar_lea.vmem %s29_s25, 25600  ;;  %p3946_p4 = scmp.lt.s32.totalorder %s29_s25, %s29_s25 }
   0x8   :  { %p3942_p3 = scmp.ne.s32.totalorder %s29_s25, %s3941_s10  ;;  %p3947_p5 = scmp.lt.s32.totalorder %s3941_s10, %s3941_s10 }
   0xa   :  { %p3948_p6 = por %p3947_p5, %p3946_p4 }
   0xc   :  { %p3949_p7 = pnand %p3948_p6, %p3942_p3 }
   0xe   :  { %3952 = shalt.err (!%p3949_p7)
}
   0xf   :  { %s3956_s11 = smov 256   ;;  %s3957_s12 = smov 16  }
  0x10   :  { %34 = dma.hbm_to_vmem [thread:$0]  %s4624_s5, 25600, %s29_s25, [#allocation3], %s3956_s11, %s3956_s11, %s3957_s12  }
  0x11   :  { %3953 = dma.done.wait [#allocation3], 25600  }
  0x12   :  { %3954 = vsyncadd [#allocation3], 4294941696  ;;  %v3958_v0 = vmov 0   ;;  %v3626_v1 = vld [vmem:[%s4622_s3] sm:$0xff]   ;;  %v3627_v2 = vld [vmem:[%s4622_s3 + $0x8] sm:$0xff]   ;;  %vm148_vm0 = vcmask 523264   ;;  %v257_v42 = vlaneseq }
  0x13   :  { %152 = vmatprep.subr.bf16.mxu0 %v3958_v0  ;;  %v3628_v3 = vld [vmem:[%s4622_s3 + $0x10] sm:$0xff]   ;;  %v3629_v4 = vld [vmem:[%s4622_s3 + $0x18] sm:$0xff]   ;;  %v3630_v5 = vld [vmem:[%s4622_s3 + $0x20] sm:$0xff]   ;;  %vm228_vm1 = vcmask 261120   ;;  %vm232_vm2 = vcmask 254976   ;;  %v3959_v36 = vmov 0.0  }
  0x14   :  { %153 = vmatpush1.bf16.msra.mxu0 %v3626_v1  ;;  %v3640_v6 = vld [vmem:[%s4619_s0 + $0x4] ss:$8 sps:$4 sm:$0x1f]   ;;  %v3632_v8 = vld [vmem:[%s4622_s3 + $0x30] sm:$0xff]   ;;  %v3633_v9 = vld [vmem:[%s4622_s3 + $0x38] sm:$0xff]   ;;  %3374 = vmatprep.subr.bf16.mxu1 %v3959_v36  ;;  %vm3960_vm3 = vmmov 0  }
  0x15   :  { %154 = vmatprep.subr.bf16.mxu0 %v3958_v0  ;;  %3143 = vmatprep.mubr.msk.bf16.mxu0 %vm148_vm0, %v3640_v6  ;;  %v3631_v7 = vld [vmem:[%s4622_s3 + $0x28] sm:$0xff]   ;;  %v3634_v10 = vld [vmem:[%s4622_s3 + $0x40] sm:$0xff]   ;;  %v3636_v12 = vld [vmem:[%s4622_s3 + $0x50] sm:$0xff]   ;;  %v4116_v45 = vshrl.u32 %v257_v42, 7  ;;  %s3961_s27 = smov 96   ;;  %s3962_s28 = smov 88  }
  0x16   :  { %v3635_v11 = vld [vmem:[%s4622_s3 + $0x48] sm:$0xff]   ;;  %v3637_v13 = vld [vmem:[%s4622_s3 + $0x58] sm:$0xff]   ;;  %v193_v15 = vld [vmem:[%s4620_s1] sm:$0xff]  ;;  %3378 = vmatprep.mubr.msk.bf16.mxu1 %vm3960_vm3, %v3959_v36  ;;  %s3963_s29 = smov 120   ;;  %vm337_vm4 = vcmask 64512   ;;  %vm385_vm5 = vcmask 80896  }
  0x17   :  { %v3638_v14 = vld [vmem:[%s4619_s0] ss:$8 sps:$4 sm:$0x1f]   ;;  %v4119_v46 = vsub.s32 0, %v4116_v45  ;;  %v4129_v51 = vsub.s32 1, %v4116_v45  ;;  %v4137_v60 = vsub.s32 2, %v4116_v45 }
  0x18   :  { %155 = vmatpush1.bf16.msra.mxu0 %v3627_v2  ;;  %v194_v17 = vld [vmem:[%s4620_s1 + $0x8] sm:$0x3]  ;;  %v3641_v35 = vld [vmem:[%s4622_s3 + $0x60] sm:$0xff]   ;;  %vm389_vm6 = vcmask 74752   ;;  %s3964_s11 = smov 64   ;;  %vm415_vm7 = vcmask 1044480  }
  0x19   :  { %156 = vmatprep.subr.bf16.mxu0 %v3958_v0  ;;  %3375 = vmatpush3.bf16.msra.mxu1 %v3641_v35  ;;  %v3642_v37 = vld [vmem:[%s4622_s3 + $0x68] sm:$0xff]   ;;  %v4124_v47 = vld [vmem:[%s4623_s4] sm:$0xff]  ;;  %s3965_s13 = smov 80   ;;  %s3966_s14 = smov 112   ;;  %vm856_vm8 = vcmask 130048   ;;  %vm859_vm9 = vcmask 195584  }
  0x1a   :  { %3376 = vmatprep.subr.bf16.mxu1 %v3959_v36  ;;  %v260_v50 = vrot.slane %v4124_v47, %v4119_v46  ;;  %v266_v55 = vrot.slane %v4124_v47, %v4129_v51  ;;  %v273_v61 = vrot.slane %v4124_v47, %v4137_v60  ;;  %s3967_s15 = smov 72   ;;  %s3968_s16 = smov 56   ;;  %vm2079_vm10 = vcmask 1041408  }
  0x1b   :  { %s3969_s17 = smov 104   ;;  %s3970_s18 = smov 48   ;;  %vm3975_vm11 = vmmov 1  }
  0x1c   :  { %157 = vmatpush1.bf16.msra.mxu0 %v3628_v3  ;;  %s3971_s19 = smov 8   ;;  %s3972_s20 = smov 40   ;;  %vm3567_vm12 = vmpackc.low %vm2079_vm10, %vm3975_vm11 }
  0x1d   :  { %158 = vmatprep.subr.bf16.mxu0 %v3958_v0  ;;  %3377 = vmatpush3.bf16.msra.mxu1 %v3642_v37  ;;  %s3973_s1 = smov 24  }
  0x1e   :  { %3382 = vmatprep.subr.bf16.mxu1 %v3959_v36 }
  0x20   :  { %159 = vmatpush1.bf16.msra.mxu0 %v3629_v4 }
  0x21   :  { %160 = vmatprep.subr.bf16.mxu0 %v3958_v0 }
  0x24   :  { %161 = vmatpush1.bf16.msra.mxu0 %v3630_v5 }
  0x25   :  { %162 = vmatprep.subr.bf16.mxu0 %v3958_v0 }
  0x28   :  { %163 = vmatpush1.bf16.msra.mxu0 %v3631_v7 }
  0x29   :  { %164 = vmatprep.subr.bf16.mxu0 %v3958_v0 }
  0x2c   :  { %165 = vmatpush1.bf16.msra.mxu0 %v3632_v8 }
  0x2d   :  { %166 = vmatprep.subr.bf16.mxu0 %v3958_v0 }
  0x30   :  { %167 = vmatpush1.bf16.msra.mxu0 %v3633_v9 }
  0x31   :  { %168 = vmatprep.subr.bf16.mxu0 %v3958_v0 }
  0x34   :  { %169 = vmatpush1.bf16.msra.mxu0 %v3634_v10 }
  0x35   :  { %170 = vmatprep.subr.bf16.mxu0 %v3958_v0 }
  0x38   :  { %171 = vmatpush1.bf16.msra.mxu0 %v3635_v11  ;;  %v4160_v11 = vld [vmem:[%s4621_s2] sm:$0xff] }
  0x39   :  { %172 = vmatprep.subr.bf16.mxu0 %v3958_v0 }
  0x3c   :  { %173 = vmatpush1.bf16.msra.mxu0 %v3636_v12 }
  0x3d   :  { %174 = vmatprep.subr.bf16.mxu0 %v3958_v0 }
  0x40   :  { %175 = vmatpush1.bf16.msra.mxu0 %v3637_v13  ;;  %v4165_v13 = vld [vmem:[%s4621_s2 + $0x8] sm:$0x3] }
  0x41   :  { %3412 = vmatprep.subr.bf16.mxu0 %v3959_v36 }
  0x43   :  { %185 = vmatmul.mubr.bf16.vlgmr.msra.gmra.mrb[0].mxu0 %v3638_v14 }
  0x44   :  { %3414 = vmatprep.mubr.msk.bf16.mxu0 %vm3960_vm3, %v3959_v36 }
 0x116   :  { %v186_v16 = vpop.f32.mrb[0].mxu0 }
 0x117   :  { %v4089_v18 = vadd.f32 %v193_v15, %v186_v16  ;;  %v188_v19 = vpop.f32.mrb[1].mxu0 }
 0x118   :  { %v189_v20 = vpop.f32.mrb[2].mxu0 }
 0x119   :  { %v4091_v21 = vadd.f32 %v194_v17, %v189_v20  ;;  %v191_v22 = vpop.f32.mrb[3].mxu0  ;;  %v229_v23 = vsel %vm228_vm1, %v4089_v18, 0.0 }
 0x11a   :  { %230 = vadd.xlane.f32.xlu0 %v229_v23 }
 0x11b   :  { %v233_v24 = vsel %vm232_vm2, %v4091_v21, 0.0 }
 0x11e   :  { %234 = vadd.xlane.f32.xlu0 %v233_v24 }
 0x1a7   :  { %v231_v25 = vpop.xlane.xlu0 %230 }
 0x1a8   :  { %v237_v26 = vmul.f32 0.03125, %v231_v25 }
 0x1aa   :  { %v239_v27 = vsub.f32 %v4089_v18, %v237_v26 }
 0x1ab   :  { %v235_v28 = vpop.xlane.xlu0 %234 }
 0x1ac   :  { %v238_v29 = vmul.f32 0.03125, %v235_v28  ;;  %v241_v30 = vmul.f32 %v239_v27, %v239_v27 }
 0x1ae   :  { %v240_v31 = vsub.f32 %v4091_v21, %v238_v29  ;;  %v243_v32 = vsel %vm228_vm1, %v241_v30, 0.0 }
 0x1af   :  { %244 = vadd.xlane.f32.xlu1 %v243_v32 }
 0x1b0   :  { %v242_v33 = vmul.f32 %v240_v31, %v240_v31 }
 0x1b2   :  { %v246_v34 = vsel %vm232_vm2, %v242_v33, 0.0 }
 0x1b3   :  { %247 = vadd.xlane.f32.xlu1 %v246_v34 }
 0x23c   :  { %v245_v38 = vpop.xlane.xlu1 %244 }
 0x23d   :  { %v249_v39 = vmul.f32 0.03125, %v245_v38 }
 0x23f   :  { %v251_v40 = vadd.f32 1e-06, %v249_v39 }
 0x240   :  { %v248_v41 = vpop.xlane.xlu1 %247 }
 0x241   :  { %3825 = vrsqrt.f32 %v251_v40  ;;  %v250_v43 = vmul.f32 0.03125, %v248_v41 }
 0x243   :  { %v252_v44 = vadd.f32 1e-06, %v250_v43 }
 0x245   :  { %3827 = vrsqrt.f32 %v252_v44 }
 0x24b   :  { %v3826_v48 = vpop.eup %3825 }
 0x24c   :  { %v255_v49 = vmul.f32 %v3826_v48, %v239_v27 }
 0x24e   :  { %v261_v54 = vmul.f32 %v260_v50, %v255_v49 }
 0x24f   :  { %v3828_v52 = vpop.eup %3827 }
 0x250   :  { %v256_v53 = vmul.f32 %v3828_v52, %v240_v31  ;;  %v267_v57 = vadd.f32 %v266_v55, %v261_v54 }
 0x252   :  { %v262_v56 = vmul.f32 %v260_v50, %v256_v53 }
 0x254   :  { %v268_v58 = vadd.f32 %v266_v55, %v262_v56 }
 0x256   :  { %v269_v59 = vpack.c.bf16 %v268_v58, %v267_v57 }
 0x258   :  { %3379 = vmatmul.mubr.msk.bf16.vlgmr.msra.gmra.mrb[0].mxu1 %vm228_vm1, %v269_v59 }
 0x259   :  { %3384 = vmatprep.mubr.msk.bf16.mxu1 %vm3960_vm3, %v3959_v36 }
 0x32b   :  { %v323_v62 = vpop.f32.mrb[0].mxu1 }
 0x32c   :  { %v324_v63 = vadd.f32 %v323_v62, %v273_v61  ;;  %v3380_v1 = vpop.f32.mrb[1].mxu1 }
 0x32d   :  { %v326_v2 = vpop.f32.mrb[2].mxu1 }
 0x32e   :  { %v327_v3 = vadd.f32 %v326_v2, %v273_v61  ;;  %v3381_v4 = vpop.f32.mrb[3].mxu1  ;;  %v330_v5 = vmul.f32 0.35355338, %v324_v63 }
 0x330   :  { %v331_v6 = vmul.f32 0.35355338, %v327_v3  ;;  %v4141_v7 = vpack.c.bf16 %v327_v3, %v324_v63 }
 0x332   :  { %v4143_v8 = vpack.c.bf16 %v331_v6, %v330_v5  ;;  %335 = vrot.lane.b32.xlu0 %v4141_v7, %s3961_s27 }
 0x336   :  { %463 = vrot.lane.b32.xlu0 %v4141_v7, %s3962_s28 }
 0x33a   :  { %461 = vrot.lane.b32.xlu0 %v4143_v8, %s3963_s29 }
 0x3a4   :  { %v336_v9 = vpop.permute.xlu0 %335 }
 0x3a5   :  { %v342_v10 = vsel %vm337_vm4, %v336_v9, 0 }
 0x3a6   :  { %3383 = vmatpush3.bf16.xpose.msra.mxu1 %v342_v10 }
 0x3a7   :  { %3388 = vmatprep.subr.bf16.mxu1 %v3959_v36 }
 0x3a8   :  { %v464_v43 = vpop.permute.xlu0 %463 }
 0x3a9   :  { %v469_v48 = vsel %vm337_vm4, %v464_v43, 0 }
 0x3ac   :  { %v462_v49 = vpop.permute.xlu0 %461 }
 0x3ad   :  { %3385 = vmatmul.mubr.msk.bf16.vlgmr.msra.gmra.mrb[4].mxu1 %vm337_vm4, %v4143_v8 }
 0x3ae   :  { %3390 = vmatprep.mubr.msk.bf16.mxu1 %vm3960_vm3, %v3959_v36 }
 0x480   :  { %v378_v12 = vpop.f32.mrb[4].mxu1 }
 0x481   :  { %v379_v14 = vadd.f32 %v378_v12, %v4160_v11  ;;  %v3386_v15 = vpop.f32.mrb[5].mxu1 }
 0x482   :  { %v381_v16 = vpop.f32.mrb[6].mxu1 }
 0x483   :  { %v382_v17 = vadd.f32 %v381_v16, %v4165_v13  ;;  %v3387_v19 = vpop.f32.mrb[7].mxu1  ;;  %v386_v20 = vsel %vm385_vm5, %v379_v14, -inf }
 0x484   :  { %387 = vmax.xlane.f32.xlu1 %v386_v20 }
 0x485   :  { %v390_v22 = vsel %vm389_vm6, %v382_v17, -inf }
 0x488   :  { %391 = vmax.xlane.f32.xlu1 %v390_v22 }
 0x511   :  { %v388_v23 = vpop.xlane.xlu1 %387 }
 0x512   :  { %v393_v24 = vsub.f32 %v379_v14, %v388_v23 }
 0x514   :  { %v395_v25 = vmul.f32 1.442695, %v393_v24 }
 0x515   :  { %v392_v26 = vpop.xlane.xlu1 %391 }
 0x516   :  { %3829 = vpow2.f32 %v395_v25  ;;  %v394_v27 = vsub.f32 %v382_v17, %v392_v26 }
 0x518   :  { %v397_v28 = vmul.f32 1.442695, %v394_v27 }
 0x51a   :  { %3831 = vpow2.f32 %v397_v28 }
 0x520   :  { %v3830_v29 = vpop.eup %3829 }
 0x521   :  { %v399_v30 = vsel %vm385_vm5, %v3830_v29, 0.0 }
 0x522   :  { %400 = vadd.xlane.f32.xlu1 %v399_v30 }
 0x524   :  { %v3832_v31 = vpop.eup %3831 }
 0x525   :  { %v402_v32 = vsel %vm389_vm6, %v3832_v31, 0.0 }
 0x526   :  { %403 = vadd.xlane.f32.xlu1 %v402_v32 }
 0x537   :  { %410 = vrot.lane.b32.xlu1 %v4141_v7, %s3964_s11 }
 0x5af   :  { %v401_v33 = vpop.xlane.xlu1 %400 }
 0x5b0   :  { %3833 = vrcp.f32 %v401_v33 }
 0x5b3   :  { %v404_v34 = vpop.xlane.xlu1 %403 }
 0x5b4   :  { %3835 = vrcp.f32 %v404_v34 }
 0x5b7   :  { %v411_v35 = vpop.permute.xlu1 %410 }
 0x5b8   :  { %v417_v37 = vsel %vm415_vm7, %v411_v35, 0 }
 0x5b9   :  { %3389 = vmatpush3.bf16.msra.mxu1 %v417_v37 }
 0x5ba   :  { %3394 = vmatprep.subr.bf16.mxu1 %v3959_v36  ;;  %v3834_v38 = vpop.eup %3833 }
 0x5bb   :  { %v406_v40 = vmul.f32 %v3834_v38, %v3830_v29 }
 0x5be   :  { %v3836_v39 = vpop.eup %3835 }
 0x5bf   :  { %v408_v41 = vmul.f32 %v3836_v39, %v3832_v31 }
 0x5c1   :  { %v409_v44 = vpack.c.bf16 %v408_v41, %v406_v40 }
 0x5c3   :  { %3391 = vmatmul.mubr.msk.bf16.vlgmr.msra.gmra.mrb[8].mxu1 %vm385_vm5, %v409_v44 }
 0x5c4   :  { %3395 = vmatpush3.bf16.xpose.msra.mxu1 %v469_v48  ;;  %3396 = vmatprep.mubr.msk.bf16.mxu1 %vm3960_vm3, %v3959_v36 }
 0x5c5   :  { %3400 = vmatprep.subr.bf16.mxu1 %v3959_v36 }
 0x5cb   :  { %3397 = vmatmul.mubr.msk.bf16.vlgmr.msra.gmra.mrb[12].mxu1 %vm337_vm4, %v462_v49 }
 0x5cc   :  { %3402 = vmatprep.mubr.msk.bf16.mxu1 %vm3960_vm3, %v3959_v36 }
 0x696   :  { %v4185_v50 = vpop.f32.mrb[8].mxu1 }
 0x697   :  { %v3392_v52 = vpop.f32.mrb[9].mxu1 }
 0x698   :  { %v4187_v53 = vpop.f32.mrb[10].mxu1 }
 0x699   :  { %v3393_v54 = vpop.f32.mrb[11].mxu1 }
 0x69e   :  { %v505_v55 = vpop.f32.mrb[12].mxu1 }
 0x69f   :  { %v506_v56 = vadd.f32 %v505_v55, %v4160_v11  ;;  %v3398_v57 = vpop.f32.mrb[13].mxu1 }
 0x6a0   :  { %v508_v58 = vpop.f32.mrb[14].mxu1 }
 0x6a1   :  { %v509_v59 = vadd.f32 %v508_v58, %v4165_v13  ;;  %v3399_v61 = vpop.f32.mrb[15].mxu1  ;;  %v512_v62 = vsel %vm385_vm5, %v506_v56, -inf }
 0x6a2   :  { %513 = vmax.xlane.f32.xlu0 %v512_v62 }
 0x6a3   :  { %v515_v63 = vsel %vm389_vm6, %v509_v59, -inf }
 0x6a4   :  { %516 = vmax.xlane.f32.xlu1 %v515_v63 }
 0x6b5   :  { %586 = vrot.lane.b32.xlu1 %v4141_v7, %s3965_s13 }
 0x6b9   :  { %584 = vrot.lane.b32.xlu1 %v4143_v8, %s3966_s14 }
 0x6bd   :  { %709 = vrot.lane.b32.xlu1 %v4141_v7, %s3967_s15 }
 0x72f   :  { %v514_v1 = vpop.xlane.xlu0 %513 }
 0x730   :  { %v518_v2 = vsub.f32 %v506_v56, %v514_v1 }
 0x731   :  { %v517_v3 = vpop.xlane.xlu1 %516 }
 0x732   :  { %v520_v4 = vmul.f32 1.442695, %v518_v2  ;;  %v519_v5 = vsub.f32 %v509_v59, %v517_v3 }
 0x734   :  { %3837 = vpow2.f32 %v520_v4  ;;  %v522_v6 = vmul.f32 1.442695, %v519_v5 }
 0x735   :  { %v587_v22 = vpop.permute.xlu1 %586 }
 0x736   :  { %3839 = vpow2.f32 %v522_v6  ;;  %v592_v28 = vsel %vm337_vm4, %v587_v22, 0 }
 0x739   :  { %v585_v27 = vpop.permute.xlu1 %584 }
 0x73e   :  { %v3838_v9 = vpop.eup %3837 }
 0x73f   :  { %v524_v10 = vsel %vm385_vm5, %v3838_v9, 0.0 }
 0x740   :  { %v3840_v12 = vpop.eup %3839  ;;  %525 = vadd.xlane.f32.xlu0 %v524_v10 }
 0x741   :  { %v527_v14 = vsel %vm389_vm6, %v3840_v12, 0.0 }
 0x744   :  { %528 = vadd.xlane.f32.xlu0 %v527_v14 }
 0x75a   :  { %535 = vrot.lane.b32.xlu0 %v4141_v7, %s3968_s16 }
 0x75e   :  { %707 = vrot.lane.b32.xlu0 %v4143_v8, %s3969_s17  ;;  %v710_v8 = vpop.permute.xlu1 %709 }
 0x75f   :  { %v715_v29 = vsel %vm337_vm4, %v710_v8, 0 }
 0x7cd   :  { %v526_v15 = vpop.xlane.xlu0 %525 }
 0x7ce   :  { %3841 = vrcp.f32 %v526_v15 }
 0x7d1   :  { %v529_v16 = vpop.xlane.xlu0 %528 }
 0x7d2   :  { %3843 = vrcp.f32 %v529_v16 }
 0x7d5   :  { %v536_v17 = vpop.permute.xlu0 %535 }
 0x7d6   :  { %v541_v19 = vsel %vm415_vm7, %v536_v17, 0 }
 0x7d7   :  { %3401 = vmatpush3.bf16.msra.mxu1 %v541_v19 }
 0x7d8   :  { %3406 = vmatprep.subr.bf16.mxu1 %v3959_v36  ;;  %v3842_v20 = vpop.eup %3841 }
 0x7d9   :  { %v531_v24 = vmul.f32 %v3842_v20, %v3838_v9  ;;  %v708_v30 = vpop.permute.xlu0 %707 }
 0x7dc   :  { %v3844_v23 = vpop.eup %3843 }
 0x7dd   :  { %v533_v25 = vmul.f32 %v3844_v23, %v3840_v12 }
 0x7df   :  { %v534_v26 = vpack.c.bf16 %v533_v25, %v531_v24 }
 0x7e1   :  { %3403 = vmatmul.mubr.msk.bf16.vlgmr.msra.gmra.mrb[16].mxu1 %vm385_vm5, %v534_v26 }
 0x7e2   :  { %3407 = vmatpush3.bf16.xpose.msra.mxu1 %v592_v28  ;;  %3408 = vmatprep.mubr.msk.bf16.mxu1 %vm3960_vm3, %v3959_v36 }
 0x7e3   :  { %3418 = vmatprep.subr.bf16.mxu1 %v3959_v36 }
 0x7e9   :  { %3409 = vmatmul.mubr.msk.bf16.vlgmr.msra.gmra.mrb[20].mxu1 %vm337_vm4, %v585_v27 }
 0x7ea   :  { %3419 = vmatpush3.bf16.xpose.msra.mxu1 %v715_v29  ;;  %3420 = vmatprep.mubr.msk.bf16.mxu1 %vm3960_vm3, %v3959_v36 }
 0x7eb   :  { %3430 = vmatprep.subr.bf16.mxu1 %v3959_v36 }
 0x7f1   :  { %3421 = vmatmul.mubr.msk.bf16.vlgmr.msra.gmra.mrb[24].mxu1 %vm337_vm4, %v708_v30 }
 0x7f2   :  { %3434 = vmatprep.mubr.msk.bf16.mxu1 %vm3960_vm3, %v3959_v36 }
 0x8b4   :  { %v577_v31 = vpop.f32.mrb[16].mxu1 }
 0x8b5   :  { %v3404_v32 = vpop.f32.mrb[17].mxu1 }
 0x8b6   :  { %v580_v33 = vpop.f32.mrb[18].mxu1 }
 0x8b7   :  { %v3596_v34 = vpack.i.bf16 %v580_v33, %v577_v31  ;;  %v3405_v35 = vpop.f32.mrb[19].mxu1 }
 0x8bc   :  { %v628_v37 = vpop.f32.mrb[20].mxu1 }
 0x8bd   :  { %v629_v38 = vadd.f32 %v628_v37, %v4160_v11  ;;  %v3410_v39 = vpop.f32.mrb[21].mxu1 }
 0x8be   :  { %v631_v40 = vpop.f32.mrb[22].mxu1 }
 0x8bf   :  { %v632_v41 = vadd.f32 %v631_v40, %v4165_v13  ;;  %v3411_v43 = vpop.f32.mrb[23].mxu1  ;;  %v635_v44 = vsel %vm385_vm5, %v629_v38, -inf }
 0x8c0   :  { %636 = vmax.xlane.f32.xlu1 %v635_v44 }
 0x8c1   :  { %v638_v48 = vsel %vm389_vm6, %v632_v41, -inf }
 0x8c2   :  { %639 = vmax.xlane.f32.xlu0 %v638_v48 }
 0x8c4   :  { %v751_v49 = vpop.f32.mrb[24].mxu1 }
 0x8c5   :  { %v752_v52 = vadd.f32 %v751_v49, %v4160_v11  ;;  %v3422_v54 = vpop.f32.mrb[25].mxu1 }
 0x8c6   :  { %v754_v55 = vpop.f32.mrb[26].mxu1  ;;  %v3644_v54 = vld [vmem:[%s4622_s3 + $0x78] sm:$0xff]  }
 0x8c7   :  { %v755_v56 = vadd.f32 %v754_v55, %v4165_v13  ;;  %v3423_v57 = vpop.f32.mrb[27].mxu1  ;;  %v758_v58 = vsel %vm385_vm5, %v752_v52, -inf }
 0x8c8   :  { %759 = vmax.xlane.f32.xlu0 %v758_v58 }
 0x8c9   :  { %v761_v59 = vsel %vm389_vm6, %v755_v56, -inf }
 0x8cc   :  { %762 = vmax.xlane.f32.xlu0 %v761_v59 }
 0x94d   :  { %v637_v61 = vpop.xlane.xlu1 %636 }
 0x94e   :  { %v641_v62 = vsub.f32 %v629_v38, %v637_v61 }
 0x94f   :  { %v640_v63 = vpop.xlane.xlu0 %639 }
 0x950   :  { %v643_v1 = vmul.f32 1.442695, %v641_v62  ;;  %v642_v2 = vsub.f32 %v632_v41, %v640_v63  ;;  %v3643_v41 = vld [vmem:[%s4622_s3 + $0x70] sm:$0xff]  }
 0x951   :  { %3431 = vmatpush3.bf16.msra.mxu1 %v3643_v41 }
 0x952   :  { %3845 = vpow2.f32 %v643_v1  ;;  %v645_v3 = vmul.f32 1.442695, %v642_v2  ;;  %3432 = vmatprep.subr.bf16.mxu1 %v3959_v36 }
 0x954   :  { %3847 = vpow2.f32 %v645_v3 }
 0x955   :  { %v760_v4 = vpop.xlane.xlu0 %759  ;;  %3433 = vmatpush3.bf16.msra.mxu1 %v3644_v54 }
 0x956   :  { %v764_v5 = vsub.f32 %v752_v52, %v760_v4  ;;  %3492 = vmatprep.subr.bf16.mxu1 %v3959_v36 }
 0x958   :  { %v766_v6 = vmul.f32 1.442695, %v764_v5 }
 0x959   :  { %v763_v9 = vpop.xlane.xlu0 %762 }
 0x95a   :  { %3849 = vpow2.f32 %v766_v6  ;;  %v765_v10 = vsub.f32 %v755_v56, %v763_v9 }
 0x95c   :  { %v3846_v12 = vpop.eup %3845  ;;  %v768_v14 = vmul.f32 1.442695, %v765_v10 }
 0x95d   :  { %v647_v15 = vsel %vm385_vm5, %v3846_v12, 0.0 }
 0x95e   :  { %v3848_v16 = vpop.eup %3847  ;;  %3851 = vpow2.f32 %v768_v14  ;;  %648 = vadd.xlane.f32.xlu1 %v647_v15 }
 0x95f   :  { %v650_v17 = vsel %vm389_vm6, %v3848_v16, 0.0 }
 0x960   :  { %651 = vadd.xlane.f32.xlu0 %v650_v17 }
 0x964   :  { %v3850_v19 = vpop.eup %3849 }
 0x965   :  { %v770_v20 = vsel %vm385_vm5, %v3850_v19, 0.0 }
 0x966   :  { %771 = vadd.xlane.f32.xlu1 %v770_v20 }
 0x968   :  { %v3852_v22 = vpop.eup %3851 }
 0x969   :  { %v773_v23 = vsel %vm389_vm6, %v3852_v22, 0.0 }
 0x96a   :  { %774 = vadd.xlane.f32.xlu0 %v773_v23 }
 0x977   :  { %658 = vrot.lane.b32.xlu1 %v4141_v7, %s3970_s18 }
 0x97b   :  { %3597 = vrot.lane.b32.xlu1 %v3596_v34, %s3971_s19 }
 0x980   :  { %781 = vrot.lane.b32.xlu0 %v4141_v7, %s3972_s20 }
 0x9eb   :  { %v649_v24 = vpop.xlane.xlu1 %648 }
 0x9ec   :  { %3853 = vrcp.f32 %v649_v24 }
 0x9ed   :  { %v652_v25 = vpop.xlane.xlu0 %651 }
 0x9ee   :  { %3855 = vrcp.f32 %v652_v25 }
 0x9f3   :  { %v772_v26 = vpop.xlane.xlu1 %771 }
 0x9f4   :  { %3857 = vrcp.f32 %v772_v26 }
 0x9f6   :  { %v3854_v27 = vpop.eup %3853 }
 0x9f7   :  { %v659_v28 = vpop.permute.xlu1 %658  ;;  %v775_v8 = vpop.xlane.xlu0 %774  ;;  %v654_v31 = vmul.f32 %v3854_v27, %v3846_v12 }
 0x9f8   :  { %v3856_v29 = vpop.eup %3855  ;;  %v664_v30 = vsel %vm415_vm7, %v659_v28, 0  ;;  %3859 = vrcp.f32 %v775_v8 }
 0x9f9   :  { %v656_v32 = vmul.f32 %v3856_v29, %v3848_v16  ;;  %3413 = vmatpush3.bf16.msra.mxu0 %v664_v30 }
 0x9fa   :  { %3424 = vmatprep.subr.bf16.mxu0 %v3959_v36 }
 0x9fb   :  { %v782_v33 = vpop.permute.xlu0 %781  ;;  %v657_v7 = vpack.c.bf16 %v656_v32, %v654_v31  ;;  %v3598_v61 = vpop.permute.xlu1 %3597 }
 0x9fc   :  { %v787_v34 = vsel %vm415_vm7, %v782_v33, 0  ;;  %v3600_v63 = vunpack.i.h.bf16 %v3598_v61  ;;  %v3599_v1 = vunpack.i.l.bf16 %v3598_v61 }
 0x9fd   :  { %3415 = vmatmul.mubr.msk.bf16.vlgmr.msra.gmra.mrb[4].mxu0 %vm385_vm5, %v657_v7 }
 0x9fe   :  { %3425 = vmatpush3.bf16.msra.mxu0 %v787_v34  ;;  %3426 = vmatprep.mubr.msk.bf16.mxu0 %vm3960_vm3, %v3959_v36  ;;  %v3858_v35 = vpop.eup %3857  ;;  %v855_v5 = vsel %vm337_vm4, %v4187_v53, %v3600_v63  ;;  %v854_v6 = vsel %vm337_vm4, %v4185_v50, %v3599_v1  ;;  %v4269_v53 = vsub.s32 3, %v4116_v45 }
 0x9ff   :  { %3438 = vmatprep.subr.bf16.mxu0 %v3959_v36  ;;  %v777_v38 = vmul.f32 %v3858_v35, %v3850_v19 }
 0xa00   :  { %v866_v50 = vrot.slane %v4124_v47, %v4269_v53 }
 0xa02   :  { %v3860_v37 = vpop.eup %3859 }
 0xa03   :  { %v779_v39 = vmul.f32 %v3860_v37, %v3852_v22  ;;  %v3645_v37 = vld [vmem:[%s4622_s3 + $0x80] sm:$0xff]  }
 0xa05   :  { %v780_v40 = vpack.c.bf16 %v779_v39, %v777_v38  ;;  %v3646_v38 = vld [vmem:[%s4622_s3 + $0x88] sm:$0xff]  }
 0xa07   :  { %3427 = vmatmul.mubr.msk.bf16.vlgmr.msra.gmra.mrb[8].mxu0 %vm385_vm5, %v780_v40 }
 0xa08   :  { %3442 = vmatprep.mubr.msk.bf16.mxu0 %vm3960_vm3, %v3959_v36  ;;  %3439 = vmatpush3.bf16.msra.mxu0 %v3645_v37 }
 0xa09   :  { %3440 = vmatprep.subr.bf16.mxu0 %v3959_v36 }
 0xa0c   :  { %3441 = vmatpush3.bf16.msra.mxu0 %v3646_v38 }
 0xa0d   :  { %3446 = vmatprep.subr.bf16.mxu0 %v3959_v36 }
 0xad0   :  { %v700_v43 = vpop.f32.mrb[4].mxu0 }
 0xad1   :  { %v3416_v44 = vpop.f32.mrb[5].mxu0 }
 0xad2   :  { %v703_v48 = vpop.f32.mrb[6].mxu0 }
 0xad3   :  { %v3601_v49 = vpack.i.bf16 %v703_v48, %v700_v43  ;;  %v3417_v52 = vpop.f32.mrb[7].mxu0 }
 0xad5   :  { %3602 = vrot.lane.b32.xlu1 %v3601_v49, %s3957_s12  ;;  %v4296_v49 = vsub.s32 4, %v4116_v45 }
 0xad7   :  { %v954_v54 = vrot.slane %v4124_v47, %v4296_v49 }
 0xada   :  { %v823_v55 = vpop.f32.mrb[8].mxu0 }
 0xadb   :  { %v3428_v56 = vpop.f32.mrb[9].mxu0 }
 0xadc   :  { %v826_v57 = vpop.f32.mrb[10].mxu0  ;;  %v4301_v56 = vsub.s32 5, %v4116_v45 }
 0xadd   :  { %v3606_v58 = vpack.i.bf16 %v826_v57, %v823_v55  ;;  %v3429_v59 = vpop.f32.mrb[11].mxu0 }
 0xade   :  { %v960_v61 = vrot.slane %v4124_v47, %v4301_v56 }
 0xadf   :  { %3607 = vrot.lane.b32.xlu1 %v3606_v58, %s3973_s1 }
 0xb47   :  { %v3603_v62 = vpop.permute.xlu1 %3602 }
 0xb48   :  { %v3605_v2 = vunpack.i.h.bf16 %v3603_v62  ;;  %v3604_v3 = vunpack.i.l.bf16 %v3603_v62 }
 0xb4a   :  { %v858_v12 = vsel %vm856_vm8, %v855_v5, %v3605_v2  ;;  %v857_v14 = vsel %vm856_vm8, %v854_v6, %v3604_v3  ;;  %v3647_v3 = vld [vmem:[%s4622_s3 + $0x90] sm:$0xff]   ;;  %v3649_v5 = vld [vmem:[%s4622_s3 + $0xa0] sm:$0xff]   ;;  %v3650_v6 = vld [vmem:[%s4622_s3 + $0xa8] sm:$0xff]  }
 0xb51   :  { %v3608_v4 = vpop.permute.xlu1 %3607 }
 0xb52   :  { %v3610_v9 = vunpack.i.h.bf16 %v3608_v4  ;;  %v3609_v10 = vunpack.i.l.bf16 %v3608_v4  ;;  %v3648_v4 = vld [vmem:[%s4622_s3 + $0x98] sm:$0xff]  }
 0xb54   :  { %v861_v15 = vsel %vm859_vm9, %v858_v12, %v3610_v9  ;;  %v860_v16 = vsel %vm859_vm9, %v857_v14, %v3609_v10  ;;  %v3651_v9 = vld [vmem:[%s4622_s3 + $0xb0] sm:$0xff]   ;;  %v3652_v10 = vld [vmem:[%s4622_s3 + $0xb8] sm:$0xff]   ;;  %v3653_v12 = vld [vmem:[%s4622_s3 + $0xc0] sm:$0xff]  }
 0xb55   :  { %v862_v17 = vpack.c.bf16 %v861_v15, %v860_v16  ;;  %v3654_v14 = vld [vmem:[%s4622_s3 + $0xc8] sm:$0xff]   ;;  %v4341_v15 = vsub.s32 6, %v4116_v45 }
 0xb57   :  { %3435 = vmatmul.mubr.msk.bf16.vlgmr.msra.gmra.mrb[28].mxu1 %vm228_vm1, %v862_v17  ;;  %v967_v16 = vrot.slane %v4124_v47, %v4341_v15 }
 0xb58   :  { %3494 = vmatprep.mubr.msk.bf16.mxu1 %vm3960_vm3, %v3959_v36 }
 0xc2a   :  { %v916_v19 = vpop.f32.mrb[28].mxu1 }
 0xc2b   :  { %v917_v20 = vadd.f32 %v916_v19, %v866_v50  ;;  %v3436_v22 = vpop.f32.mrb[29].mxu1 }
 0xc2c   :  { %v919_v23 = vpop.f32.mrb[30].mxu1 }
 0xc2d   :  { %v4274_v24 = vadd.f32 %v917_v20, %v4089_v18  ;;  %v920_v25 = vadd.f32 %v919_v23, %v866_v50  ;;  %v3437_v26 = vpop.f32.mrb[31].mxu1 }
 0xc2f   :  { %v4277_v27 = vadd.f32 %v920_v25, %v4091_v21  ;;  %v925_v28 = vsel %vm228_vm1, %v4274_v24, 0.0 }
 0xc30   :  { %926 = vadd.xlane.f32.xlu0 %v925_v28 }
 0xc31   :  { %v928_v8 = vsel %vm232_vm2, %v4277_v27, 0.0 }
 0xc32   :  { %929 = vadd.xlane.f32.xlu1 %v928_v8 }
 0xcbd   :  { %v927_v29 = vpop.xlane.xlu0 %926 }
 0xcbe   :  { %v931_v30 = vmul.f32 0.03125, %v927_v29 }
 0xcbf   :  { %v930_v31 = vpop.xlane.xlu1 %929 }
 0xcc0   :  { %v933_v32 = vsub.f32 %v4274_v24, %v931_v30  ;;  %v932_v18 = vmul.f32 0.03125, %v930_v31 }
 0xcc2   :  { %v934_v33 = vsub.f32 %v4277_v27, %v932_v18  ;;  %v935_v7 = vmul.f32 %v933_v32, %v933_v32 }
 0xcc4   :  { %v937_v21 = vsel %vm228_vm1, %v935_v7, 0.0  ;;  %v936_v34 = vmul.f32 %v934_v33, %v934_v33 }
 0xcc5   :  { %938 = vadd.xlane.f32.xlu0 %v937_v21 }
 0xcc6   :  { %v940_v35 = vsel %vm232_vm2, %v936_v34, 0.0 }
 0xcc9   :  { %941 = vadd.xlane.f32.xlu0 %v940_v35 }
 0xd52   :  { %v939_v39 = vpop.xlane.xlu0 %938 }
 0xd53   :  { %v943_v40 = vmul.f32 0.03125, %v939_v39 }
 0xd55   :  { %v945_v41 = vadd.f32 1e-06, %v943_v40 }
 0xd56   :  { %v942_v43 = vpop.xlane.xlu0 %941 }
 0xd57   :  { %3861 = vrsqrt.f32 %v945_v41  ;;  %v944_v44 = vmul.f32 0.03125, %v942_v43  ;;  %v1045_v43 = vsub.s32 7, %v4116_v45 }
 0xd59   :  { %v946_v48 = vadd.f32 1e-06, %v944_v44  ;;  %v1046_v44 = vrot.slane %v4124_v47, %v1045_v43 }
 0xd5b   :  { %3863 = vrsqrt.f32 %v946_v48 }
 0xd61   :  { %v3862_v52 = vpop.eup %3861 }
 0xd62   :  { %v949_v55 = vmul.f32 %v3862_v52, %v933_v32 }
 0xd64   :  { %v955_v58 = vmul.f32 %v954_v54, %v949_v55 }
 0xd65   :  { %v3864_v57 = vpop.eup %3863 }
 0xd66   :  { %v950_v59 = vmul.f32 %v3864_v57, %v934_v33  ;;  %v961_v63 = vadd.f32 %v960_v61, %v955_v58 }
 0xd68   :  { %v956_v62 = vmul.f32 %v954_v54, %v950_v59 }
 0xd6a   :  { %v962_v1 = vadd.f32 %v960_v61, %v956_v62 }
 0xd6c   :  { %v963_v2 = vpack.c.bf16 %v962_v1, %v961_v63 }
 0xd6e   :  { %3443 = vmatmul.mubr.msk.bf16.vlgmr.msra.gmra.mrb[12].mxu0 %vm228_vm1, %v963_v2 }
 0xd6f   :  { %3462 = vmatprep.mubr.msk.bf16.mxu0 %vm3960_vm3, %v3959_v36  ;;  %3447 = vmatpush3.bf16.msra.mxu0 %v3647_v3 }
 0xd70   :  { %3448 = vmatprep.subr.bf16.mxu0 %v3959_v36 }
 0xd73   :  { %3449 = vmatpush3.bf16.msra.mxu0 %v3648_v4 }
 0xd74   :  { %3450 = vmatprep.subr.bf16.mxu0 %v3959_v36 }
 0xd77   :  { %3451 = vmatpush3.bf16.msra.mxu0 %v3649_v5 }
 0xd78   :  { %3452 = vmatprep.subr.bf16.mxu0 %v3959_v36 }
 0xd7b   :  { %3453 = vmatpush3.bf16.msra.mxu0 %v3650_v6 }
 0xd7c   :  { %3454 = vmatprep.subr.bf16.mxu0 %v3959_v36 }
 0xd7f   :  { %3455 = vmatpush3.bf16.msra.mxu0 %v3651_v9 }
 0xd80   :  { %3456 = vmatprep.subr.bf16.mxu0 %v3959_v36 }
 0xd83   :  { %3457 = vmatpush3.bf16.msra.mxu0 %v3652_v10  ;;  %v3655_v10 = vld [vmem:[%s4622_s3 + $0xd0] sm:$0xff]  }
 0xd84   :  { %3458 = vmatprep.subr.bf16.mxu0 %v3959_v36 }
 0xd87   :  { %3459 = vmatpush3.bf16.msra.mxu0 %v3653_v12  ;;  %v3656_v12 = vld [vmem:[%s4622_s3 + $0xd8] sm:$0xff]  }
 0xd88   :  { %3460 = vmatprep.subr.bf16.mxu0 %v3959_v36 }
 0xd8b   :  { %3461 = vmatpush3.bf16.msra.mxu0 %v3654_v14 }
 0xd8c   :  { %3466 = vmatprep.subr.bf16.mxu0 %v3959_v36 }
 0xe41   :  { %v1017_v17 = vpop.f32.mrb[12].mxu0 }
 0xe42   :  { %v1018_v50 = vadd.f32 %v1017_v17, %v967_v16  ;;  %v3444_v19 = vpop.f32.mrb[13].mxu0 }
 0xe43   :  { %v1020_v20 = vpop.f32.mrb[14].mxu0 }
 0xe44   :  { %v1024_v22 = vmul.f32 %v1018_v50, %v1018_v50  ;;  %v1021_v23 = vadd.f32 %v1020_v20, %v967_v16  ;;  %v3445_v25 = vpop.f32.mrb[15].mxu0 }
 0xe46   :  { %v1026_v26 = vmul.f32 %v1024_v22, %v1018_v50  ;;  %v1025_v28 = vmul.f32 %v1021_v23, %v1021_v23  ;;  %v4376_v22 = vld [vmem:[%s4623_s4 + $0x8] sm:$0xff] }
 0xe48   :  { %v1028_v8 = vmul.f32 0.044715, %v1026_v26  ;;  %v1027_v29 = vmul.f32 %v1025_v28, %v1021_v23 }
 0xe4a   :  { %v1030_v30 = vadd.f32 %v1028_v8, %v1018_v50  ;;  %v1029_v31 = vmul.f32 0.044715, %v1027_v29 }
 0xe4c   :  { %v1032_v32 = vmul.f32 0.7978846, %v1030_v30  ;;  %v1031_v18 = vadd.f32 %v1029_v31, %v1021_v23  ;;  %v1203_v30 = vrot.slane %v4376_v22, %v4129_v51 }
 0xe4e   :  { %3865 = vtanh.f32 %v1032_v32  ;;  %v1033_v33 = vmul.f32 0.7978846, %v1031_v18 }
 0xe50   :  { %3867 = vtanh.f32 %v1033_v33 }
 0xe58   :  { %v3866_v7 = vpop.eup %3865 }
 0xe59   :  { %v1036_v21 = vadd.f32 1.0, %v3866_v7  ;;  %v1210_v7 = vrot.slane %v4376_v22, %v4137_v60 }
 0xe5a   :  { %v3868_v34 = vpop.eup %3867 }
 0xe5b   :  { %v1038_v35 = vmul.f32 0.5, %v1036_v21  ;;  %v1037_v37 = vadd.f32 1.0, %v3868_v34 }
 0xe5d   :  { %v1039_v38 = vmul.f32 0.5, %v1037_v37  ;;  %v1040_v39 = vmul.f32 %v1038_v35, %v1018_v50 }
 0xe5f   :  { %v1041_v40 = vmul.f32 %v1039_v38, %v1021_v23  ;;  %v1197_v23 = vrot.slane %v4376_v22, %v4119_v46 }
 0xe61   :  { %v1042_v41 = vpack.c.bf16 %v1041_v40, %v1040_v39 }
 0xe63   :  { %3463 = vmatmul.mubr.bf16.vlgmr.msra.gmra.mrb[16].mxu0 %v1042_v41 }
 0xe64   :  { %3470 = vmatprep.mubr.msk.bf16.mxu0 %vm3960_vm3, %v3959_v36  ;;  %3467 = vmatpush3.bf16.msra.mxu0 %v3655_v10 }
 0xe65   :  { %3468 = vmatprep.subr.bf16.mxu0 %v3959_v36 }
 0xe68   :  { %3469 = vmatpush3.bf16.msra.mxu0 %v3656_v12 }
 0xe69   :  { %3474 = vmatprep.subr.bf16.mxu0 %v3959_v36 }
 0xf36   :  { %v1129_v48 = vpop.f32.mrb[16].mxu0 }
 0xf37   :  { %v1130_v52 = vadd.f32 %v1129_v48, %v1046_v44  ;;  %v3464_v54 = vpop.f32.mrb[17].mxu0 }
 0xf38   :  { %v1132_v55 = vpop.f32.mrb[18].mxu0 }
 0xf39   :  { %v4352_v57 = vadd.f32 %v1130_v52, %v4274_v24  ;;  %v1133_v58 = vadd.f32 %v1132_v55, %v1046_v44  ;;  %v3465_v59 = vpop.f32.mrb[19].mxu0 }
 0xf3b   :  { %v4355_v61 = vadd.f32 %v1133_v58, %v4277_v27  ;;  %v1168_v62 = vsel %vm228_vm1, %v4352_v57, 0.0 }
 0xf3c   :  { %1169 = vadd.xlane.f32.xlu0 %v1168_v62 }
 0xf3d   :  { %v1171_v63 = vsel %vm232_vm2, %v4355_v61, 0.0 }
 0xf3e   :  { %1172 = vadd.xlane.f32.xlu1 %v1171_v63 }
 0xfc9   :  { %v1170_v47 = vpop.xlane.xlu0 %1169 }
 0xfca   :  { %v1174_v1 = vmul.f32 0.03125, %v1170_v47 }
 0xfcb   :  { %v1173_v2 = vpop.xlane.xlu1 %1172 }
 0xfcc   :  { %v1176_v3 = vsub.f32 %v4352_v57, %v1174_v1  ;;  %v1175_v24 = vmul.f32 0.03125, %v1173_v2 }
 0xfce   :  { %v1177_v4 = vsub.f32 %v4355_v61, %v1175_v24  ;;  %v1178_v5 = vmul.f32 %v1176_v3, %v1176_v3 }
 0xfd0   :  { %v1180_v27 = vsel %vm228_vm1, %v1178_v5, 0.0  ;;  %v1179_v6 = vmul.f32 %v1177_v4, %v1177_v4 }
 0xfd1   :  { %1181 = vadd.xlane.f32.xlu0 %v1180_v27 }
 0xfd2   :  { %v1183_v9 = vsel %vm232_vm2, %v1179_v6, 0.0 }
 0xfd3   :  { %1184 = vadd.xlane.f32.xlu1 %v1183_v9 }
0x105e   :  { %v1182_v14 = vpop.xlane.xlu0 %1181 }
0x105f   :  { %v1186_v16 = vmul.f32 0.03125, %v1182_v14 }
0x1060   :  { %v1185_v17 = vpop.xlane.xlu1 %1184 }
0x1061   :  { %v1188_v50 = vadd.f32 1e-06, %v1186_v16  ;;  %v1187_v19 = vmul.f32 0.03125, %v1185_v17 }
0x1063   :  { %3869 = vrsqrt.f32 %v1188_v50  ;;  %v1189_v20 = vadd.f32 1e-06, %v1187_v19 }
0x1065   :  { %3871 = vrsqrt.f32 %v1189_v20 }
0x106d   :  { %v3870_v25 = vpop.eup %3869 }
0x106e   :  { %v1192_v26 = vmul.f32 %v3870_v25, %v1176_v3 }
0x106f   :  { %v3872_v28 = vpop.eup %3871 }
0x1070   :  { %v1198_v8 = vmul.f32 %v1197_v23, %v1192_v26  ;;  %v1193_v29 = vmul.f32 %v3872_v28, %v1177_v4 }
0x1072   :  { %v1199_v31 = vmul.f32 %v1197_v23, %v1193_v29  ;;  %v1204_v32 = vadd.f32 %v1203_v30, %v1198_v8 }
0x1074   :  { %v1205_v18 = vadd.f32 %v1203_v30, %v1199_v31 }
0x1076   :  { %v1206_v33 = vpack.c.bf16 %v1205_v18, %v1204_v32 }
0x1078   :  { %3471 = vmatmul.mubr.msk.bf16.vlgmr.msra.gmra.mrb[20].mxu0 %vm228_vm1, %v1206_v33 }
0x1079   :  { %3476 = vmatprep.mubr.msk.bf16.mxu0 %vm3960_vm3, %v3959_v36 }
0x114b   :  { %v1260_v21 = vpop.f32.mrb[20].mxu0 }
0x114c   :  { %v1261_v34 = vadd.f32 %v1260_v21, %v1210_v7  ;;  %v3472_v35 = vpop.f32.mrb[21].mxu0 }
0x114d   :  { %v1263_v37 = vpop.f32.mrb[22].mxu0 }
0x114e   :  { %v1264_v38 = vadd.f32 %v1263_v37, %v1210_v7  ;;  %v3473_v39 = vpop.f32.mrb[23].mxu0  ;;  %v1267_v40 = vmul.f32 0.35355338, %v1261_v34 }
0x1150   :  { %v1268_v41 = vmul.f32 0.35355338, %v1264_v38  ;;  %v4387_v44 = vpack.c.bf16 %v1264_v38, %v1261_v34 }
0x1152   :  { %v1269_v48 = vpack.c.bf16 %v1268_v41, %v1267_v40  ;;  %1272 = vrot.lane.b32.xlu0 %v4387_v44, %s3961_s27 }
0x1156   :  { %1396 = vrot.lane.b32.xlu0 %v4387_v44, %s3962_s28 }
0x115a   :  { %1394 = vrot.lane.b32.xlu0 %v1269_v48, %s3963_s29 }
0x115e   :  { %1519 = vrot.lane.b32.xlu0 %v4387_v44, %s3965_s13 }
0x1162   :  { %1642 = vrot.lane.b32.xlu0 %v4387_v44, %s3967_s15 }
0x11c4   :  { %v1273_v52 = vpop.permute.xlu0 %1272 }
0x11c5   :  { %v1278_v54 = vsel %vm337_vm4, %v1273_v52, 0 }
0x11c6   :  { %3475 = vmatpush3.bf16.xpose.msra.mxu0 %v1278_v54 }
0x11c7   :  { %3480 = vmatprep.subr.bf16.mxu0 %v3959_v36 }
0x11c8   :  { %v1397_v23 = vpop.permute.xlu0 %1396 }
0x11c9   :  { %v1402_v30 = vsel %vm337_vm4, %v1397_v23, 0 }
0x11cc   :  { %v1395_v29 = vpop.permute.xlu0 %1394 }
0x11cd   :  { %3477 = vmatmul.mubr.msk.bf16.vlgmr.msra.gmra.mrb[24].mxu0 %vm337_vm4, %v1269_v48 }
0x11ce   :  { %3482 = vmatprep.mubr.msk.bf16.mxu0 %vm3960_vm3, %v3959_v36 }
0x11d0   :  { %v1520_v31 = vpop.permute.xlu0 %1519 }
0x11d1   :  { %v1525_v32 = vsel %vm337_vm4, %v1520_v31, 0 }
0x11d4   :  { %v1643_v18 = vpop.permute.xlu0 %1642 }
0x11d5   :  { %v1648_v7 = vsel %vm337_vm4, %v1643_v18, 0 }
0x12a0   :  { %v1314_v55 = vpop.f32.mrb[24].mxu0 }
0x12a1   :  { %v1315_v58 = vadd.f32 %v1314_v55, %v4160_v11  ;;  %v3478_v59 = vpop.f32.mrb[25].mxu0 }
0x12a2   :  { %v1317_v62 = vpop.f32.mrb[26].mxu0 }
0x12a3   :  { %v1318_v63 = vadd.f32 %v1317_v62, %v4165_v13  ;;  %v3479_v47 = vpop.f32.mrb[27].mxu0  ;;  %v1321_v1 = vsel %vm385_vm5, %v1315_v58, -inf  ;;  %v3929_v62 = vld [vmem:[%s4621_s2] sm:$0xff] }
0x12a4   :  { %1322 = vmax.xlane.f32.xlu1 %v1321_v1 }
0x12a5   :  { %v1324_v2 = vsel %vm389_vm6, %v1318_v63, -inf }
0x12a8   :  { %1325 = vmax.xlane.f32.xlu1 %v1324_v2 }
0x1331   :  { %v1323_v3 = vpop.xlane.xlu1 %1322 }
0x1332   :  { %v1327_v24 = vsub.f32 %v1315_v58, %v1323_v3 }
0x1334   :  { %v1329_v4 = vmul.f32 1.442695, %v1327_v24 }
0x1335   :  { %v1326_v5 = vpop.xlane.xlu1 %1325 }
0x1336   :  { %3873 = vpow2.f32 %v1329_v4  ;;  %v1328_v27 = vsub.f32 %v1318_v63, %v1326_v5 }
0x1338   :  { %v1331_v6 = vmul.f32 1.442695, %v1328_v27 }
0x133a   :  { %3875 = vpow2.f32 %v1331_v6 }
0x1340   :  { %v3874_v9 = vpop.eup %3873 }
0x1341   :  { %v1333_v10 = vsel %vm385_vm5, %v3874_v9, 0.0 }
0x1342   :  { %1334 = vadd.xlane.f32.xlu1 %v1333_v10 }
0x1344   :  { %v3876_v12 = vpop.eup %3875 }
0x1345   :  { %v1336_v14 = vsel %vm389_vm6, %v3876_v12, 0.0 }
0x1346   :  { %1337 = vadd.xlane.f32.xlu1 %v1336_v14 }
0x1357   :  { %1344 = vrot.lane.b32.xlu1 %v4387_v44, %s3964_s11 }
0x135b   :  { %1517 = vrot.lane.b32.xlu1 %v1269_v48, %s3966_s14 }
0x135f   :  { %1640 = vrot.lane.b32.xlu1 %v1269_v48, %s3969_s17 }
0x13cf   :  { %v1335_v16 = vpop.xlane.xlu1 %1334 }
0x13d0   :  { %3877 = vrcp.f32 %v1335_v16 }
0x13d3   :  { %v1338_v17 = vpop.xlane.xlu1 %1337 }
0x13d4   :  { %3879 = vrcp.f32 %v1338_v17 }
0x13d7   :  { %v1345_v50 = vpop.permute.xlu1 %1344 }
0x13d8   :  { %v1350_v19 = vsel %vm415_vm7, %v1345_v50, 0 }
0x13d9   :  { %3481 = vmatpush3.bf16.msra.mxu0 %v1350_v19 }
0x13da   :  { %3486 = vmatprep.subr.bf16.mxu0 %v3959_v36  ;;  %v3878_v20 = vpop.eup %3877 }
0x13db   :  { %v1340_v26 = vmul.f32 %v3878_v20, %v3874_v9  ;;  %v1518_v33 = vpop.permute.xlu1 %1517 }
0x13de   :  { %v3880_v25 = vpop.eup %3879 }
0x13df   :  { %v1342_v28 = vmul.f32 %v3880_v25, %v3876_v12  ;;  %v1641_v21 = vpop.permute.xlu1 %1640 }
0x13e1   :  { %v1343_v8 = vpack.c.bf16 %v1342_v28, %v1340_v26 }
0x13e3   :  { %3483 = vmatmul.mubr.msk.bf16.vlgmr.msra.gmra.mrb[28].mxu0 %vm385_vm5, %v1343_v8 }
0x13e4   :  { %3487 = vmatpush3.bf16.xpose.msra.mxu0 %v1402_v30  ;;  %3488 = vmatprep.mubr.msk.bf16.mxu0 %vm3960_vm3, %v3959_v36 }
0x13e5   :  { %3498 = vmatprep.subr.bf16.mxu0 %v3959_v36 }
0x13eb   :  { %3489 = vmatmul.mubr.msk.bf16.vlgmr.msra.gmra.mrb[32].mxu0 %vm337_vm4, %v1395_v29 }
0x13ec   :  { %3499 = vmatpush3.bf16.xpose.msra.mxu0 %v1525_v32  ;;  %3500 = vmatprep.mubr.msk.bf16.mxu0 %vm3960_vm3, %v3959_v36 }
0x13ed   :  { %3510 = vmatprep.subr.bf16.mxu0 %v3959_v36 }
0x13f3   :  { %3501 = vmatmul.mubr.msk.bf16.vlgmr.msra.gmra.mrb[36].mxu0 %vm337_vm4, %v1518_v33 }
0x13f4   :  { %3511 = vmatpush3.bf16.xpose.msra.mxu0 %v1648_v7  ;;  %3512 = vmatprep.mubr.msk.bf16.mxu0 %vm3960_vm3, %v3959_v36 }
0x13f5   :  { %3522 = vmatprep.subr.bf16.mxu0 %v3959_v36 }
0x13fb   :  { %3513 = vmatmul.mubr.msk.bf16.vlgmr.msra.gmra.mrb[40].mxu0 %vm337_vm4, %v1641_v21 }
0x13fc   :  { %3526 = vmatprep.mubr.msk.bf16.mxu0 %vm3960_vm3, %v3959_v36 }
0x14b6   :  { %v4433_v34 = vpop.f32.mrb[28].mxu0 }
0x14b7   :  { %v3484_v35 = vpop.f32.mrb[29].mxu0 }
0x14b8   :  { %v4435_v37 = vpop.f32.mrb[30].mxu0 }
0x14b9   :  { %v3485_v38 = vpop.f32.mrb[31].mxu0 }
0x14be   :  { %v1438_v39 = vpop.f32.mrb[32].mxu0 }
0x14bf   :  { %v1439_v40 = vadd.f32 %v1438_v39, %v4160_v11  ;;  %v3490_v41 = vpop.f32.mrb[33].mxu0  ;;  %v3930_v11 = vld [vmem:[%s4621_s2 + $0x8] sm:$0x3] }
0x14c0   :  { %v1441_v48 = vpop.f32.mrb[34].mxu0 }
0x14c1   :  { %v1442_v52 = vadd.f32 %v1441_v48, %v4165_v13  ;;  %v3491_v54 = vpop.f32.mrb[35].mxu0  ;;  %v1445_v55 = vsel %vm385_vm5, %v1439_v40, -inf }
0x14c2   :  { %1446 = vmax.xlane.f32.xlu0 %v1445_v55 }
0x14c3   :  { %v1448_v58 = vsel %vm389_vm6, %v1442_v52, -inf }
0x14c4   :  { %1449 = vmax.xlane.f32.xlu1 %v1448_v58 }
0x14c6   :  { %v1561_v59 = vpop.f32.mrb[36].mxu0 }
0x14c7   :  { %v1562_v63 = vadd.f32 %v3929_v62, %v1561_v59  ;;  %v3502_v47 = vpop.f32.mrb[37].mxu0 }
0x14c8   :  { %v1564_v1 = vpop.f32.mrb[38].mxu0 }
0x14c9   :  { %v1565_v13 = vadd.f32 %v3930_v11, %v1564_v1  ;;  %v3503_v2 = vpop.f32.mrb[39].mxu0  ;;  %v1568_v3 = vsel %vm385_vm5, %v1562_v63, -inf }
0x14ca   :  { %1569 = vmax.xlane.f32.xlu0 %v1568_v3 }
0x14cb   :  { %v1571_v24 = vsel %vm389_vm6, %v1565_v13, -inf }
0x14ce   :  { %1572 = vmax.xlane.f32.xlu0 %v1571_v24  ;;  %v1684_v4 = vpop.f32.mrb[40].mxu0 }
0x14cf   :  { %v1685_v5 = vadd.f32 %v3929_v62, %v1684_v4  ;;  %v3514_v27 = vpop.f32.mrb[41].mxu0 }
0x14d0   :  { %v1687_v6 = vpop.f32.mrb[42].mxu0 }
0x14d1   :  { %v1688_v9 = vadd.f32 %v3930_v11, %v1687_v6  ;;  %v3515_v10 = vpop.f32.mrb[43].mxu0  ;;  %v1691_v12 = vsel %vm385_vm5, %v1685_v5, -inf }
0x14d2   :  { %1692 = vmax.xlane.f32.xlu0 %v1691_v12 }
0x14d3   :  { %v1694_v14 = vsel %vm389_vm6, %v1688_v9, -inf }
0x14d4   :  { %1695 = vmax.xlane.f32.xlu1 %v1694_v14 }
0x154f   :  { %v1447_v16 = vpop.xlane.xlu0 %1446 }
0x1550   :  { %v1451_v17 = vsub.f32 %v1439_v40, %v1447_v16 }
0x1551   :  { %v1450_v50 = vpop.xlane.xlu1 %1449 }
0x1552   :  { %v1453_v19 = vmul.f32 1.442695, %v1451_v17  ;;  %v1452_v20 = vsub.f32 %v1442_v52, %v1450_v50 }
0x1554   :  { %3881 = vpow2.f32 %v1453_v19  ;;  %v1455_v23 = vmul.f32 1.442695, %v1452_v20 }
0x1556   :  { %3883 = vpow2.f32 %v1455_v23 }
0x1557   :  { %v1570_v25 = vpop.xlane.xlu0 %1569 }
0x1558   :  { %v1574_v26 = vsub.f32 %v1562_v63, %v1570_v25 }
0x155a   :  { %v1576_v28 = vmul.f32 1.442695, %v1574_v26 }
0x155b   :  { %v1573_v8 = vpop.xlane.xlu0 %1572 }
0x155c   :  { %3885 = vpow2.f32 %v1576_v28  ;;  %v1575_v29 = vsub.f32 %v1565_v13, %v1573_v8 }
0x155e   :  { %v3882_v30 = vpop.eup %3881  ;;  %v1578_v31 = vmul.f32 1.442695, %v1575_v29 }
0x155f   :  { %v1693_v32 = vpop.xlane.xlu0 %1692  ;;  %v1457_v18 = vsel %vm385_vm5, %v3882_v30, 0.0 }
0x1560   :  { %v3884_v33 = vpop.eup %3883  ;;  %3887 = vpow2.f32 %v1578_v31  ;;  %v1697_v7 = vsub.f32 %v1685_v5, %v1693_v32  ;;  %1458 = vadd.xlane.f32.xlu0 %v1457_v18  ;;  %v3657_v32 = vld [vmem:[%s4622_s3 + $0xe0] sm:$0xff]  }
0x1561   :  { %v1460_v21 = vsel %vm389_vm6, %v3884_v33, 0.0  ;;  %v1696_v54 = vpop.xlane.xlu1 %1695  ;;  %3523 = vmatpush3.bf16.msra.mxu0 %v3657_v32  ;;  %v3659_v32 = vld [vmem:[%s4622_s3 + $0xf0] sm:$0xff]  }
0x1562   :  { %v1699_v35 = vmul.f32 1.442695, %v1697_v7  ;;  %1461 = vadd.xlane.f32.xlu1 %v1460_v21  ;;  %v1698_v55 = vsub.f32 %v1688_v9, %v1696_v54  ;;  %3524 = vmatprep.subr.bf16.mxu0 %v3959_v36 }
0x1564   :  { %3889 = vpow2.f32 %v1699_v35  ;;  %v1701_v58 = vmul.f32 1.442695, %v1698_v55 }
0x1566   :  { %v3886_v38 = vpop.eup %3885  ;;  %3891 = vpow2.f32 %v1701_v58 }
0x1567   :  { %v1580_v39 = vsel %vm385_vm5, %v3886_v38, 0.0 }
0x1568   :  { %1581 = vadd.xlane.f32.xlu0 %v1580_v39 }
0x156a   :  { %v3888_v40 = vpop.eup %3887 }
0x156b   :  { %v1583_v41 = vsel %vm389_vm6, %v3888_v40, 0.0 }
0x156c   :  { %1584 = vadd.xlane.f32.xlu1 %v1583_v41 }
0x156e   :  { %v3890_v48 = vpop.eup %3889 }
0x156f   :  { %v1703_v52 = vsel %vm385_vm5, %v3890_v48, 0.0 }
0x1570   :  { %1704 = vadd.xlane.f32.xlu0 %v1703_v52  ;;  %v3892_v59 = vpop.eup %3891 }
0x1571   :  { %v1706_v62 = vsel %vm389_vm6, %v3892_v59, 0.0 }
0x157d   :  { %1591 = vrot.lane.b32.xlu1 %v4387_v44, %s3970_s18 }
0x1586   :  { %1468 = vrot.lane.b32.xlu0 %v4387_v44, %s3968_s16 }
0x15a1   :  { %1707 = vadd.xlane.f32.xlu1 %v1706_v62 }
0x15b2   :  { %1714 = vrot.lane.b32.xlu1 %v4387_v44, %s3972_s20 }
0x15ed   :  { %v1459_v47 = vpop.xlane.xlu0 %1458 }
0x15ef   :  { %v1462_v63 = vpop.xlane.xlu1 %1461 }
0x15f0   :  { %3893 = vrcp.f32 %v1462_v63 }
0x15f1   :  { %3895 = vrcp.f32 %v1459_v47 }
0x15f5   :  { %v1582_v1 = vpop.xlane.xlu0 %1581 }
0x15f9   :  { %v1585_v11 = vpop.xlane.xlu1 %1584 }
0x15fa   :  { %3897 = vrcp.f32 %v1585_v11  ;;  %v3894_v13 = vpop.eup %3893 }
0x15fb   :  { %3899 = vrcp.f32 %v1582_v1  ;;  %v3896_v3 = vpop.eup %3895  ;;  %v1466_v24 = vmul.f32 %v3894_v13, %v3884_v33 }
0x15fc   :  { %v1464_v5 = vmul.f32 %v3896_v3, %v3882_v30 }
0x15fd   :  { %v1705_v2 = vpop.xlane.xlu0 %1704  ;;  %v1592_v6 = vpop.permute.xlu1 %1591 }
0x15fe   :  { %v1467_v9 = vpack.c.bf16 %v1466_v24, %v1464_v5  ;;  %v1597_v10 = vsel %vm415_vm7, %v1592_v6, 0  ;;  %3901 = vrcp.f32 %v1705_v2 }
0x1601   :  { %v1469_v4 = vpop.permute.xlu0 %1468 }
0x1602   :  { %v1474_v27 = vsel %vm415_vm7, %v1469_v4, 0 }
0x1603   :  { %3493 = vmatpush3.bf16.msra.mxu1 %v1474_v27 }
0x1604   :  { %3504 = vmatprep.subr.bf16.mxu1 %v3959_v36  ;;  %v3898_v44 = vpop.eup %3897 }
0x1605   :  { %v3900_v12 = vpop.eup %3899  ;;  %v1589_v14 = vmul.f32 %v3898_v44, %v3888_v40  ;;  %v3658_v40 = vld [vmem:[%s4622_s3 + $0xe8] sm:$0xff]  }
0x1606   :  { %3495 = vmatmul.mubr.msk.bf16.vlgmr.msra.gmra.mrb[32].mxu1 %vm385_vm5, %v1467_v9  ;;  %v1587_v16 = vmul.f32 %v3900_v12, %v3886_v38  ;;  %3525 = vmatpush3.bf16.msra.mxu0 %v3658_v40 }
0x1607   :  { %3505 = vmatpush3.bf16.msra.mxu1 %v1597_v10  ;;  %3506 = vmatprep.mubr.msk.bf16.mxu1 %vm3960_vm3, %v3959_v36 }
0x1608   :  { %3516 = vmatprep.subr.bf16.mxu1 %v3959_v36  ;;  %v1590_v17 = vpack.c.bf16 %v1589_v14, %v1587_v16  ;;  %v3902_v23 = vpop.eup %3901  ;;  %3538 = vmatprep.subr.bf16.mxu0 %v3959_v36 }
0x1609   :  { %v1710_v26 = vmul.f32 %v3902_v23, %v3890_v48 }
0x160e   :  { %3507 = vmatmul.mubr.msk.bf16.vlgmr.msra.gmra.mrb[36].mxu1 %vm385_vm5, %v1590_v17 }
0x160f   :  { %3518 = vmatprep.mubr.msk.bf16.mxu1 %vm3960_vm3, %v3959_v36 }
0x162e   :  { %v1708_v50 = vpop.xlane.xlu1 %1707 }
0x162f   :  { %3903 = vrcp.f32 %v1708_v50 }
0x1632   :  { %v1715_v19 = vpop.permute.xlu1 %1714 }
0x1633   :  { %v1720_v20 = vsel %vm415_vm7, %v1715_v19, 0 }
0x1634   :  { %3517 = vmatpush3.bf16.msra.mxu1 %v1720_v20 }
0x1635   :  { %3530 = vmatprep.subr.bf16.mxu1 %v3959_v36 }
0x1639   :  { %v3904_v25 = vpop.eup %3903 }
0x163a   :  { %v1712_v28 = vmul.f32 %v3904_v25, %v3892_v59 }
0x163c   :  { %v1713_v8 = vpack.c.bf16 %v1712_v28, %v1710_v26 }
0x163e   :  { %3519 = vmatmul.mubr.msk.bf16.vlgmr.msra.gmra.mrb[40].mxu1 %vm385_vm5, %v1713_v8 }
0x163f   :  { %3534 = vmatprep.mubr.msk.bf16.mxu1 %vm3960_vm3, %v3959_v36  ;;  %3531 = vmatpush3.bf16.msra.mxu1 %v3659_v32 }
0x1640   :  { %3532 = vmatprep.subr.bf16.mxu1 %v3959_v36 }
0x16d9   :  { %v1510_v29 = vpop.f32.mrb[32].mxu1 }
0x16da   :  { %v3496_v30 = vpop.f32.mrb[33].mxu1 }
0x16db   :  { %v1513_v31 = vpop.f32.mrb[34].mxu1 }
0x16dc   :  { %v3611_v18 = vpack.i.bf16 %v1513_v31, %v1510_v29  ;;  %v3497_v33 = vpop.f32.mrb[35].mxu1 }
0x16de   :  { %3612 = vrot.lane.b32.xlu1 %v3611_v18, %s3971_s19  ;;  %v3660_v18 = vld [vmem:[%s4622_s3 + $0xf8] sm:$0xff]  }
0x16df   :  { %3533 = vmatpush3.bf16.msra.mxu1 %v3660_v18 }
0x16e1   :  { %v1633_v7 = vpop.f32.mrb[36].mxu1 }
0x16e2   :  { %v3508_v21 = vpop.f32.mrb[37].mxu1 }
0x16e3   :  { %v1636_v35 = vpop.f32.mrb[38].mxu1 }
0x16e4   :  { %v3616_v38 = vpack.i.bf16 %v1636_v35, %v1633_v7  ;;  %v3509_v39 = vpop.f32.mrb[39].mxu1 }
0x16e6   :  { %3617 = vrot.lane.b32.xlu0 %v3616_v38, %s3957_s12 }
0x1711   :  { %v1756_v41 = vpop.f32.mrb[40].mxu1 }
0x1712   :  { %v3520_v48 = vpop.f32.mrb[41].mxu1 }
0x1713   :  { %v1759_v52 = vpop.f32.mrb[42].mxu1 }
0x1714   :  { %v3621_v54 = vpack.i.bf16 %v1759_v52, %v1756_v41  ;;  %v3521_v55 = vpop.f32.mrb[43].mxu1  ;;  %v1885_v41 = vrot.slane %v4376_v22, %v4296_v49 }
0x1716   :  { %3622 = vrot.lane.b32.xlu1 %v3621_v54, %s3973_s1 }
0x1750   :  { %v3613_v58 = vpop.permute.xlu1 %3612 }
0x1751   :  { %v3615_v62 = vunpack.i.h.bf16 %v3613_v58  ;;  %v3614_v63 = vunpack.i.l.bf16 %v3613_v58  ;;  %v1891_v58 = vrot.slane %v4376_v22, %v4301_v56 }
0x1753   :  { %v1788_v13 = vsel %vm337_vm4, %v4435_v37, %v3615_v62  ;;  %v1787_v2 = vsel %vm337_vm4, %v4433_v34, %v3614_v63  ;;  %v1797_v37 = vrot.slane %v4376_v22, %v4269_v53 }
0x1758   :  { %v3618_v59 = vpop.permute.xlu0 %3617 }
0x1759   :  { %v3620_v47 = vunpack.i.h.bf16 %v3618_v59  ;;  %v3619_v1 = vunpack.i.l.bf16 %v3618_v59 }
0x175b   :  { %v1789_v4 = vsel %vm856_vm8, %v1787_v2, %v3619_v1  ;;  %v1790_v5 = vsel %vm856_vm8, %v1788_v13, %v3620_v47  ;;  %v3661_v1 = vld [vmem:[%s4622_s3 + $0x100] sm:$0xff]   ;;  %v3663_v13 = vld [vmem:[%s4622_s3 + $0x110] sm:$0xff]   ;;  %v3664_v2 = vld [vmem:[%s4622_s3 + $0x118] sm:$0xff]  }
0x1788   :  { %v3623_v11 = vpop.permute.xlu1 %3622 }
0x1789   :  { %v3625_v3 = vunpack.i.h.bf16 %v3623_v11  ;;  %v3624_v24 = vunpack.i.l.bf16 %v3623_v11  ;;  %v3662_v11 = vld [vmem:[%s4622_s3 + $0x108] sm:$0xff]  }
0x178b   :  { %v1791_v27 = vsel %vm859_vm9, %v1789_v4, %v3624_v24  ;;  %v1792_v6 = vsel %vm859_vm9, %v1790_v5, %v3625_v3  ;;  %v3665_v3 = vld [vmem:[%s4622_s3 + $0x120] sm:$0xff]   ;;  %v3666_v24 = vld [vmem:[%s4622_s3 + $0x128] sm:$0xff]   ;;  %v3667_v4 = vld [vmem:[%s4622_s3 + $0x130] sm:$0xff]  }
0x178c   :  { %v1793_v9 = vpack.c.bf16 %v1792_v6, %v1791_v27  ;;  %v3668_v5 = vld [vmem:[%s4622_s3 + $0x138] sm:$0xff]   ;;  %v1898_v27 = vrot.slane %v4376_v22, %v4341_v15 }
0x178e   :  { %3527 = vmatmul.mubr.msk.bf16.vlgmr.msra.gmra.mrb[44].mxu0 %vm228_vm1, %v1793_v9 }
0x178f   :  { %3554 = vmatprep.mubr.msk.bf16.mxu0 %vm3960_vm3, %v3959_v36  ;;  %3539 = vmatpush3.bf16.msra.mxu0 %v3661_v1 }
0x1790   :  { %3540 = vmatprep.subr.bf16.mxu0 %v3959_v36 }
0x1793   :  { %3541 = vmatpush3.bf16.msra.mxu0 %v3662_v11 }
0x1794   :  { %3542 = vmatprep.subr.bf16.mxu0 %v3959_v36 }
0x1797   :  { %3543 = vmatpush3.bf16.msra.mxu0 %v3663_v13 }
0x1798   :  { %3544 = vmatprep.subr.bf16.mxu0 %v3959_v36 }
0x179b   :  { %3545 = vmatpush3.bf16.msra.mxu0 %v3664_v2 }
0x179c   :  { %3546 = vmatprep.subr.bf16.mxu0 %v3959_v36 }
0x179f   :  { %3547 = vmatpush3.bf16.msra.mxu0 %v3665_v3 }
0x17a0   :  { %3548 = vmatprep.subr.bf16.mxu0 %v3959_v36 }
0x17a3   :  { %3549 = vmatpush3.bf16.msra.mxu0 %v3666_v24 }
0x17a4   :  { %3550 = vmatprep.subr.bf16.mxu0 %v3959_v36 }
0x17a7   :  { %3551 = vmatpush3.bf16.msra.mxu0 %v3667_v4 }
0x17a8   :  { %3552 = vmatprep.subr.bf16.mxu0 %v3959_v36 }
0x17ab   :  { %3553 = vmatpush3.bf16.msra.mxu0 %v3668_v5 }
0x1861   :  { %v1847_v34 = vpop.f32.mrb[44].mxu0 }
0x1862   :  { %v1848_v44 = vadd.f32 %v1847_v34, %v1797_v37  ;;  %v3528_v10 = vpop.f32.mrb[45].mxu0 }
0x1863   :  { %v1850_v12 = vpop.f32.mrb[46].mxu0 }
0x1864   :  { %v4503_v14 = vadd.f32 %v1848_v44, %v4352_v57  ;;  %v1851_v16 = vadd.f32 %v1850_v12, %v1797_v37  ;;  %v3529_v17 = vpop.f32.mrb[47].mxu0 }
0x1866   :  { %v4506_v50 = vadd.f32 %v1851_v16, %v4355_v61  ;;  %v1856_v19 = vsel %vm228_vm1, %v4503_v14, 0.0 }
0x1867   :  { %1857 = vadd.xlane.f32.xlu0 %v1856_v19 }
0x1868   :  { %v1859_v20 = vsel %vm232_vm2, %v4506_v50, 0.0 }
0x1869   :  { %1860 = vadd.xlane.f32.xlu1 %v1859_v20 }
0x18f4   :  { %v1858_v23 = vpop.xlane.xlu0 %1857 }
0x18f5   :  { %v1862_v25 = vmul.f32 0.03125, %v1858_v23 }
0x18f6   :  { %v1861_v26 = vpop.xlane.xlu1 %1860 }
0x18f7   :  { %v1864_v28 = vsub.f32 %v4503_v14, %v1862_v25  ;;  %v1863_v57 = vmul.f32 0.03125, %v1861_v26 }
0x18f9   :  { %v1865_v8 = vsub.f32 %v4506_v50, %v1863_v57  ;;  %v1866_v29 = vmul.f32 %v1864_v28, %v1864_v28 }
0x18fb   :  { %v1868_v61 = vsel %vm228_vm1, %v1866_v29, 0.0  ;;  %v1867_v30 = vmul.f32 %v1865_v8, %v1865_v8 }
0x18fc   :  { %1869 = vadd.xlane.f32.xlu0 %v1868_v61 }
0x18fd   :  { %v1871_v31 = vsel %vm232_vm2, %v1867_v30, 0.0 }
0x1900   :  { %1872 = vadd.xlane.f32.xlu0 %v1871_v31 }
0x1989   :  { %v1870_v33 = vpop.xlane.xlu0 %1869 }
0x198a   :  { %v1874_v7 = vmul.f32 0.03125, %v1870_v33 }
0x198c   :  { %v1876_v21 = vadd.f32 1e-06, %v1874_v7 }
0x198d   :  { %v1873_v35 = vpop.xlane.xlu0 %1872 }
0x198e   :  { %3905 = vrsqrt.f32 %v1876_v21  ;;  %v1875_v38 = vmul.f32 0.03125, %v1873_v35  ;;  %v3974_v21 = vmov 0.0|0.0   ;;  %v1977_v35 = vrot.slane %v4376_v22, %v1045_v43 }
0x198f   :  { %3565 = vmatprep.subr.bf16.mxu1 %v3974_v21  ;;  %v3689_v21 = vld [vmem:[#allocation2 + $0x84] ss:$16 sps:$4 sm:$0xff]  }
0x1990   :  { %v1877_v39 = vadd.f32 1e-06, %v1875_v38 }
0x1992   :  { %3907 = vrsqrt.f32 %v1877_v39 }
0x1998   :  { %v3906_v40 = vpop.eup %3905 }
0x1999   :  { %v1880_v48 = vmul.f32 %v3906_v40, %v1864_v28 }
0x199b   :  { %v1886_v54 = vmul.f32 %v1885_v41, %v1880_v48  ;;  %v2070_v48 = vand.u32 127, %v257_v42 }
0x199c   :  { %v3908_v52 = vpop.eup %3907 }
0x199d   :  { %v1881_v55 = vmul.f32 %v3908_v52, %v1865_v8  ;;  %v1892_v62 = vadd.f32 %v1891_v58, %v1886_v54  ;;  %v2073_v52 = vmul.u32 5, %v4116_v45 }
0x199f   :  { %v1887_v59 = vmul.f32 %v1885_v41, %v1881_v55  ;;  %vm2074_vm13 = vcmp.eq.s32.totalorder %v2070_v48, %v2073_v52  ;;  %v3696_v48 = vld [vmem:[#allocation2 + $0xe0] ss:$16 sps:$4 sm:$0xff]   ;;  %v3701_v52 = vld [vmem:[#allocation2 + $0x104] ss:$16 sps:$4 sm:$0xff]  }
0x19a0   :  { %v2075_v43 = vsel %vm2074_vm13, 1.0, %v3959_v36 }
0x19a1   :  { %v1893_v63 = vadd.f32 %v1891_v58, %v1887_v59 }
0x19a3   :  { %v1894_v47 = vpack.c.bf16 %v1893_v63, %v1892_v62 }
0x19a5   :  { %3535 = vmatmul.mubr.msk.bf16.vlgmr.msra.gmra.mrb[44].mxu1 %vm228_vm1, %v1894_v47 }
0x19a6   :  { %3562 = vmatprep.mubr.msk.f32.mxu1 %vm3960_vm3, %v3959_v36  ;;  %v4578_v36 = vld [vmem:[%s4625_s6] sm:$0xff] }
0x19a7   :  { %v2173_v3 = vrot.slane %v4578_v36, %v4119_v46  ;;  %v2178_v5 = vrot.slane %v4578_v36, %v4129_v51  ;;  %v3672_v46 = vld [vmem:[#allocation2 + $0x20] ss:$16 sps:$4 sm:$0xff]   ;;  %v3677_v51 = vld [vmem:[#allocation2 + $0xc] ss:$16 sps:$4 sm:$0xff]  }
0x1a78   :  { %v1948_v6 = vpop.f32.mrb[44].mxu1 }
0x1a79   :  { %v1949_v9 = vadd.f32 %v1948_v6, %v1898_v27  ;;  %v3536_v37 = vpop.f32.mrb[45].mxu1 }
0x1a7a   :  { %v1951_v34 = vpop.f32.mrb[46].mxu1 }
0x1a7b   :  { %v1955_v44 = vmul.f32 %v1949_v9, %v1949_v9  ;;  %v1952_v10 = vadd.f32 %v1951_v34, %v1898_v27  ;;  %v3537_v12 = vpop.f32.mrb[47].mxu1 }
0x1a7d   :  { %v1957_v16 = vmul.f32 %v1955_v44, %v1949_v9  ;;  %v1956_v17 = vmul.f32 %v1952_v10, %v1952_v10 }
0x1a7f   :  { %v1959_v19 = vmul.f32 0.044715, %v1957_v16  ;;  %v1958_v20 = vmul.f32 %v1956_v17, %v1952_v10  ;;  %v3671_v16 = vld [vmem:[#allocation2 + $0x4] ss:$16 sps:$4 sm:$0xff]   ;;  %v3669_v17 = vld [vmem:[#allocation2] ss:$16 sps:$4 sm:$0xff]  }
0x1a81   :  { %v1961_v23 = vadd.f32 %v1959_v19, %v1949_v9  ;;  %v1960_v25 = vmul.f32 0.044715, %v1958_v20  ;;  %v3674_v19 = vld [vmem:[#allocation2 + $0x24] ss:$16 sps:$4 sm:$0xff]  }
0x1a83   :  { %v1963_v26 = vmul.f32 0.7978846, %v1961_v23  ;;  %v1962_v28 = vadd.f32 %v1960_v25, %v1952_v10 }
0x1a85   :  { %3909 = vtanh.f32 %v1963_v26  ;;  %v1964_v57 = vmul.f32 0.7978846, %v1962_v28  ;;  %v2196_v26 = vrot.slane %v4578_v36, %v4137_v60  ;;  %v3681_v60 = vld [vmem:[#allocation2 + $0x40] ss:$16 sps:$4 sm:$0xff]  }
0x1a87   :  { %3911 = vtanh.f32 %v1964_v57  ;;  %v2201_v57 = vrot.slane %v4578_v36, %v4269_v53  ;;  %v3684_v53 = vld [vmem:[#allocation2 + $0x60] ss:$16 sps:$4 sm:$0xff]  }
0x1a8f   :  { %v3910_v8 = vpop.eup %3909 }
0x1a90   :  { %v1967_v29 = vadd.f32 1.0, %v3910_v8 }
0x1a91   :  { %v3912_v61 = vpop.eup %3911 }
0x1a92   :  { %v1969_v30 = vmul.f32 0.5, %v1967_v29  ;;  %v1968_v31 = vadd.f32 1.0, %v3912_v61 }
0x1a94   :  { %v1970_v32 = vmul.f32 0.5, %v1968_v31  ;;  %v1971_v18 = vmul.f32 %v1969_v30, %v1949_v9  ;;  %v3675_v30 = vld [vmem:[#allocation2 + $0x8] ss:$16 sps:$4 sm:$0xff]  }
0x1a96   :  { %v1972_v33 = vmul.f32 %v1970_v32, %v1952_v10  ;;  %v3680_v32 = vld [vmem:[#allocation2 + $0x2c] ss:$16 sps:$4 sm:$0xff]  }
0x1a98   :  { %v1973_v7 = vpack.c.bf16 %v1972_v33, %v1971_v18  ;;  %v3678_v18 = vld [vmem:[#allocation2 + $0x28] ss:$16 sps:$4 sm:$0xff]   ;;  %v3683_v33 = vld [vmem:[#allocation2 + $0x44] ss:$16 sps:$4 sm:$0xff]  }
0x1a9a   :  { %3555 = vmatmul.mubr.bf16.vlgmr.msra.gmra.mrb[48].mxu0 %v1973_v7  ;;  %v3686_v7 = vld [vmem:[#allocation2 + $0x64] ss:$16 sps:$4 sm:$0xff]  }
0x1b6d   :  { %v2060_v38 = vpop.f32.mrb[48].mxu0 }
0x1b6e   :  { %v2061_v39 = vadd.f32 %v2060_v38, %v1977_v35  ;;  %v3556_v40 = vpop.f32.mrb[49].mxu0  ;;  %v3692_v38 = vld [vmem:[#allocation2 + $0xa4] ss:$16 sps:$4 sm:$0xff]  }
0x1b6f   :  { %v2063_v41 = vpop.f32.mrb[50].mxu0  ;;  %v3693_v40 = vld [vmem:[#allocation2 + $0xc0] ss:$16 sps:$4 sm:$0xff]  }
0x1b70   :  { %v2064_v54 = vadd.f32 %v2063_v41, %v1977_v35  ;;  %v3557_v55 = vpop.f32.mrb[51].mxu0  ;;  %v2067_v58 = vadd.f32 %v2061_v39, %v4503_v14  ;;  %v3687_v35 = vld [vmem:[#allocation2 + $0x80] ss:$16 sps:$4 sm:$0xff]   ;;  %v3698_v41 = vld [vmem:[#allocation2 + $0xe4] ss:$16 sps:$4 sm:$0xff]  }
0x1b71   :  { %v3690_v39 = vld [vmem:[#allocation2 + $0xa0] ss:$16 sps:$4 sm:$0xff]   ;;  %v3704_v55 = vld [vmem:[#allocation2 + $0x124] ss:$16 sps:$4 sm:$0xff]  }
0x1b72   :  { %v2068_v59 = vadd.f32 %v2064_v54, %v4506_v50  ;;  %v3699_v54 = vld [vmem:[#allocation2 + $0x100] ss:$16 sps:$4 sm:$0xff]  }
0x1b74   :  { %v3566_v62 = vpack.c.bf16 %v2068_v59, %v2067_v58  ;;  %v3702_v58 = vld [vmem:[#allocation2 + $0x120] ss:$16 sps:$4 sm:$0xff]   ;;  %v3707_v59 = vld [vmem:[#allocation2 + $0x144] ss:$16 sps:$4 sm:$0xff]  }
0x1b76   :  { %3568 = vmatpush3.bf16.msk.msra.mxu1 %vm3567_vm12, %v3566_v62  ;;  %v3705_v62 = vld [vmem:[#allocation2 + $0x140] ss:$16 sps:$4 sm:$0xff]  }
0x1b77   :  { %2367 = vmatprep.subr.bf16.mxu1 %v3671_v16  ;;  %v3789_v16 = vld [vmem:[#allocation2 + $0x4c0] ss:$16 sps:$4 sm:$0xff]  }
0x1b79   :  { %3563 = vmatmul.mubr.msk.f32.vlgmr.msra.gmra.mrb[48].mxu1 %vm385_vm5, %v2075_v43  ;;  %v3710_v43 = vld [vmem:[#allocation2 + $0x164] ss:$16 sps:$4 sm:$0xff]  }
0x1b7a   :  { %2399 = vmatprep.mubr.bf16.mxu1 %v3958_v0  ;;  %2368 = vmatpush1.bf16.msra.mxu1 %v3669_v17  ;;  %v3794_v17 = vld [vmem:[#allocation2 + $0x4e4] ss:$16 sps:$4 sm:$0xff]  }
0x1b7b   :  { %2369 = vmatprep.subr.bf16.mxu1 %v3674_v19  ;;  %v3797_v19 = vld [vmem:[#allocation2 + $0x504] ss:$16 sps:$4 sm:$0xff]  }
0x1b7e   :  { %2370 = vmatpush1.bf16.msra.mxu1 %v3672_v46  ;;  %v3792_v46 = vld [vmem:[#allocation2 + $0x4e0] ss:$16 sps:$4 sm:$0xff]  }
0x1b7f   :  { %2408 = vmatprep.subr.bf16.mxu1 %v3677_v51  ;;  %v3795_v51 = vld [vmem:[#allocation2 + $0x500] ss:$16 sps:$4 sm:$0xff]  }
0x1c4c   :  { %v2149_v42 = vpop.f32.mrb[48].mxu1 }
0x1c4d   :  { %v2157_v45 = vsel %vm232_vm2, %v2149_v42, 0.0  ;;  %v3564_v22 = vpop.f32.mrb[49].mxu1 }
0x1c4e   :  { %2158 = vadd.xlane.f32.xlu0 %v2157_v45  ;;  %v3713_v45 = vld [vmem:[#allocation2 + $0x184] ss:$16 sps:$4 sm:$0xff]   ;;  %v3711_v22 = vld [vmem:[#allocation2 + $0x180] ss:$16 sps:$4 sm:$0xff]  }
0x1cdb   :  { %v2159_v63 = vpop.xlane.xlu0 %2158 }
0x1cdc   :  { %v2160_v14 = vmul.f32 0.03125, %v2159_v63  ;;  %v3716_v63 = vld [vmem:[#allocation2 + $0x1a4] ss:$16 sps:$4 sm:$0xff]  }
0x1cde   :  { %v2161_v47 = vsub.f32 %v2149_v42, %v2160_v14  ;;  %v3708_v42 = vld [vmem:[#allocation2 + $0x160] ss:$16 sps:$4 sm:$0xff]  }
0x1cdf   :  { %v3714_v14 = vld [vmem:[#allocation2 + $0x1a0] ss:$16 sps:$4 sm:$0xff]  }
0x1ce0   :  { %v2162_v50 = vmul.f32 %v2161_v47, %v2161_v47 }
0x1ce2   :  { %v2163_v1 = vsel %vm232_vm2, %v2162_v50, 0.0  ;;  %v3717_v50 = vld [vmem:[#allocation2 + $0x1c0] ss:$16 sps:$4 sm:$0xff]  }
0x1ce3   :  { %2164 = vadd.xlane.f32.xlu1 %v2163_v1  ;;  %v3722_v1 = vld [vmem:[#allocation2 + $0x1e4] ss:$16 sps:$4 sm:$0xff]  }
0x1d70   :  { %v2165_v11 = vpop.xlane.xlu1 %2164 }
0x1d71   :  { %v2166_v13 = vmul.f32 0.03125, %v2165_v11  ;;  %v3720_v11 = vld [vmem:[#allocation2 + $0x1e0] ss:$16 sps:$4 sm:$0xff]  }
0x1d73   :  { %v2167_v2 = vadd.f32 1e-06, %v2166_v13  ;;  %v3725_v13 = vld [vmem:[#allocation2 + $0x204] ss:$16 sps:$4 sm:$0xff]  }
0x1d75   :  { %3913 = vrsqrt.f32 %v2167_v2  ;;  %v3723_v2 = vld [vmem:[#allocation2 + $0x200] ss:$16 sps:$4 sm:$0xff]  }
0x1d7f   :  { %v3914_v24 = vpop.eup %3913 }
0x1d80   :  { %v2169_v4 = vmul.f32 %v3914_v24, %v2161_v47  ;;  %v3719_v47 = vld [vmem:[#allocation2 + $0x1c4] ss:$16 sps:$4 sm:$0xff]   ;;  %v3726_v24 = vld [vmem:[#allocation2 + $0x220] ss:$16 sps:$4 sm:$0xff]  }
0x1d82   :  { %v2174_v27 = vmul.f32 %v2173_v3, %v2169_v4  ;;  %v3728_v3 = vld [vmem:[#allocation2 + $0x224] ss:$16 sps:$4 sm:$0xff]  }
0x1d83   :  { %v3731_v4 = vld [vmem:[#allocation2 + $0x244] ss:$16 sps:$4 sm:$0xff]  }
0x1d84   :  { %v2179_v6 = vadd.f32 %v2178_v5, %v2174_v27  ;;  %v3777_v5 = vld [vmem:[#allocation2 + $0x440] ss:$16 sps:$4 sm:$0xff]   ;;  %v3779_v27 = vld [vmem:[#allocation2 + $0x444] ss:$16 sps:$4 sm:$0xff]  }
0x1d85   :  { %3083 = vmatprep.subr.bf16.mxu0 %v3779_v27  ;;  %v3732_v27 = vld [vmem:[#allocation2 + $0x260] ss:$16 sps:$4 sm:$0xff]  }
0x1d86   :  { %v2180_v9 = vsel %vm232_vm2, %v2179_v6, 0.0  ;;  %3084 = vmatpush1.bf16.msra.mxu0 %v3777_v5 }
0x1d87   :  { %2181 = vadd.xlane.f32.xlu0 %v2180_v9  ;;  %v3780_v9 = vld [vmem:[#allocation2 + $0x460] ss:$16 sps:$4 sm:$0xff]  }
0x1e14   :  { %v2182_v37 = vpop.xlane.xlu0 %2181 }
0x1e15   :  { %v2183_v34 = vmul.f32 0.03125, %v2182_v37  ;;  %v3785_v37 = vld [vmem:[#allocation2 + $0x484] ss:$16 sps:$4 sm:$0xff]  }
0x1e17   :  { %v2184_v44 = vsub.f32 %v2179_v6, %v2183_v34  ;;  %v3782_v6 = vld [vmem:[#allocation2 + $0x464] ss:$16 sps:$4 sm:$0xff]   ;;  %v3783_v34 = vld [vmem:[#allocation2 + $0x480] ss:$16 sps:$4 sm:$0xff]  }
0x1e18   :  { %3085 = vmatprep.subr.bf16.mxu0 %v3782_v6 }
0x1e19   :  { %v2185_v10 = vmul.f32 %v2184_v44, %v2184_v44  ;;  %3086 = vmatpush1.bf16.msra.mxu0 %v3780_v9  ;;  %v3737_v9 = vld [vmem:[#allocation2 + $0x284] ss:$16 sps:$4 sm:$0xff]  }
0x1e1a   :  { %3087 = vmatprep.subr.bf16.mxu0 %v3785_v37 }
0x1e1b   :  { %v2186_v12 = vsel %vm232_vm2, %v2185_v10, 0.0  ;;  %v3786_v10 = vld [vmem:[#allocation2 + $0x4a0] ss:$16 sps:$4 sm:$0xff]  }
0x1e1c   :  { %2187 = vadd.xlane.f32.xlu1 %v2186_v12  ;;  %v3791_v12 = vld [vmem:[#allocation2 + $0x4c4] ss:$16 sps:$4 sm:$0xff]  }
0x1e1d   :  { %3088 = vmatpush1.bf16.msra.mxu0 %v3783_v34  ;;  %v3735_v34 = vld [vmem:[#allocation2 + $0x280] ss:$16 sps:$4 sm:$0xff]  }
0x1ea9   :  { %v2188_v20 = vpop.xlane.xlu1 %2187 }
0x1eaa   :  { %v2189_v23 = vmul.f32 0.03125, %v2188_v20  ;;  %v3800_v20 = vld [vmem:[#allocation2 + $0x524] ss:$16 sps:$4 sm:$0xff]  }
0x1eac   :  { %v2190_v25 = vadd.f32 1e-05, %v2189_v23  ;;  %v4596_v23 = vld [vmem:[%s4625_s6 + $0x8] sm:$0xff] }
0x1eae   :  { %3915 = vrsqrt.f32 %v2190_v25  ;;  %v2311_v25 = vrot.slane %v4578_v36, %v4296_v49 }
0x1eb8   :  { %v3916_v28 = vpop.eup %3915 }
0x1eb9   :  { %v2192_v8 = vmul.f32 %v3916_v28, %v2184_v44  ;;  %v3788_v44 = vld [vmem:[#allocation2 + $0x4a4] ss:$16 sps:$4 sm:$0xff]   ;;  %v2315_v28 = vrot.slane %v4596_v23, %v4296_v49 }
0x1eba   :  { %3089 = vmatprep.subr.bf16.mxu0 %v3788_v44 }
0x1ebb   :  { %v2197_v29 = vmul.f32 %v2196_v26, %v2192_v8  ;;  %3090 = vmatpush1.bf16.msra.mxu0 %v3786_v10  ;;  %v3798_v26 = vld [vmem:[#allocation2 + $0x520] ss:$16 sps:$4 sm:$0xff]  }
0x1ebc   :  { %3091 = vmatprep.subr.bf16.mxu0 %v3791_v12  ;;  %v2155_v10 = vld [vmem:[%s4625_s6 + $0x10] sm:$0xff] }
0x1ebd   :  { %v2202_v61 = vadd.f32 %v2201_v57, %v2197_v29  ;;  %v3740_v12 = vld [vmem:[#allocation2 + $0x2a4] ss:$16 sps:$4 sm:$0xff]  }
0x1ebf   :  { %v2307_v31 = vpack.c.bf16 %v2202_v61, %v2202_v61  ;;  %3092 = vmatpush1.bf16.msra.mxu0 %v3789_v16  ;;  %v2319_v16 = vrot.slane %v2155_v10, %v4296_v49 }
0x1ec0   :  { %3093 = vmatprep.subr.bf16.mxu0 %v3794_v17  ;;  %v3738_v17 = vld [vmem:[#allocation2 + $0x2a0] ss:$16 sps:$4 sm:$0xff]  }
0x1ec1   :  { %3205 = vmatmul.mubr.msk.bf16.vlgmr.msra.gmra.mrb[52].mxu1 %vm228_vm1, %v2307_v31 }
0x1ec2   :  { %2409 = vmatpush1.bf16.msra.mxu1 %v3675_v30  ;;  %2440 = vmatprep.mubr.bf16.mxu1 %v3958_v0  ;;  %v3695_v0 = vld [vmem:[#allocation2 + $0xc4] ss:$16 sps:$4 sm:$0xff]  }
0x1ec3   :  { %2410 = vmatprep.subr.bf16.mxu1 %v3680_v32  ;;  %3094 = vmatpush1.bf16.msra.mxu0 %v3792_v46  ;;  %v3743_v46 = vld [vmem:[#allocation2 + $0x2c4] ss:$16 sps:$4 sm:$0xff]  }
0x1ec4   :  { %3095 = vmatprep.subr.bf16.mxu0 %v3797_v19 }
0x1ec6   :  { %2411 = vmatpush1.bf16.msra.mxu1 %v3678_v18  ;;  %v2156_v18 = vld [vmem:[%s4625_s6 + $0x18] sm:$0xff] }
0x1ec7   :  { %2817 = vmatprep.subr.bf16.mxu1 %v3683_v33  ;;  %3096 = vmatpush1.bf16.msra.mxu0 %v3795_v51  ;;  %v3741_v51 = vld [vmem:[#allocation2 + $0x2c0] ss:$16 sps:$4 sm:$0xff]  }
0x1ec8   :  { %3097 = vmatprep.subr.bf16.mxu0 %v3800_v20  ;;  %v3746_v20 = vld [vmem:[#allocation2 + $0x2e4] ss:$16 sps:$4 sm:$0xff]  }
0x1ec9   :  { %3206 = vmatmul.mubr.msk.bf16.vlgmr.msra.gmra.mrb[56].mxu1 %vm228_vm1, %v2307_v31 }
0x1eca   :  { %2818 = vmatpush1.bf16.msra.mxu1 %v3681_v60 }
0x1ecb   :  { %2819 = vmatprep.subr.bf16.mxu1 %v3686_v7  ;;  %3098 = vmatpush1.bf16.msra.mxu0 %v3798_v26  ;;  %v3744_v26 = vld [vmem:[#allocation2 + $0x2e0] ss:$16 sps:$4 sm:$0xff]  }
0x1ece   :  { %2820 = vmatpush1.bf16.msra.mxu1 %v3684_v53  ;;  %v2323_v53 = vrot.slane %v2156_v18, %v4296_v49  ;;  %v3758_v18 = vld [vmem:[#allocation2 + $0x364] ss:$16 sps:$4 sm:$0xff]  }
0x1ecf   :  { %2821 = vmatprep.subr.bf16.mxu1 %v3689_v21 }
0x1ed2   :  { %2822 = vmatpush1.bf16.msra.mxu1 %v3687_v35 }
0x1ed3   :  { %2823 = vmatprep.subr.bf16.mxu1 %v3692_v38 }
0x1ed6   :  { %2824 = vmatpush1.bf16.msra.mxu1 %v3690_v39 }
0x1ed7   :  { %2825 = vmatprep.subr.bf16.mxu1 %v3695_v0 }
0x1eda   :  { %2826 = vmatpush1.bf16.msra.mxu1 %v3693_v40 }
0x1edb   :  { %2827 = vmatprep.subr.bf16.mxu1 %v3698_v41 }
0x1ede   :  { %2828 = vmatpush1.bf16.msra.mxu1 %v3696_v48 }
0x1edf   :  { %2829 = vmatprep.subr.bf16.mxu1 %v3701_v52 }
0x1ee2   :  { %2830 = vmatpush1.bf16.msra.mxu1 %v3699_v54 }
0x1ee3   :  { %2831 = vmatprep.subr.bf16.mxu1 %v3704_v55 }
0x1ee6   :  { %2832 = vmatpush1.bf16.msra.mxu1 %v3702_v58 }
0x1ee7   :  { %2833 = vmatprep.subr.bf16.mxu1 %v3707_v59 }
0x1eea   :  { %2834 = vmatpush1.bf16.msra.mxu1 %v3705_v62 }
0x1eeb   :  { %2835 = vmatprep.subr.bf16.mxu1 %v3710_v43 }
0x1eee   :  { %2836 = vmatpush1.bf16.msra.mxu1 %v3708_v42 }
0x1eef   :  { %2837 = vmatprep.subr.bf16.mxu1 %v3713_v45 }
0x1ef2   :  { %2838 = vmatpush1.bf16.msra.mxu1 %v3711_v22 }
0x1ef3   :  { %2839 = vmatprep.subr.bf16.mxu1 %v3716_v63 }
0x1ef6   :  { %2840 = vmatpush1.bf16.msra.mxu1 %v3714_v14 }
0x1ef7   :  { %2841 = vmatprep.subr.bf16.mxu1 %v3719_v47 }
0x1efa   :  { %2842 = vmatpush1.bf16.msra.mxu1 %v3717_v50 }
0x1efb   :  { %2843 = vmatprep.subr.bf16.mxu1 %v3722_v1 }
0x1efe   :  { %2844 = vmatpush1.bf16.msra.mxu1 %v3720_v11 }
0x1eff   :  { %2845 = vmatprep.subr.bf16.mxu1 %v3725_v13 }
0x1f02   :  { %2846 = vmatpush1.bf16.msra.mxu1 %v3723_v2  ;;  %v3729_v2 = vld [vmem:[#allocation2 + $0x240] ss:$16 sps:$4 sm:$0xff]  }
0x1f03   :  { %2847 = vmatprep.subr.bf16.mxu1 %v3728_v3 }
0x1f06   :  { %2848 = vmatpush1.bf16.msra.mxu1 %v3726_v24 }
0x1f07   :  { %2858 = vmatprep.subr.bf16.mxu1 %v3731_v4  ;;  %v3734_v4 = vld [vmem:[#allocation2 + $0x264] ss:$16 sps:$4 sm:$0xff]  }
0x1f94   :  { %v2401_v57 = vpop.f32.mrb[52].mxu1 }
0x1f95   :  { %v2402_v8 = vadd.f32 %v2401_v57, %v2311_v25  ;;  %v2403_v29 = vpop.f32.mrb[53].mxu1 }
0x1f96   :  { %v2404_v61 = vadd.f32 %v2403_v29, %v2315_v28  ;;  %v2405_v30 = vpop.f32.mrb[54].mxu1  ;;  %v3749_v28 = vld [vmem:[#allocation2 + $0x304] ss:$16 sps:$4 sm:$0xff]  }
0x1f97   :  { %v2449_v31 = vmul.f32 %v2402_v8, %v2402_v8  ;;  %v2406_v32 = vpop.f32.mrb[55].mxu1  ;;  %v3752_v29 = vld [vmem:[#allocation2 + $0x324] ss:$16 sps:$4 sm:$0xff]  }
0x1f98   :  { %v2450_v33 = vmul.f32 %v2404_v61, %v2404_v61  ;;  %v3755_v30 = vld [vmem:[#allocation2 + $0x344] ss:$16 sps:$4 sm:$0xff]   ;;  %v3753_v32 = vld [vmem:[#allocation2 + $0x340] ss:$16 sps:$4 sm:$0xff]  }
0x1f99   :  { %v2453_v60 = vmul.f32 %v2449_v31, %v2402_v8 }
0x1f9a   :  { %v2454_v7 = vmul.f32 %v2450_v33, %v2404_v61 }
0x1f9b   :  { %v2457_v21 = vmul.f32 0.044715, %v2453_v60  ;;  %v3756_v60 = vld [vmem:[#allocation2 + $0x360] ss:$16 sps:$4 sm:$0xff]  }
0x1f9c   :  { %v2458_v35 = vmul.f32 0.044715, %v2454_v7  ;;  %v2442_v38 = vpop.f32.mrb[56].mxu1  ;;  %v3761_v7 = vld [vmem:[#allocation2 + $0x384] ss:$16 sps:$4 sm:$0xff]  }
0x1f9d   :  { %v2461_v39 = vadd.f32 %v2457_v21, %v2402_v8  ;;  %v2444_v0 = vpop.f32.mrb[57].mxu1  ;;  %v2443_v19 = vadd.f32 %v2442_v38, %v2319_v16  ;;  %v3764_v21 = vld [vmem:[#allocation2 + $0x3a4] ss:$16 sps:$4 sm:$0xff]  }
0x1f9e   :  { %v2462_v40 = vadd.f32 %v2458_v35, %v2404_v61  ;;  %v2445_v41 = vadd.f32 %v2444_v0, %v2323_v53  ;;  %v2446_v48 = vpop.f32.mrb[58].mxu1  ;;  %v3759_v53 = vld [vmem:[#allocation2 + $0x380] ss:$16 sps:$4 sm:$0xff]   ;;  %v3767_v38 = vld [vmem:[#allocation2 + $0x3c4] ss:$16 sps:$4 sm:$0xff]  }
0x1f9f   :  { %v2465_v52 = vmul.f32 0.7978846, %v2461_v39  ;;  %v2447_v54 = vpop.f32.mrb[59].mxu1  ;;  %v2451_v25 = vmul.f32 %v2443_v19, %v2443_v19  ;;  %v3762_v35 = vld [vmem:[#allocation2 + $0x3a0] ss:$16 sps:$4 sm:$0xff]  }
0x1fa0   :  { %v2466_v55 = vmul.f32 0.7978846, %v2462_v40  ;;  %v2452_v58 = vmul.f32 %v2445_v41, %v2445_v41  ;;  %v3765_v39 = vld [vmem:[#allocation2 + $0x3c0] ss:$16 sps:$4 sm:$0xff]   ;;  %v3770_v0 = vld [vmem:[#allocation2 + $0x3e4] ss:$16 sps:$4 sm:$0xff]  }
0x1fa1   :  { %3917 = vtanh.f32 %v2465_v52  ;;  %v2455_v57 = vmul.f32 %v2451_v25, %v2443_v19  ;;  %v3773_v48 = vld [vmem:[#allocation2 + $0x404] ss:$16 sps:$4 sm:$0xff]   ;;  %v3771_v54 = vld [vmem:[#allocation2 + $0x400] ss:$16 sps:$4 sm:$0xff]  }
0x1fa2   :  { %3919 = vtanh.f32 %v2466_v55  ;;  %v2456_v59 = vmul.f32 %v2452_v58, %v2445_v41  ;;  %v3776_v55 = vld [vmem:[#allocation2 + $0x424] ss:$16 sps:$4 sm:$0xff]  }
0x1fa3   :  { %v2459_v49 = vmul.f32 0.044715, %v2455_v57 }
0x1fa4   :  { %v2460_v62 = vmul.f32 0.044715, %v2456_v59  ;;  %v3774_v59 = vld [vmem:[#allocation2 + $0x420] ss:$16 sps:$4 sm:$0xff]  }
0x1fa5   :  { %v2463_v31 = vadd.f32 %v2459_v49, %v2443_v19 }
0x1fa6   :  { %v2464_v43 = vadd.f32 %v2460_v62, %v2445_v41 }
0x1fa7   :  { %v2467_v33 = vmul.f32 0.7978846, %v2463_v31 }
0x1fa8   :  { %v2468_v42 = vmul.f32 0.7978846, %v2464_v43 }
0x1faa   :  { %3921 = vtanh.f32 %v2468_v42  ;;  %v3803_v42 = vld [vmem:[#allocation2 + $0x544] ss:$16 sps:$4 sm:$0xff]  }
0x1fab   :  { %v3918_v45 = vpop.eup %3917  ;;  %3923 = vtanh.f32 %v2467_v33  ;;  %3099 = vmatprep.subr.bf16.mxu0 %v3803_v42 }
0x1fac   :  { %v3920_v22 = vpop.eup %3919  ;;  %v2473_v63 = vadd.f32 1.0, %v3918_v45  ;;  %v3801_v45 = vld [vmem:[#allocation2 + $0x540] ss:$16 sps:$4 sm:$0xff]  }
0x1fad   :  { %v2474_v14 = vadd.f32 1.0, %v3920_v22  ;;  %3100 = vmatpush1.bf16.msra.mxu0 %v3801_v45  ;;  %v3806_v22 = vld [vmem:[#allocation2 + $0x564] ss:$16 sps:$4 sm:$0xff]  }
0x1fae   :  { %v2477_v47 = vmul.f32 0.5, %v2473_v63  ;;  %v3804_v63 = vld [vmem:[#allocation2 + $0x560] ss:$16 sps:$4 sm:$0xff]   ;;  %3101 = vmatprep.subr.bf16.mxu0 %v3806_v22 }
0x1faf   :  { %v2478_v50 = vmul.f32 0.5, %v2474_v14  ;;  %v3809_v14 = vld [vmem:[#allocation2 + $0x584] ss:$16 sps:$4 sm:$0xff]  }
0x1fb0   :  { %v2481_v1 = vmul.f32 %v2477_v47, %v2402_v8  ;;  %v3747_v8 = vld [vmem:[#allocation2 + $0x300] ss:$16 sps:$4 sm:$0xff]  }
0x1fb1   :  { %v2482_v11 = vmul.f32 %v2478_v50, %v2404_v61  ;;  %v3750_v61 = vld [vmem:[#allocation2 + $0x320] ss:$16 sps:$4 sm:$0xff]   ;;  %3102 = vmatpush1.bf16.msra.mxu0 %v3804_v63  ;;  %v3812_v50 = vld [vmem:[#allocation2 + $0x5a4] ss:$16 sps:$4 sm:$0xff]  }
0x1fb2   :  { %v2485_v24 = vpack.c.bf16 %v2481_v1, %v2481_v1  ;;  %v3807_v47 = vld [vmem:[#allocation2 + $0x580] ss:$16 sps:$4 sm:$0xff]   ;;  %3103 = vmatprep.subr.bf16.mxu0 %v3809_v14 }
0x1fb3   :  { %v2486_v13 = vpack.c.bf16 %v2482_v11, %v2482_v11  ;;  %v3810_v1 = vld [vmem:[#allocation2 + $0x5a0] ss:$16 sps:$4 sm:$0xff]   ;;  %v3815_v11 = vld [vmem:[#allocation2 + $0x5c4] ss:$16 sps:$4 sm:$0xff]  }
0x1fb4   :  { %v3922_v3 = vpop.eup %3921 }
0x1fb5   :  { %2849 = vmatprep.mubr.bf16.mxu1 %v2486_v13  ;;  %v2476_v5 = vadd.f32 1.0, %v3922_v3  ;;  %v3924_v40 = vpop.eup %3923  ;;  %3104 = vmatpush1.bf16.msra.mxu0 %v3807_v47  ;;  %v3813_v13 = vld [vmem:[#allocation2 + $0x5c0] ss:$16 sps:$4 sm:$0xff]  }
0x1fb6   :  { %2850 = vmatmul.mubr.bf16.vlgmr.msra.gmra.mrb[60].mxu1 %v2485_v24  ;;  %v2475_v52 = vadd.f32 1.0, %v3924_v40  ;;  %3105 = vmatprep.subr.bf16.mxu0 %v3812_v50  ;;  %v3816_v3 = vld [vmem:[#allocation2 + $0x5e0] ss:$16 sps:$4 sm:$0xff]   ;;  %v3821_v24 = vld [vmem:[#allocation2 + $0x604] ss:$16 sps:$4 sm:$0xff]  }
0x1fb7   :  { %2859 = vmatpush1.bf16.msra.mxu1 %v3729_v2  ;;  %v2480_v6 = vmul.f32 0.5, %v2476_v5  ;;  %v3818_v2 = vld [vmem:[#allocation2 + $0x5e4] ss:$16 sps:$4 sm:$0xff]  }
0x1fb8   :  { %2860 = vmatprep.subr.bf16.mxu1 %v3734_v4  ;;  %v2479_v58 = vmul.f32 0.5, %v2475_v52  ;;  %v3819_v4 = vld [vmem:[#allocation2 + $0x600] ss:$16 sps:$4 sm:$0xff]   ;;  %v3824_v5 = vld [vmem:[#allocation2 + $0x624] ss:$16 sps:$4 sm:$0xff]  }
0x1fb9   :  { %v2484_v37 = vmul.f32 %v2480_v6, %v2445_v41  ;;  %v3768_v41 = vld [vmem:[#allocation2 + $0x3e0] ss:$16 sps:$4 sm:$0xff]   ;;  %3106 = vmatpush1.bf16.msra.mxu0 %v3810_v1  ;;  %v2492_v6 = vrot.slane %v4578_v36, %v4301_v56 }
0x1fba   :  { %v2483_v62 = vmul.f32 %v2479_v58, %v2443_v19  ;;  %3107 = vmatprep.subr.bf16.mxu0 %v3815_v11 }
0x1fbb   :  { %2861 = vmatpush1.bf16.msra.mxu1 %v3732_v27  ;;  %v2488_v44 = vpack.c.bf16 %v2484_v37, %v2484_v37  ;;  %v3822_v27 = vld [vmem:[#allocation2 + $0x620] ss:$16 sps:$4 sm:$0xff]  }
0x1fbc   :  { %2862 = vmatprep.subr.bf16.mxu1 %v3737_v9  ;;  %v2487_v43 = vpack.c.bf16 %v2483_v62, %v2483_v62  ;;  %v2496_v9 = vrot.slane %v4596_v23, %v4301_v56 }
0x1fbd   :  { %2890 = vmatprep.mubr.bf16.mxu1 %v2488_v44  ;;  %3108 = vmatpush1.bf16.msra.mxu0 %v3813_v13 }
0x1fbe   :  { %3109 = vmatprep.subr.bf16.mxu0 %v3818_v2 }
0x1fbf   :  { %2863 = vmatpush1.bf16.msra.mxu1 %v3735_v34 }
0x1fc0   :  { %2864 = vmatprep.subr.bf16.mxu1 %v3740_v12 }
0x1fc1   :  { %3110 = vmatpush1.bf16.msra.mxu0 %v3816_v3 }
0x1fc2   :  { %3111 = vmatprep.subr.bf16.mxu0 %v3821_v24 }
0x1fc3   :  { %2865 = vmatpush1.bf16.msra.mxu1 %v3738_v17 }
0x1fc4   :  { %2866 = vmatprep.subr.bf16.mxu1 %v3743_v46 }
0x1fc5   :  { %3112 = vmatpush1.bf16.msra.mxu0 %v3819_v4 }
0x1fc6   :  { %3113 = vmatprep.subr.bf16.mxu0 %v3824_v5 }
0x1fc7   :  { %2867 = vmatpush1.bf16.msra.mxu1 %v3741_v51 }
0x1fc8   :  { %2868 = vmatprep.subr.bf16.mxu1 %v3746_v20 }
0x1fc9   :  { %3114 = vmatpush1.bf16.msra.mxu0 %v3822_v27 }
0x1fcb   :  { %2869 = vmatpush1.bf16.msra.mxu1 %v3744_v26 }
0x1fcc   :  { %2870 = vmatprep.subr.bf16.mxu1 %v3749_v28 }
0x1fcf   :  { %2871 = vmatpush1.bf16.msra.mxu1 %v3747_v8 }
0x1fd0   :  { %2872 = vmatprep.subr.bf16.mxu1 %v3752_v29 }
0x1fd3   :  { %2873 = vmatpush1.bf16.msra.mxu1 %v3750_v61 }
0x1fd4   :  { %2874 = vmatprep.subr.bf16.mxu1 %v3755_v30 }
0x1fd7   :  { %2875 = vmatpush1.bf16.msra.mxu1 %v3753_v32 }
0x1fd8   :  { %2876 = vmatprep.subr.bf16.mxu1 %v3758_v18 }
0x1fdb   :  { %2877 = vmatpush1.bf16.msra.mxu1 %v3756_v60  ;;  %v2922_v60 = vrot.slane %v4578_v36, %v4341_v15 }
0x1fdc   :  { %2878 = vmatprep.subr.bf16.mxu1 %v3761_v7 }
0x1fdf   :  { %2879 = vmatpush1.bf16.msra.mxu1 %v3759_v53 }
0x1fe0   :  { %2880 = vmatprep.subr.bf16.mxu1 %v3764_v21 }
0x1fe3   :  { %2881 = vmatpush1.bf16.msra.mxu1 %v3762_v35 }
0x1fe4   :  { %2882 = vmatprep.subr.bf16.mxu1 %v3767_v38 }
0x1fe7   :  { %2883 = vmatpush1.bf16.msra.mxu1 %v3765_v39 }
0x1fe8   :  { %2884 = vmatprep.subr.bf16.mxu1 %v3770_v0 }
0x1feb   :  { %2885 = vmatpush1.bf16.msra.mxu1 %v3768_v41 }
0x1fec   :  { %2886 = vmatprep.subr.bf16.mxu1 %v3773_v48 }
0x1fef   :  { %2887 = vmatpush1.bf16.msra.mxu1 %v3771_v54 }
0x1ff0   :  { %2888 = vmatprep.subr.bf16.mxu1 %v3776_v55 }
0x1ff3   :  { %2889 = vmatpush1.bf16.msra.mxu1 %v3774_v59 }
0x1ff6   :  { %2891 = vmatmul.mubr.bf16.vlgmr.msra.gmra.mrb[60].mxu1 %v2487_v43 }
0x20c9   :  { %v2892_v37 = vpop.f32.mrb[60].mxu1 }
0x20ca   :  { %v3569_v34 = vadd.f32 %v2892_v37, %v2492_v6  ;;  %v2894_v44 = vpop.f32.mrb[61].mxu1 }
0x20cb   :  { %v3570_v10 = vadd.f32 %v2894_v44, %v2496_v9  ;;  %v2896_v12 = vpop.f32.mrb[62].mxu1 }
0x20cc   :  { %v2899_v16 = vmul.f32 %v3569_v34, %v3569_v34  ;;  %v2897_v17 = vpop.f32.mrb[63].mxu1 }
0x20cd   :  { %v2900_v46 = vmul.f32 %v3570_v10, %v3570_v10 }
0x20ce   :  { %v2901_v19 = vmul.f32 %v3569_v34, %v2899_v16 }
0x20cf   :  { %v2902_v51 = vmul.f32 %v3570_v10, %v2900_v46 }
0x20d0   :  { %v2903_v20 = vmul.f32 0.044715, %v2901_v19 }
0x20d1   :  { %v2904_v25 = vmul.f32 0.044715, %v2902_v51 }
0x20d2   :  { %v2905_v26 = vadd.f32 %v3569_v34, %v2903_v20 }
0x20d3   :  { %v2906_v28 = vadd.f32 %v3570_v10, %v2904_v25 }
0x20d4   :  { %v2907_v57 = vmul.f32 0.7978846, %v2905_v26 }
0x20d5   :  { %v2908_v8 = vmul.f32 0.7978846, %v2906_v28 }
0x20d6   :  { %3925 = vtanh.f32 %v2907_v57 }
0x20d7   :  { %3927 = vtanh.f32 %v2908_v8 }
0x20e0   :  { %v3926_v29 = vpop.eup %3925 }
0x20e1   :  { %v3928_v56 = vpop.eup %3927  ;;  %v2911_v23 = vadd.f32 1.0, %v3926_v29 }
0x20e2   :  { %v2912_v49 = vadd.f32 1.0, %v3928_v56 }
0x20e3   :  { %v2913_v61 = vmul.f32 0.5, %v2911_v23 }
0x20e4   :  { %v2914_v30 = vmul.f32 0.5, %v2912_v49 }
0x20e5   :  { %v2915_v31 = vmul.f32 %v3569_v34, %v2913_v61 }
0x20e6   :  { %v2916_v32 = vmul.f32 %v3570_v10, %v2914_v30 }
0x20e7   :  { %v2917_v33 = vpack.c.bf16 %v2915_v31, %v2915_v31 }
0x20e8   :  { %v2918_v18 = vpack.c.bf16 %v2916_v32, %v2916_v32 }
0x20ea   :  { %3115 = vmatprep.mubr.bf16.mxu0 %v2918_v18 }
0x20eb   :  { %3116 = vmatmul.mubr.bf16.vlgmr.msra.gmra.mrb[52].mxu0 %v2917_v33 }
0x21be   :  { %v3117_v7 = vpop.f32.mrb[52].mxu0 }
0x21bf   :  { %v3118_v53 = vadd.f32 %v3117_v7, %v2922_v60  ;;  %v3119_v21 = vpop.f32.mrb[53].mxu0 }
0x21c0   :  { %v3120_v35 = vpop.f32.mrb[54].mxu0 }
0x21c1   :  { %3123 = vst [vmem:[%s4626_s7] sm:$0x3] %v3118_v53  ;;  %v3121_v38 = vpop.f32.mrb[55].mxu0 }
0x21c2   :  { %3128 = vsyncpa [#allocation3], 1 }

</bundles_post_ra>
